<compile_context>
chip_gen: v6e
topology: v6e:2x2x1
jax: 0.10.0
libtpu: 0.0.40
codegen_flags: <defaults>
</compile_context>

<pallas_src>
import functools

import numpy as np
import jax
import jax.numpy as jnp
from jax.experimental import pallas as pl
from jax.experimental.pallas import tpu as pltpu


# ----------------------------------------------------------------------------
# Parameter setup (glue): NVAE autoregressive masks + weight normalization
# ----------------------------------------------------------------------------
def channel_mask(c_in, g_in, c_out, zero_diag):
    assert c_in % c_out == 0 or c_out % c_in == 0
    assert g_in == 1 or g_in == c_in
    if g_in == 1:
        mask = np.ones([c_out, c_in], dtype=np.float32)
        if c_out >= c_in:
            ratio = c_out // c_in
            for i in range(c_in):
                mask[i * ratio:(i + 1) * ratio, i + 1:] = 0
                if zero_diag:
                    mask[i * ratio:(i + 1) * ratio, i:i + 1] = 0
        else:
            ratio = c_in // c_out
            for i in range(c_out):
                mask[i:i + 1, (i + 1) * ratio:] = 0
                if zero_diag:
                    mask[i:i + 1, i * ratio:(i + 1) * ratio] = 0
    else:  # depthwise
        mask = np.ones([c_out, c_in // g_in], dtype=np.float32)
        if zero_diag:
            mask = 0.0 * mask
    return mask


def create_conv_mask(kernel_size, c_in, g_in, c_out, zero_diag, mirror):
    m = (kernel_size - 1) // 2
    mask = np.ones([c_out, c_in // g_in, kernel_size, kernel_size], dtype=np.float32)
    mask[:, :, m:, :] = 0
    mask[:, :, m, :m] = 1
    mask[:, :, m, m] = channel_mask(c_in, g_in, c_out, zero_diag)
    if mirror:
        mask = np.copy(mask[:, :, ::-1, ::-1])
    return mask


def _ar_weight_norm(w_raw, mask, extra_log_coeff=0.0):
    """ARConv2d: masked weight + weight-norm, log_weight_norm at its init value."""
    wm = w_raw * mask
    norm = jnp.sqrt(jnp.sum(wm * wm, axis=(1, 2, 3), keepdims=True))
    log_wn = jnp.log(norm + 1e-2) + extra_log_coeff   # init of log_weight_norm
    return jnp.exp(log_wn) * wm / (norm + 1e-5)


def _block_diag(w, batch):
    """(o, i) -> (batch*o, batch*i) block-diagonal replication."""
    o, i = w.shape
    bd = jnp.zeros((batch * o, batch * i), w.dtype)
    for b in range(batch):
        bd = bd.at[b * o:(b + 1) * o, b * i:(b + 1) * i].set(w)
    return bd


def init_cell_ar_params(key, nz, hid, batch, H, W, mirror=False):
    k1, k2, k3, kb = jax.random.split(key, 4)
    # raw weights (deterministic synthetic init), PyTorch OIHW layout
    w1_raw = jax.random.normal(k1, (hid, nz, 3, 3), jnp.float32) * 0.1
    w2_raw = jax.random.normal(k2, (hid, 1, 5, 5), jnp.float32) * 0.1
    w3_raw = jax.random.normal(k3, (nz, hid, 1, 1), jnp.float32) * 0.1
    b3 = jax.random.normal(kb, (nz,), jnp.float32) * 0.01

    m1_np = create_conv_mask(3, nz, 1, hid, zero_diag=True, mirror=mirror)
    m2_np = create_conv_mask(5, hid, hid, hid, zero_diag=False, mirror=mirror)
    m3_np = create_conv_mask(1, hid, 1, nz, zero_diag=False, mirror=mirror)

    w1_eff = _ar_weight_norm(w1_raw, jnp.asarray(m1_np))
    w2_eff = _ar_weight_norm(w2_raw, jnp.asarray(m2_np))
    # ARELUConv: log_weight_norm += log(weight_init_coeff=0.1)
    w3_eff = _ar_weight_norm(w3_raw, jnp.asarray(m3_np), extra_log_coeff=float(np.log(0.1)))

    # ---- static nonzero-tap lists: the AR masks zero entire taps -> skip them
    taps1 = tuple((ky - 1, kx - 1) for ky in range(3) for kx in range(3)
                  if m1_np[:, :, ky, kx].any())                     # 5 of 9 taps
    taps2 = tuple((ky - 2, kx - 2) for ky in range(5) for kx in range(5)
                  if m2_np[:, :, ky, kx].any())                     # 13 of 25 taps

    # ---- kernel-side packed weights, batch folded along the sublane axis:
    #      batch-block-diagonal matmul weights process all B elements at once.
    w1_blk = jnp.stack([_block_diag(w1_eff[:, :, dy + 1, dx + 1], batch)
                        for (dy, dx) in taps1], axis=0)             # (nt1, B*hid, B*nz)
    w2_tap = jnp.stack([w2_eff[:, 0, dy + 2, dx + 2] for (dy, dx) in taps2],
                       axis=1)                                      # (hid, nt2)
    w2_tiled = jnp.tile(w2_tap, (batch, 1))                         # (B*hid, nt2)
    w3_blk = _block_diag(w3_eff[:, :, 0, 0], batch)                 # (B*nz, B*hid)
    b3_col = jnp.tile(b3[:, None], (batch, 1))                      # (B*nz, 1)

    # ---- per-offset 0/1 validity rows (zero out roll wrap-around = zero pad).
    #      One row per distinct non-zero (dy, dx); taps1 offsets are a subset
    #      of taps2 offsets, so the table covers both convs.
    offsets = sorted(set(taps1 + taps2) - {(0, 0)})
    off_row = {off: r for r, off in enumerate(offsets)}
    yy, xx = np.meshgrid(np.arange(H), np.arange(W), indexing="ij")
    rows = []
    for (dy, dx) in offsets:
        valid = ((yy + dy >= 0) & (yy + dy < H) &
                 (xx + dx >= 0) & (xx + dx < W)).astype(np.float32)
        rows.append(valid.reshape(-1))
    cmask = jnp.asarray(np.stack(rows, axis=0))                     # (n_off, H*W)

    kernel_params = dict(w1=w1_blk, w2=w2_tiled, w3=w3_blk, b3=b3_col,
                         cmask=cmask, taps1=taps1, taps2=taps2, off_row=off_row)

    # HWIO layouts (used by the pure-JAX reference)
    ref_params = (jnp.transpose(w1_eff, (2, 3, 1, 0)),   # (3,3,nz,hid)
                  jnp.transpose(w2_eff, (2, 3, 1, 0)),   # (5,5,1,hid)
                  jnp.transpose(w3_eff, (2, 3, 1, 0)),   # (1,1,hid,nz)
                  b3)
    return kernel_params, ref_params


# ----------------------------------------------------------------------------
# Pallas kernel
# ----------------------------------------------------------------------------
def _elu(x):
    return jnp.where(x > 0, x, jnp.exp(jnp.minimum(x, 0.0)) - 1.0)


def cell_ar_kernel(z_ref, ftr_ref, w1_ref, w2_ref, w3_ref, b3_ref, cmask_ref,
                   out_ref, *, W, HW, taps1, taps2, off_row):
    # z_ref   : (B*NZ,  HW)  -- batch stacked along sublanes, lane-dense HW
    # ftr_ref : (B*HID, HW)
    # w1_ref  : (ntaps1, B*HID, B*NZ)   batch-block-diagonal per-tap weights
    # w2_ref  : (B*HID, ntaps2)         depthwise per-tap weights
    # w3_ref  : (B*NZ, B*HID), b3_ref: (B*NZ, 1)
    # cmask_ref: (n_off, HW)            per-offset 0/1 validity rows
    z = z_ref[...]
    ftr = ftr_ref[...]
    w2 = w2_ref[...]

    def shift_mask(xv, off):
        # spatial shift by (dy, dx): out[p] = xv[p + dy*W + dx], zeros outside.
        # pltpu.roll keeps the shift in the (otherwise idle) XLU slot; the
        # precomputed validity row kills row/column wrap-around.  Batch lives
        # in sublanes, so rolling along lanes never mixes batch elements.
        dy, dx = off
        s = dy * W + dx
        if s == 0:
            return xv
        rolled = pltpu.roll(xv, (-s) % HW, 1)
        row = cmask_ref[pl.ds(off_row[off], 1), :]      # (1, HW), used once per tap
        return rolled * row

    # ---- conv1: masked 3x3, NZ -> HID.  Five small MXU matmuls accumulating
    #      directly into (B*HID, HW); masking is applied to z (cheap: 8
    #      sublanes) before the matmul (mask commutes with the contraction).
    h_pre = None
    for t, off in enumerate(taps1):
        term = jnp.dot(w1_ref[t], shift_mask(z, off),
                       preferred_element_type=jnp.float32)          # (B*HID, HW)
        h_pre = term if h_pre is None else h_pre + term
    h1 = _elu(h_pre)

    # ---- conv2: masked 5x5 depthwise over the statically-nonzero taps.
    #      Two accumulators halve the serial dependency depth.
    acc_e = jnp.zeros_like(h1)
    acc_o = jnp.zeros_like(h1)
    for t, off in enumerate(taps2):
        contrib = shift_mask(h1, off) * w2[:, t:t + 1]
        if t % 2 == 0:
            acc_e = acc_e + contrib
        else:
            acc_o = acc_o + contrib
    s_act = _elu(acc_e + acc_o) + ftr                   # ARInvertedResidual output

    # ---- mu head: ELU -> masked 1x1 conv (one MXU matmul) + bias
    mu = jnp.dot(w3_ref[...], _elu(s_act),
                 preferred_element_type=jnp.float32) + b3_ref[...]   # (B*NZ, HW)

    out_ref[...] = z - mu


def cell_ar_forward(z, ftr, params):
    """z: (B, NZ, H, W) NCHW (PyTorch-native), ftr: (B, HID, H, W) NCHW.

    Returns (new_z, log_det), both (B, NZ, H, W)."""
    B, NZ, H, W = z.shape
    HID = ftr.shape[1]
    HW = H * W
    w1, w2, w3, b3 = params["w1"], params["w2"], params["w3"], params["b3"]
    cmask = params["cmask"]
    nt1, nt2, n_off = w1.shape[0], w2.shape[1], cmask.shape[0]
    BNZ, BHID = B * NZ, B * HID

    # Free reshapes (contiguous NCHW -> (B*C, HW)); no transposes, no pads.
    z_flat = z.reshape(BNZ, HW)
    f_flat = ftr.reshape(BHID, HW)

    kernel = functools.partial(cell_ar_kernel, W=W, HW=HW,
                               taps1=params["taps1"], taps2=params["taps2"],
                               off_row=params["off_row"])

    # Advisory cost hint for XLA's scheduler around this tiny custom call.
    flops = 2 * B * HW * HID * (NZ * nt1 + nt2 + NZ)
    transcendentals = 3 * B * HID * HW
    bytes_accessed = 4 * (z_flat.size + f_flat.size + z_flat.size +
                          w1.size + w2.size + w3.size + b3.size + cmask.size)

    new_z_flat = pl.pallas_call(
        kernel,
        out_shape=jax.ShapeDtypeStruct((BNZ, HW), jnp.float32),
        grid=(1,),                                     # batch folded -> 1 step
        in_specs=[
            pl.BlockSpec((BNZ, HW), lambda i: (0, 0)),
            pl.BlockSpec((BHID, HW), lambda i: (0, 0)),
            pl.BlockSpec((nt1, BHID, BNZ), lambda i: (0, 0, 0)),
            pl.BlockSpec((BHID, nt2), lambda i: (0, 0)),
            pl.BlockSpec((BNZ, BHID), lambda i: (0, 0)),
            pl.BlockSpec((BNZ, 1), lambda i: (0, 0)),
            pl.BlockSpec((n_off, HW), lambda i: (0, 0)),
        ],
        out_specs=pl.BlockSpec((BNZ, HW), lambda i: (0, 0)),
        compiler_params=pltpu.CompilerParams(dimension_semantics=("arbitrary",)),
        cost_estimate=pl.CostEstimate(flops=flops, transcendentals=transcendentals,
                                      bytes_accessed=bytes_accessed),
    )(z_flat, f_flat, w1, w2, w3, b3, cmask)

    new_z = new_z_flat.reshape(B, NZ, H, W)            # free reshape back to NCHW
    # log_det is identically zero for this flow -> compile-time constant,
    # produced here instead of wasting a kernel output stream.
    log_det = jnp.zeros_like(new_z)
    return new_z, log_det


# ----------------------------------------------------------------------------
# Pure-JAX reference (for correctness check), NHWC as before
# ----------------------------------------------------------------------------
def cell_ar_reference(z, ftr, w1_hwio, w2_hwio, w3_hwio, b3):
    dn = ('NHWC', 'HWIO', 'NHWC')
    prec = jax.lax.Precision.HIGHEST
    h = jax.lax.conv_general_dilated(z, w1_hwio, (1, 1), 'SAME',
                                     dimension_numbers=dn, precision=prec)
    h = jax.nn.elu(h)
    h = jax.lax.conv_general_dilated(h, w2_hwio, (1, 1), 'SAME',
                                     dimension_numbers=dn,
                                     feature_group_count=w2_hwio.shape[-1],
                                     precision=prec)
    h = jax.nn.elu(h)
    s = h + ftr
    e = jax.nn.elu(s)
    mu = jax.lax.conv_general_dilated(e, w3_hwio, (1, 1), 'SAME',
                                      dimension_numbers=dn, precision=prec)
    mu = mu + b3[None, None, None, :]
    return z - mu, jnp.zeros_like(z)


if __name__ == "__main__":
    # CellAR(num_z=4, num_ftr=24, num_c=8, arch=None, mirror=False), ex=6
    # TODO(synk): the use_mix_log_cdf=True branch (MixLogCDFParam +
    # mix_log_cdf_flow) is dead code in the reference config and not implemented.
    B, NZ, H, W = 2, 4, 16, 16
    EX = 6
    HID = NZ * EX          # ARInvertedResidual.hidden_dim = 24
    NUM_FTR = HID          # ftr must have hidden_dim channels (z + ftr)

    key = jax.random.PRNGKey(0)
    kz, kf, kp = jax.random.split(key, 3)
    z = jax.random.normal(kz, (B, NZ, H, W), jnp.float32)        # NCHW (PyTorch layout)
    ftr = jax.random.normal(kf, (B, NUM_FTR, H, W), jnp.float32)

    kparams, rparams = init_cell_ar_params(kp, NZ, HID, B, H, W, mirror=False)

    new_z, log_det = cell_ar_forward(z, ftr, kparams)
    jax.block_until_ready((new_z, log_det))

    # Reference (validated NHWC path); transpose NCHW test data around it.
    z_nhwc = jnp.transpose(z, (0, 2, 3, 1))
    f_nhwc = jnp.transpose(ftr, (0, 2, 3, 1))
    ref_z_nhwc, _ = cell_ar_reference(z_nhwc, f_nhwc, *rparams)
    ref_z = jnp.transpose(ref_z_nhwc, (0, 3, 1, 2))

    assert new_z.shape == (B, NZ, H, W) and log_det.shape == (B, NZ, H, W)
    err = float(jnp.max(jnp.abs(new_z - ref_z)))
    assert jnp.allclose(new_z, ref_z, atol=1e-3, rtol=1e-3), err
    assert jnp.allclose(log_det, 0.0)
    print("KERNEL_OK")
</pallas_src>

<mosaic_0001>
module attributes {stable_mosaic.version = 11 : i64} {
  func.func @cell_ar_kernel(%arg0: i32, %arg1: memref<8x256xf32, #tpu.memory_space<vmem>>, %arg2: memref<48x256xf32, #tpu.memory_space<vmem>>, %arg3: memref<5x48x8xf32, #tpu.memory_space<vmem>>, %arg4: memref<48x13xf32, #tpu.memory_space<vmem>>, %arg5: memref<8x48xf32, #tpu.memory_space<vmem>>, %arg6: memref<8x1xf32, #tpu.memory_space<vmem>>, %arg7: memref<12x256xf32, #tpu.memory_space<vmem>>, %arg8: memref<8x256xf32, #tpu.memory_space<vmem>>) attributes {dimension_semantics = [#tpu.dimension_semantics<arbitrary>], iteration_bounds = array<i64: 1>, scalar_prefetch = 0 : i64, scratch_operands = 0 : i64, tpu.core_type = #tpu.core_type<tc>, window_params = [{pipeline_mode = #tpu.pipeline_mode<synchronous>, transform_indices = @transform_0, window_bounds = array<i64: 8, 256>}, {pipeline_mode = #tpu.pipeline_mode<synchronous>, transform_indices = @transform_1, window_bounds = array<i64: 48, 256>}, {pipeline_mode = #tpu.pipeline_mode<synchronous>, transform_indices = @transform_2, window_bounds = array<i64: 5, 48, 8>}, {pipeline_mode = #tpu.pipeline_mode<synchronous>, transform_indices = @transform_3, window_bounds = array<i64: 48, 13>}, {pipeline_mode = #tpu.pipeline_mode<synchronous>, transform_indices = @transform_4, window_bounds = array<i64: 8, 48>}, {pipeline_mode = #tpu.pipeline_mode<synchronous>, transform_indices = @transform_5, window_bounds = array<i64: 8, 1>}, {pipeline_mode = #tpu.pipeline_mode<synchronous>, transform_indices = @transform_6, window_bounds = array<i64: 12, 256>}, {pipeline_mode = #tpu.pipeline_mode<synchronous>, transform_indices = @transform_7, window_bounds = array<i64: 8, 256>}]} {
    %c0 = arith.constant 0 : index
    %c0_0 = arith.constant 0 : index
    %0 = vector.load %arg1[%c0, %c0_0] : memref<8x256xf32, #tpu.memory_space<vmem>>, vector<8x256xf32>
    %c0_1 = arith.constant 0 : index
    %c0_2 = arith.constant 0 : index
    %1 = vector.load %arg2[%c0_1, %c0_2] : memref<48x256xf32, #tpu.memory_space<vmem>>, vector<48x256xf32>
    %c0_3 = arith.constant 0 : index
    %c0_4 = arith.constant 0 : index
    %2 = vector.load %arg4[%c0_3, %c0_4] : memref<48x13xf32, #tpu.memory_space<vmem>>, vector<48x13xf32>
    %c0_5 = arith.constant 0 : index
    %c0_6 = arith.constant 0 : index
    %c0_7 = arith.constant 0 : index
    %3 = vector.load %arg3[%c0_5, %c0_6, %c0_7] : memref<5x48x8xf32, #tpu.memory_space<vmem>>, vector<1x48x8xf32>
    %4 = vector.shape_cast %3 : vector<1x48x8xf32> to vector<48x8xf32>
    %c17_i32 = arith.constant 17 : i32
    %5 = tpu.dynamic_rotate %0 by %c17_i32 dim 1 : vector<8x256xf32>, i32 -> vector<8x256xf32>
    %c6 = arith.constant 6 : index
    %c0_8 = arith.constant 0 : index
    %6 = vector.load %arg7[%c6, %c0_8] : memref<12x256xf32, #tpu.memory_space<vmem>>, vector<1x256xf32>
    %7 = vector.broadcast %6 : vector<1x256xf32> to vector<8x256xf32>
    %8 = arith.mulf %5, %7 : vector<8x256xf32>
    %cst = arith.constant dense<0.000000e+00> : vector<48x256xf32>
    %9 = tpu.matmul %4, %8, %cst {dimension_numbers = #tpu.dot_dimension_numbers<[1], [0], [0], [1], [0, 0, 1, 1], [], []>} : vector<48x8xf32>, vector<8x256xf32>, vector<48x256xf32> -> vector<48x256xf32>
    %c1 = arith.constant 1 : index
    %c0_9 = arith.constant 0 : index
    %c0_10 = arith.constant 0 : index
    %10 = vector.load %arg3[%c1, %c0_9, %c0_10] : memref<5x48x8xf32, #tpu.memory_space<vmem>>, vector<1x48x8xf32>
    %11 = vector.shape_cast %10 : vector<1x48x8xf32> to vector<48x8xf32>
    %c16_i32 = arith.constant 16 : i32
    %12 = tpu.dynamic_rotate %0 by %c16_i32 dim 1 : vector<8x256xf32>, i32 -> vector<8x256xf32>
    %c7 = arith.constant 7 : index
    %c0_11 = arith.constant 0 : index
    %13 = vector.load %arg7[%c7, %c0_11] : memref<12x256xf32, #tpu.memory_space<vmem>>, vector<1x256xf32>
    %14 = vector.broadcast %13 : vector<1x256xf32> to vector<8x256xf32>
    %15 = arith.mulf %12, %14 : vector<8x256xf32>
    %cst_12 = arith.constant dense<0.000000e+00> : vector<48x256xf32>
    %16 = tpu.matmul %11, %15, %cst_12 {dimension_numbers = #tpu.dot_dimension_numbers<[1], [0], [0], [1], [0, 0, 1, 1], [], []>} : vector<48x8xf32>, vector<8x256xf32>, vector<48x256xf32> -> vector<48x256xf32>
    %17 = arith.addf %9, %16 : vector<48x256xf32>
    %c2 = arith.constant 2 : index
    %c0_13 = arith.constant 0 : index
    %c0_14 = arith.constant 0 : index
    %18 = vector.load %arg3[%c2, %c0_13, %c0_14] : memref<5x48x8xf32, #tpu.memory_space<vmem>>, vector<1x48x8xf32>
    %19 = vector.shape_cast %18 : vector<1x48x8xf32> to vector<48x8xf32>
    %c15_i32 = arith.constant 15 : i32
    %20 = tpu.dynamic_rotate %0 by %c15_i32 dim 1 : vector<8x256xf32>, i32 -> vector<8x256xf32>
    %c8 = arith.constant 8 : index
    %c0_15 = arith.constant 0 : index
    %21 = vector.load %arg7[%c8, %c0_15] : memref<12x256xf32, #tpu.memory_space<vmem>>, vector<1x256xf32>
    %22 = vector.broadcast %21 : vector<1x256xf32> to vector<8x256xf32>
    %23 = arith.mulf %20, %22 : vector<8x256xf32>
    %cst_16 = arith.constant dense<0.000000e+00> : vector<48x256xf32>
    %24 = tpu.matmul %19, %23, %cst_16 {dimension_numbers = #tpu.dot_dimension_numbers<[1], [0], [0], [1], [0, 0, 1, 1], [], []>} : vector<48x8xf32>, vector<8x256xf32>, vector<48x256xf32> -> vector<48x256xf32>
    %25 = arith.addf %17, %24 : vector<48x256xf32>
    %c3 = arith.constant 3 : index
    %c0_17 = arith.constant 0 : index
    %c0_18 = arith.constant 0 : index
    %26 = vector.load %arg3[%c3, %c0_17, %c0_18] : memref<5x48x8xf32, #tpu.memory_space<vmem>>, vector<1x48x8xf32>
    %27 = vector.shape_cast %26 : vector<1x48x8xf32> to vector<48x8xf32>
    %c1_i32 = arith.constant 1 : i32
    %28 = tpu.dynamic_rotate %0 by %c1_i32 dim 1 : vector<8x256xf32>, i32 -> vector<8x256xf32>
    %c11 = arith.constant 11 : index
    %c0_19 = arith.constant 0 : index
    %29 = vector.load %arg7[%c11, %c0_19] : memref<12x256xf32, #tpu.memory_space<vmem>>, vector<1x256xf32>
    %30 = vector.broadcast %29 : vector<1x256xf32> to vector<8x256xf32>
    %31 = arith.mulf %28, %30 : vector<8x256xf32>
    %cst_20 = arith.constant dense<0.000000e+00> : vector<48x256xf32>
    %32 = tpu.matmul %27, %31, %cst_20 {dimension_numbers = #tpu.dot_dimension_numbers<[1], [0], [0], [1], [0, 0, 1, 1], [], []>} : vector<48x8xf32>, vector<8x256xf32>, vector<48x256xf32> -> vector<48x256xf32>
    %33 = arith.addf %25, %32 : vector<48x256xf32>
    %c4 = arith.constant 4 : index
    %c0_21 = arith.constant 0 : index
    %c0_22 = arith.constant 0 : index
    %34 = vector.load %arg3[%c4, %c0_21, %c0_22] : memref<5x48x8xf32, #tpu.memory_space<vmem>>, vector<1x48x8xf32>
    %35 = vector.shape_cast %34 : vector<1x48x8xf32> to vector<48x8xf32>
    %cst_23 = arith.constant dense<0.000000e+00> : vector<48x256xf32>
    %36 = tpu.matmul %35, %0, %cst_23 {dimension_numbers = #tpu.dot_dimension_numbers<[1], [0], [0], [1], [0, 0, 1, 1], [], []>} : vector<48x8xf32>, vector<8x256xf32>, vector<48x256xf32> -> vector<48x256xf32>
    %37 = arith.addf %33, %36 : vector<48x256xf32>
    %cst_24 = arith.constant 0.000000e+00 : f32
    %38 = vector.broadcast %cst_24 : f32 to vector<48x256xf32>
    %39 = arith.cmpf ogt, %37, %38 : vector<48x256xf32>
    %cst_25 = arith.constant 0.000000e+00 : f32
    %40 = vector.broadcast %cst_25 : f32 to vector<48x256xf32>
    %41 = arith.minimumf %37, %40 : vector<48x256xf32>
    %42 = math.exp %41 : vector<48x256xf32>
    %cst_26 = arith.constant 1.000000e+00 : f32
    %43 = vector.broadcast %cst_26 : f32 to vector<48x256xf32>
    %44 = arith.subf %42, %43 : vector<48x256xf32>
    %45 = arith.select %39, %37, %44 : vector<48x256xi1>, vector<48x256xf32>
    %cst_27 = arith.constant 0.000000e+00 : f32
    %46 = vector.broadcast %cst_27 : f32 to vector<48x256xf32>
    %cst_28 = arith.constant 0.000000e+00 : f32
    %47 = vector.broadcast %cst_28 : f32 to vector<48x256xf32>
    %c34_i32 = arith.constant 34 : i32
    %48 = tpu.dynamic_rotate %45 by %c34_i32 dim 1 : vector<48x256xf32>, i32 -> vector<48x256xf32>
    %c0_29 = arith.constant 0 : index
    %c0_30 = arith.constant 0 : index
    %49 = vector.load %arg7[%c0_29, %c0_30] : memref<12x256xf32, #tpu.memory_space<vmem>>, vector<1x256xf32>
    %50 = vector.broadcast %49 : vector<1x256xf32> to vector<48x256xf32>
    %51 = arith.mulf %48, %50 : vector<48x256xf32>
    %52 = vector.extract_strided_slice %2 {offsets = [0, 0], sizes = [48, 1], strides = [1, 1]} : vector<48x13xf32> to vector<48x1xf32>
    %53 = vector.broadcast %52 : vector<48x1xf32> to vector<48x256xf32>
    %54 = arith.mulf %51, %53 : vector<48x256xf32>
    %55 = arith.addf %46, %54 : vector<48x256xf32>
    %c33_i32 = arith.constant 33 : i32
    %56 = tpu.dynamic_rotate %45 by %c33_i32 dim 1 : vector<48x256xf32>, i32 -> vector<48x256xf32>
    %c1_31 = arith.constant 1 : index
    %c0_32 = arith.constant 0 : index
    %57 = vector.load %arg7[%c1_31, %c0_32] : memref<12x256xf32, #tpu.memory_space<vmem>>, vector<1x256xf32>
    %58 = vector.broadcast %57 : vector<1x256xf32> to vector<48x256xf32>
    %59 = arith.mulf %56, %58 : vector<48x256xf32>
    %60 = vector.extract_strided_slice %2 {offsets = [0, 1], sizes = [48, 1], strides = [1, 1]} : vector<48x13xf32> to vector<48x1xf32>
    %61 = vector.broadcast %60 : vector<48x1xf32> to vector<48x256xf32>
    %62 = arith.mulf %59, %61 : vector<48x256xf32>
    %63 = arith.addf %47, %62 : vector<48x256xf32>
    %c32_i32 = arith.constant 32 : i32
    %64 = tpu.dynamic_rotate %45 by %c32_i32 dim 1 : vector<48x256xf32>, i32 -> vector<48x256xf32>
    %c2_33 = arith.constant 2 : index
    %c0_34 = arith.constant 0 : index
    %65 = vector.load %arg7[%c2_33, %c0_34] : memref<12x256xf32, #tpu.memory_space<vmem>>, vector<1x256xf32>
    %66 = vector.broadcast %65 : vector<1x256xf32> to vector<48x256xf32>
    %67 = arith.mulf %64, %66 : vector<48x256xf32>
    %68 = vector.extract_strided_slice %2 {offsets = [0, 2], sizes = [48, 1], strides = [1, 1]} : vector<48x13xf32> to vector<48x1xf32>
    %69 = vector.broadcast %68 : vector<48x1xf32> to vector<48x256xf32>
    %70 = arith.mulf %67, %69 : vector<48x256xf32>
    %71 = arith.addf %55, %70 : vector<48x256xf32>
    %c31_i32 = arith.constant 31 : i32
    %72 = tpu.dynamic_rotate %45 by %c31_i32 dim 1 : vector<48x256xf32>, i32 -> vector<48x256xf32>
    %c3_35 = arith.constant 3 : index
    %c0_36 = arith.constant 0 : index
    %73 = vector.load %arg7[%c3_35, %c0_36] : memref<12x256xf32, #tpu.memory_space<vmem>>, vector<1x256xf32>
    %74 = vector.broadcast %73 : vector<1x256xf32> to vector<48x256xf32>
    %75 = arith.mulf %72, %74 : vector<48x256xf32>
    %76 = vector.extract_strided_slice %2 {offsets = [0, 3], sizes = [48, 1], strides = [1, 1]} : vector<48x13xf32> to vector<48x1xf32>
    %77 = vector.broadcast %76 : vector<48x1xf32> to vector<48x256xf32>
    %78 = arith.mulf %75, %77 : vector<48x256xf32>
    %79 = arith.addf %63, %78 : vector<48x256xf32>
    %c30_i32 = arith.constant 30 : i32
    %80 = tpu.dynamic_rotate %45 by %c30_i32 dim 1 : vector<48x256xf32>, i32 -> vector<48x256xf32>
    %c4_37 = arith.constant 4 : index
    %c0_38 = arith.constant 0 : index
    %81 = vector.load %arg7[%c4_37, %c0_38] : memref<12x256xf32, #tpu.memory_space<vmem>>, vector<1x256xf32>
    %82 = vector.broadcast %81 : vector<1x256xf32> to vector<48x256xf32>
    %83 = arith.mulf %80, %82 : vector<48x256xf32>
    %84 = vector.extract_strided_slice %2 {offsets = [0, 4], sizes = [48, 1], strides = [1, 1]} : vector<48x13xf32> to vector<48x1xf32>
    %85 = vector.broadcast %84 : vector<48x1xf32> to vector<48x256xf32>
    %86 = arith.mulf %83, %85 : vector<48x256xf32>
    %87 = arith.addf %71, %86 : vector<48x256xf32>
    %c18_i32 = arith.constant 18 : i32
    %88 = tpu.dynamic_rotate %45 by %c18_i32 dim 1 : vector<48x256xf32>, i32 -> vector<48x256xf32>
    %c5 = arith.constant 5 : index
    %c0_39 = arith.constant 0 : index
    %89 = vector.load %arg7[%c5, %c0_39] : memref<12x256xf32, #tpu.memory_space<vmem>>, vector<1x256xf32>
    %90 = vector.broadcast %89 : vector<1x256xf32> to vector<48x256xf32>
    %91 = arith.mulf %88, %90 : vector<48x256xf32>
    %92 = vector.extract_strided_slice %2 {offsets = [0, 5], sizes = [48, 1], strides = [1, 1]} : vector<48x13xf32> to vector<48x1xf32>
    %93 = vector.broadcast %92 : vector<48x1xf32> to vector<48x256xf32>
    %94 = arith.mulf %91, %93 : vector<48x256xf32>
    %95 = arith.addf %79, %94 : vector<48x256xf32>
    %c17_i32_40 = arith.constant 17 : i32
    %96 = tpu.dynamic_rotate %45 by %c17_i32_40 dim 1 : vector<48x256xf32>, i32 -> vector<48x256xf32>
    %c6_41 = arith.constant 6 : index
    %c0_42 = arith.constant 0 : index
    %97 = vector.load %arg7[%c6_41, %c0_42] : memref<12x256xf32, #tpu.memory_space<vmem>>, vector<1x256xf32>
    %98 = vector.broadcast %97 : vector<1x256xf32> to vector<48x256xf32>
    %99 = arith.mulf %96, %98 : vector<48x256xf32>
    %100 = vector.extract_strided_slice %2 {offsets = [0, 6], sizes = [48, 1], strides = [1, 1]} : vector<48x13xf32> to vector<48x1xf32>
    %101 = vector.broadcast %100 : vector<48x1xf32> to vector<48x256xf32>
    %102 = arith.mulf %99, %101 : vector<48x256xf32>
    %103 = arith.addf %87, %102 : vector<48x256xf32>
    %c16_i32_43 = arith.constant 16 : i32
    %104 = tpu.dynamic_rotate %45 by %c16_i32_43 dim 1 : vector<48x256xf32>, i32 -> vector<48x256xf32>
    %c7_44 = arith.constant 7 : index
    %c0_45 = arith.constant 0 : index
    %105 = vector.load %arg7[%c7_44, %c0_45] : memref<12x256xf32, #tpu.memory_space<vmem>>, vector<1x256xf32>
    %106 = vector.broadcast %105 : vector<1x256xf32> to vector<48x256xf32>
    %107 = arith.mulf %104, %106 : vector<48x256xf32>
    %108 = vector.extract_strided_slice %2 {offsets = [0, 7], sizes = [48, 1], strides = [1, 1]} : vector<48x13xf32> to vector<48x1xf32>
    %109 = vector.broadcast %108 : vector<48x1xf32> to vector<48x256xf32>
    %110 = arith.mulf %107, %109 : vector<48x256xf32>
    %111 = arith.addf %95, %110 : vector<48x256xf32>
    %c15_i32_46 = arith.constant 15 : i32
    %112 = tpu.dynamic_rotate %45 by %c15_i32_46 dim 1 : vector<48x256xf32>, i32 -> vector<48x256xf32>
    %c8_47 = arith.constant 8 : index
    %c0_48 = arith.constant 0 : index
    %113 = vector.load %arg7[%c8_47, %c0_48] : memref<12x256xf32, #tpu.memory_space<vmem>>, vector<1x256xf32>
    %114 = vector.broadcast %113 : vector<1x256xf32> to vector<48x256xf32>
    %115 = arith.mulf %112, %114 : vector<48x256xf32>
    %116 = vector.extract_strided_slice %2 {offsets = [0, 8], sizes = [48, 1], strides = [1, 1]} : vector<48x13xf32> to vector<48x1xf32>
    %117 = vector.broadcast %116 : vector<48x1xf32> to vector<48x256xf32>
    %118 = arith.mulf %115, %117 : vector<48x256xf32>
    %119 = arith.addf %103, %118 : vector<48x256xf32>
    %c14_i32 = arith.constant 14 : i32
    %120 = tpu.dynamic_rotate %45 by %c14_i32 dim 1 : vector<48x256xf32>, i32 -> vector<48x256xf32>
    %c9 = arith.constant 9 : index
    %c0_49 = arith.constant 0 : index
    %121 = vector.load %arg7[%c9, %c0_49] : memref<12x256xf32, #tpu.memory_space<vmem>>, vector<1x256xf32>
    %122 = vector.broadcast %121 : vector<1x256xf32> to vector<48x256xf32>
    %123 = arith.mulf %120, %122 : vector<48x256xf32>
    %124 = vector.extract_strided_slice %2 {offsets = [0, 9], sizes = [48, 1], strides = [1, 1]} : vector<48x13xf32> to vector<48x1xf32>
    %125 = vector.broadcast %124 : vector<48x1xf32> to vector<48x256xf32>
    %126 = arith.mulf %123, %125 : vector<48x256xf32>
    %127 = arith.addf %111, %126 : vector<48x256xf32>
    %c2_i32 = arith.constant 2 : i32
    %128 = tpu.dynamic_rotate %45 by %c2_i32 dim 1 : vector<48x256xf32>, i32 -> vector<48x256xf32>
    %c10 = arith.constant 10 : index
    %c0_50 = arith.constant 0 : index
    %129 = vector.load %arg7[%c10, %c0_50] : memref<12x256xf32, #tpu.memory_space<vmem>>, vector<1x256xf32>
    %130 = vector.broadcast %129 : vector<1x256xf32> to vector<48x256xf32>
    %131 = arith.mulf %128, %130 : vector<48x256xf32>
    %132 = vector.extract_strided_slice %2 {offsets = [0, 10], sizes = [48, 1], strides = [1, 1]} : vector<48x13xf32> to vector<48x1xf32>
    %133 = vector.broadcast %132 : vector<48x1xf32> to vector<48x256xf32>
    %134 = arith.mulf %131, %133 : vector<48x256xf32>
    %135 = arith.addf %119, %134 : vector<48x256xf32>
    %c1_i32_51 = arith.constant 1 : i32
    %136 = tpu.dynamic_rotate %45 by %c1_i32_51 dim 1 : vector<48x256xf32>, i32 -> vector<48x256xf32>
    %c11_52 = arith.constant 11 : index
    %c0_53 = arith.constant 0 : index
    %137 = vector.load %arg7[%c11_52, %c0_53] : memref<12x256xf32, #tpu.memory_space<vmem>>, vector<1x256xf32>
    %138 = vector.broadcast %137 : vector<1x256xf32> to vector<48x256xf32>
    %139 = arith.mulf %136, %138 : vector<48x256xf32>
    %140 = vector.extract_strided_slice %2 {offsets = [0, 11], sizes = [48, 1], strides = [1, 1]} : vector<48x13xf32> to vector<48x1xf32>
    %141 = vector.broadcast %140 : vector<48x1xf32> to vector<48x256xf32>
    %142 = arith.mulf %139, %141 : vector<48x256xf32>
    %143 = arith.addf %127, %142 : vector<48x256xf32>
    %144 = vector.extract_strided_slice %2 {offsets = [0, 12], sizes = [48, 1], strides = [1, 1]} : vector<48x13xf32> to vector<48x1xf32>
    %145 = vector.broadcast %144 : vector<48x1xf32> to vector<48x256xf32>
    %146 = arith.mulf %45, %145 : vector<48x256xf32>
    %147 = arith.addf %135, %146 : vector<48x256xf32>
    %148 = arith.addf %147, %143 : vector<48x256xf32>
    %cst_54 = arith.constant 0.000000e+00 : f32
    %149 = vector.broadcast %cst_54 : f32 to vector<48x256xf32>
    %150 = arith.cmpf ogt, %148, %149 : vector<48x256xf32>
    %cst_55 = arith.constant 0.000000e+00 : f32
    %151 = vector.broadcast %cst_55 : f32 to vector<48x256xf32>
    %152 = arith.minimumf %148, %151 : vector<48x256xf32>
    %153 = math.exp %152 : vector<48x256xf32>
    %cst_56 = arith.constant 1.000000e+00 : f32
    %154 = vector.broadcast %cst_56 : f32 to vector<48x256xf32>
    %155 = arith.subf %153, %154 : vector<48x256xf32>
    %156 = arith.select %150, %148, %155 : vector<48x256xi1>, vector<48x256xf32>
    %157 = arith.addf %156, %1 : vector<48x256xf32>
    %c0_57 = arith.constant 0 : index
    %c0_58 = arith.constant 0 : index
    %158 = vector.load %arg5[%c0_57, %c0_58] : memref<8x48xf32, #tpu.memory_space<vmem>>, vector<8x48xf32>
    %cst_59 = arith.constant 0.000000e+00 : f32
    %159 = vector.broadcast %cst_59 : f32 to vector<48x256xf32>
    %160 = arith.cmpf ogt, %157, %159 : vector<48x256xf32>
    %cst_60 = arith.constant 0.000000e+00 : f32
    %161 = vector.broadcast %cst_60 : f32 to vector<48x256xf32>
    %162 = arith.minimumf %157, %161 : vector<48x256xf32>
    %163 = math.exp %162 : vector<48x256xf32>
    %cst_61 = arith.constant 1.000000e+00 : f32
    %164 = vector.broadcast %cst_61 : f32 to vector<48x256xf32>
    %165 = arith.subf %163, %164 : vector<48x256xf32>
    %166 = arith.select %160, %157, %165 : vector<48x256xi1>, vector<48x256xf32>
    %cst_62 = arith.constant dense<0.000000e+00> : vector<8x256xf32>
    %167 = tpu.matmul %158, %166, %cst_62 {dimension_numbers = #tpu.dot_dimension_numbers<[1], [0], [0], [1], [0, 0, 1, 1], [], []>} : vector<8x48xf32>, vector<48x256xf32>, vector<8x256xf32> -> vector<8x256xf32>
    %c0_63 = arith.constant 0 : index
    %c0_64 = arith.constant 0 : index
    %168 = vector.load %arg6[%c0_63, %c0_64] : memref<8x1xf32, #tpu.memory_space<vmem>>, vector<8x1xf32>
    %169 = vector.broadcast %168 : vector<8x1xf32> to vector<8x256xf32>
    %170 = arith.addf %167, %169 : vector<8x256xf32>
    %171 = arith.subf %0, %170 : vector<8x256xf32>
    %c0_65 = arith.constant 0 : index
    %c0_66 = arith.constant 0 : index
    %172 = vector.load %arg8[%c0_65, %c0_66] : memref<8x256xf32, #tpu.memory_space<vmem>>, vector<8x256xf32>
    tpu.vector_store %arg8[%c0_65, %c0_66], %171 {strides = array<i32>} : memref<8x256xf32, #tpu.memory_space<vmem>>, vector<8x256xf32>,
    return
  }
  func.func @transform_0(%arg0: i32) -> (i32, i32) {
    %c0_i32 = arith.constant 0 : i32
    %c0_i32_0 = arith.constant 0 : i32
    %c0_i32_1 = arith.constant 0 : i32
    return %c0_i32, %c0_i32_0 : i32, i32
  }
  func.func @transform_1(%arg0: i32) -> (i32, i32) {
    %c0_i32 = arith.constant 0 : i32
    %c0_i32_0 = arith.constant 0 : i32
    %c0_i32_1 = arith.constant 0 : i32
    return %c0_i32, %c0_i32_0 : i32, i32
  }
  func.func @transform_2(%arg0: i32) -> (i32, i32, i32) {
    %c0_i32 = arith.constant 0 : i32
    %c0_i32_0 = arith.constant 0 : i32
    %c0_i32_1 = arith.constant 0 : i32
    %c0_i32_2 = arith.constant 0 : i32
    return %c0_i32, %c0_i32_0, %c0_i32_1 : i32, i32, i32
  }
  func.func @transform_3(%arg0: i32) -> (i32, i32) {
    %c0_i32 = arith.constant 0 : i32
    %c0_i32_0 = arith.constant 0 : i32
    %c0_i32_1 = arith.constant 0 : i32
    return %c0_i32, %c0_i32_0 : i32, i32
  }
  func.func @transform_4(%arg0: i32) -> (i32, i32) {
    %c0_i32 = arith.constant 0 : i32
    %c0_i32_0 = arith.constant 0 : i32
    %c0_i32_1 = arith.constant 0 : i32
    return %c0_i32, %c0_i32_0 : i32, i32
  }
  func.func @transform_5(%arg0: i32) -> (i32, i32) {
    %c0_i32 = arith.constant 0 : i32
    %c0_i32_0 = arith.constant 0 : i32
    %c0_i32_1 = arith.constant 0 : i32
    return %c0_i32, %c0_i32_0 : i32, i32
  }
  func.func @transform_6(%arg0: i32) -> (i32, i32) {
    %c0_i32 = arith.constant 0 : i32
    %c0_i32_0 = arith.constant 0 : i32
    %c0_i32_1 = arith.constant 0 : i32
    return %c0_i32, %c0_i32_0 : i32, i32
  }
  func.func @transform_7(%arg0: i32) -> (i32, i32) {
    %c0_i32 = arith.constant 0 : i32
    %c0_i32_0 = arith.constant 0 : i32
    %c0_i32_1 = arith.constant 0 : i32
    return %c0_i32, %c0_i32_0 : i32, i32
  }
}

</mosaic_0001>

<bundles_post_ra>
// kernel: tpu_custom_call.1
= control target key start
LH: loop header
LB: loop body
LE: loop exit
PB: predicated region body
PF: predicated region fallthrough
CT: control target
= control target key end

     0   :  { %s2726_s26 = smov 17   ;;  %s2727_s27 = smov 16   ;;  %v2728_v2 = vmov 0.0   ;;  %s4984_s0 = inlined_call_operand.vmem [shape: f32[8,256], index: 0, kind: input, shape index: {}]   ;;  %s4985_s1 = inlined_call_operand.vmem [shape: f32[48,256], index: 1, kind: input, shape index: {}]   ;;  %s4986_s2 = inlined_call_operand.vmem [shape: f32[5,48,8], index: 2, kind: input, shape index: {}]   ;;  %s4987_s3 = inlined_call_operand.vmem [shape: f32[48,13], index: 3, kind: input, shape index: {}]   ;;  %s4988_s4 = inlined_call_operand.vmem [shape: f32[8,48], index: 4, kind: input, shape index: {}]   ;;  %s4989_s5 = inlined_call_operand.vmem [shape: f32[8,1], index: 5, kind: input, shape index: {}]   ;;  %s4990_s6 = inlined_call_operand.vmem [shape: f32[12,256], index: 6, kind: input, shape index: {}]   ;;  %s4991_s7 = inlined_call_operand.hbm [shape: f32[8,256], index: 7, kind: output, shape index: {}]  }
   0x1   :  { %v2796_v0 = vld [vmem:[%s4984_s0] sm:$0xff]  ;;  %v2805_v1 = vld [vmem:[%s4984_s0 + $0x8] sm:$0xff]  ;;  %189 = vmatprep.mubr.f32.mxu0 %v2728_v2  ;;  %213 = vmatprep.mubr.f32.mxu1 %v2728_v2 }
   0x2   :  { %53 = vrot.lane.b32.xlu1 %v2796_v0, %s2726_s26  ;;  %84 = vrot.lane.b32.xlu0 %v2796_v0, %s2727_s27 }
   0x6   :  { %55 = vrot.lane.b32.xlu1 %v2805_v1, %s2726_s26  ;;  %86 = vrot.lane.b32.xlu0 %v2805_v1, %s2727_s27 }
   0x7   :  { %12 = vsyncpa [#allocation3], 0  ;;  %s2729_s30 = smov 15   ;;  %s2730_s8 = smov 1   ;;  %v4993_v3 = vmov 0   ;;  %v2825_v4 = vld [vmem:[%s4987_s3 + $0x8] sm:$0xff]  ;;  %v57_v16 = vlaneseq }
   0x8   :  { %2592 = vset.pattern.permute.xlu1 %v4993_v3  ;;  %2591 = vset.pattern.permute.xlu0 %v4993_v3  ;;  %v2832_v5 = vld [vmem:[%s4987_s3 + $0x10] sm:$0xff]  ;;  %v2838_v6 = vld [vmem:[%s4987_s3 + $0x20] sm:$0xff]  ;;  %v2732_v7 = vmov 1   ;;  %v2852_v9 = vld [vmem:[%s4987_s3 + $0x18] sm:$0xff]  ;;  %v2733_v11 = vmov 2   ;;  %v2734_v12 = vmov 3  }
   0x9   :  { %v2844_v8 = vld [vmem:[%s4987_s3] sm:$0xff]  ;;  %v2859_v10 = vld [vmem:[%s4987_s3 + $0x28] sm:$0xff]  ;;  %v2735_v13 = vmov 4   ;;  %v2736_v14 = vmov 5   ;;  %v2737_v15 = vmov 6   ;;  %v66_v17 = vshrl.u32 %v57_v16, 7 }
   0xa   :  { %354 = vrot.lane.b32.xlu1 %v2805_v1, %s2729_s30  ;;  %352 = vrot.lane.b32.xlu0 %v2796_v0, %s2729_s30  ;;  %v2895_v18 = vand.u32 127, %v57_v16  ;;  %v2467_v21 = vld [vmem:[%s4990_s6 + $0x7] ss:$8 sm:$0x3]  ;;  %v2738_v25 = vmov 8   ;;  %v2461_v41 = vld [vmem:[%s4986_s2 + $0x30] sm:$0xff] }
   0xb   :  { %v2897_v19 = vsub.s32 0, %v66_v17  ;;  %v2899_v20 = vsub.s32 1, %v66_v17  ;;  %v2460_v24 = vld [vmem:[%s4990_s6 + $0x6] ss:$8 sm:$0x3]  ;;  %vm106_vm3 = vcmask 64512  }
   0xc   :  { %vm59_vm0 = vcmp.lt.s32.totalorder %v2895_v18, 17  ;;  %vm88_vm1 = vcmp.lt.s32.totalorder %v2895_v18, 16  ;;  %v2486_v28 = vld [vmem:[%s4990_s6 + $0x10] ss:$8 sm:$0x3]  ;;  %vm356_vm2 = vcmp.lt.s32.totalorder %v2895_v18, 15 }
   0xd   :  { %v2912_v26 = vrot.slane %v2467_v21, %v2899_v20  ;;  %v2915_v27 = vrot.slane %v2467_v21, %v2897_v19  ;;  %v2921_v29 = vrot.slane %v2460_v24, %v2899_v20  ;;  %v2924_v30 = vrot.slane %v2460_v24, %v2897_v19  ;;  %v2465_v42 = vld [vmem:[%s4986_s2 + $0x50] sm:$0xff]  ;;  %v2462_v53 = vld [vmem:[%s4986_s2 + $0x38] sm:$0xff]  ;;  %v2463_v61 = vld [vmem:[%s4986_s2 + $0x40] sm:$0xff]  ;;  %s2745_s13 = smov 34   ;;  %s2746_s14 = smov 31  }
   0xe   :  { %514 = vrot.lane.b32.xlu1 %v2805_v1, %s2730_s8  ;;  %512 = vrot.lane.b32.xlu0 %v2796_v0, %s2730_s8  ;;  %v2937_v38 = vrot.slane %v2486_v28, %v2897_v19  ;;  %v2941_v40 = vrot.slane %v2486_v28, %v2899_v20  ;;  %v2499_v44 = vld [vmem:[%s4990_s6 + $0x13] ss:$8 sm:$0x3]  ;;  %vm516_vm4 = vcmp.lt.s32.totalorder %v2895_v18, 1  ;;  %v47_v62 = vld [vmem:[%s4986_s2] sm:$0xff]  ;;  %v4996_v21 = vmov 11  }
   0xf   :  { %5173 = vst [vmem:[#allocation5_spill] sm:$0xff] %v2912_v26  ;;  %5174 = vst [vmem:[#allocation6_spill] sm:$0xff] %v2915_v27  ;;  %v2965_v52 = vrot.slane %v2499_v44, %v2899_v20  ;;  %v2466_v54 = vld [vmem:[%s4986_s2 + $0x58] sm:$0xff]  ;;  %v2975_v56 = vrot.slane %v2499_v44, %v2897_v19  ;;  %v2481_v17 = vld [vmem:[%s4986_s2 + $0x68] sm:$0xff]  ;;  %v4994_v28 = vmov 12   ;;  %s2747_s15 = smov 32  }
  0x10   :  { %5175 = vst [vmem:[#allocation7_spill] sm:$0xff] %v2921_v29  ;;  %5176 = vst [vmem:[#allocation8_spill] sm:$0xff] %v2937_v38  ;;  %v50_v16 = vld [vmem:[%s4986_s2 + $0x18] sm:$0xff]  ;;  %v2511_v44 = vld [vmem:[%s4986_s2 + $0xe8] sm:$0xff]  ;;  %s2748_s16 = smov 18   ;;  %s2749_s17 = smov 30  }
  0x11   :  { %5177 = vst [vmem:[#allocation9_spill] sm:$0xff] %v2941_v40  ;;  %5178 = vst [vmem:[#allocation10_spill] sm:$0xff] %v2965_v52  ;;  %v2483_v24 = vld [vmem:[%s4986_s2 + $0x78] sm:$0xff]  ;;  %s2750_s18 = smov 14   ;;  %s2751_s19 = smov 2  }
  0x12   :  { %943 = vperm.xlu1 %2592, %v2825_v4   ;;  %938 = vperm.xlu0 %2591, %v2844_v8   ;;  %5179 = vst [vmem:[#allocation11_spill] sm:$0xff] %v2975_v56 }
  0x16   :  { %948 = vperm.xlu1 %2592, %v2832_v5   ;;  %953 = vperm.xlu0 %2591, %v2852_v9  }
  0x1a   :  { %958 = vperm.xlu1 %2592, %v2838_v6   ;;  %963 = vperm.xlu0 %2591, %v2859_v10  }
  0x1e   :  { %2593 = vset.pattern.permute.xlu1 %v2732_v7  ;;  %2594 = vset.pattern.permute.xlu0 %v2732_v7  ;;  %v4999_v7 = vmov 9  }
  0x1f   :  { %1053 = vperm.xlu1 %2593, %v2844_v8   ;;  %1057 = vperm.xlu0 %2594, %v2825_v4  }
  0x23   :  { %1061 = vperm.xlu1 %2593, %v2832_v5   ;;  %1069 = vperm.xlu0 %2594, %v2838_v6  }
  0x27   :  { %1065 = vperm.xlu1 %2593, %v2852_v9   ;;  %2595 = vset.pattern.permute.xlu0 %v2733_v11 }
  0x28   :  { %1163 = vperm.xlu0 %2595, %v2844_v8  }
  0x2b   :  { %1073 = vperm.xlu1 %2593, %v2859_v10  }
  0x2c   :  { %1175 = vperm.xlu0 %2595, %v2852_v9  }
  0x2f   :  { %2596 = vset.pattern.permute.xlu1 %v2733_v11  ;;  %v2464_v11 = vld [vmem:[%s4986_s2 + $0x48] sm:$0xff] }
  0x30   :  { %1167 = vperm.xlu1 %2596, %v2825_v4   ;;  %1183 = vperm.xlu0 %2595, %v2859_v10  }
  0x34   :  { %1171 = vperm.xlu1 %2596, %v2832_v5   ;;  %2598 = vset.pattern.permute.xlu0 %v2734_v12 }
  0x35   :  { %1277 = vperm.xlu0 %2598, %v2825_v4  }
  0x38   :  { %1179 = vperm.xlu1 %2596, %v2838_v6  }
  0x39   :  { %1289 = vperm.xlu0 %2598, %v2838_v6  }
  0x3c   :  { %2597 = vset.pattern.permute.xlu1 %v2734_v12  ;;  %v48_v12 = vld [vmem:[%s4986_s2 + $0x8] sm:$0xff] }
  0x3d   :  { %1273 = vperm.xlu1 %2597, %v2844_v8   ;;  %2599 = vset.pattern.permute.xlu0 %v2735_v13 }
  0x3e   :  { %1383 = vperm.xlu0 %2599, %v2844_v8  }
  0x41   :  { %1281 = vperm.xlu1 %2597, %v2832_v5  }
  0x42   :  { %1395 = vperm.xlu0 %2599, %v2852_v9  }
  0x45   :  { %1285 = vperm.xlu1 %2597, %v2852_v9  }
  0x46   :  { %1403 = vperm.xlu0 %2599, %v2859_v10  }
  0x49   :  { %1293 = vperm.xlu1 %2597, %v2859_v10  }
  0x4a   :  { %2602 = vset.pattern.permute.xlu0 %v2736_v14 }
  0x4b   :  { %1497 = vperm.xlu0 %2602, %v2825_v4  }
  0x4d   :  { %2600 = vset.pattern.permute.xlu1 %v2735_v13  ;;  %v2480_v13 = vld [vmem:[%s4986_s2 + $0x60] sm:$0xff] }
  0x4e   :  { %1387 = vperm.xlu1 %2600, %v2825_v4  }
  0x4f   :  { %2603 = vset.pattern.permute.xlu0 %v2737_v15 }
  0x50   :  { %1609 = vperm.xlu0 %2603, %v2859_v10  }
  0x52   :  { %1391 = vperm.xlu1 %2600, %v2832_v5  }
  0x54   :  { %1601 = vperm.xlu0 %2603, %v2852_v9  }
  0x56   :  { %1399 = vperm.xlu1 %2600, %v2838_v6  }
  0x58   :  { %1597 = vperm.xlu0 %2603, %v2832_v5  }
  0x5a   :  { %2601 = vset.pattern.permute.xlu1 %v2736_v14 }
  0x5b   :  { %1493 = vperm.xlu1 %2601, %v2844_v8  }
  0x5c   :  { %1593 = vperm.xlu0 %2603, %v2825_v4  }
  0x5f   :  { %1501 = vperm.xlu1 %2601, %v2832_v5  }
  0x63   :  { %1513 = vperm.xlu1 %2601, %v2859_v10  }
  0x67   :  { %1509 = vperm.xlu1 %2601, %v2838_v6  }
  0x6b   :  { %2604 = vset.pattern.permute.xlu1 %v2737_v15 }
  0x6c   :  { %1605 = vperm.xlu1 %2604, %v2838_v6  }
  0x70   :  { %2605 = vset.pattern.permute.xlu1 %v2738_v25 }
  0x71   :  { %1801 = vperm.xlu1 %2605, %v2859_v10  }
  0x74   :  { %v54_v22 = vpop.permute.xlu1 %53  ;;  %v85_v23 = vpop.permute.xlu0 %84 }
  0x75   :  { %2606 = vset.pattern.permute.xlu1 %v2736_v14  ;;  %v4998_v14 = vmov 10  }
  0x76   :  { %1505 = vperm.xlu1 %2606, %v2852_v9  }
  0x78   :  { %v56_v31 = vpop.permute.xlu1 %55  ;;  %v87_v32 = vpop.permute.xlu0 %86 }
  0x79   :  { %v60_v33 = vsel %vm59_vm0, %v54_v22, %v56_v31  ;;  %v61_v34 = vsel %vm59_vm0, %v56_v31, %v54_v22  ;;  %v89_v35 = vsel %vm88_vm1, %v85_v23, %v87_v32  ;;  %v90_v36 = vsel %vm88_vm1, %v87_v32, %v85_v23  ;;  %v51_v22 = vld [vmem:[%s4986_s2 + $0x20] sm:$0xff]  ;;  %v2482_v23 = vld [vmem:[%s4986_s2 + $0x70] sm:$0xff] }
  0x7a   :  { %v105_v37 = vmul.f32 %v2912_v26, %v89_v35  ;;  %v104_v39 = vmul.f32 %v2915_v27, %v90_v36  ;;  %v76_v43 = vmul.f32 %v2921_v29, %v60_v33  ;;  %v75_v45 = vmul.f32 %v2924_v30, %v61_v34  ;;  %2607 = vset.pattern.permute.xlu1 %v4999_v7  ;;  %v2484_v31 = vld [vmem:[%s4986_s2 + $0x80] sm:$0xff]  ;;  %v2493_v32 = vld [vmem:[%s4986_s2 + $0x90] sm:$0xff]  ;;  %v2485_v33 = vld [vmem:[%s4986_s2 + $0x88] sm:$0xff] }
  0x7b   :  { %1911 = vperm.xlu1 %2607, %v2859_v10   ;;  %v2494_v34 = vld [vmem:[%s4986_s2 + $0x98] sm:$0xff]  ;;  %v2495_v35 = vld [vmem:[%s4986_s2 + $0xa0] sm:$0xff] }
  0x7c   :  { %v355_v46 = vpop.permute.xlu1 %354  ;;  %155 = vmatprep.subr.mxu0 %v105_v37  ;;  %2562 = vmatprep.subr.mxu1 %v105_v37  ;;  %v353_v47 = vpop.permute.xlu0 %352  ;;  %v2506_v36 = vld [vmem:[%s4986_s2 + $0xc0] sm:$0xff]  ;;  %v2507_v37 = vld [vmem:[%s4986_s2 + $0xc8] sm:$0xff] }
  0x7d   :  { %v357_v48 = vsel %vm356_vm2, %v353_v47, %v355_v46  ;;  %v358_v49 = vsel %vm356_vm2, %v355_v46, %v353_v47  ;;  %156 = vmatpush1.msra.mxu0 %v104_v39  ;;  %2563 = vmatpush1.msra.mxu1 %v104_v39  ;;  %v2508_v39 = vld [vmem:[%s4986_s2 + $0xd0] sm:$0xff] }
  0x7e   :  { %v372_v50 = vmul.f32 %v2937_v38, %v358_v49  ;;  %2468 = vmatmul.mubr.msk.f32.vlgmr.msra.gmra.mxu0 %vm106_vm3, %v2461_v41  ;;  %2472 = vmatmul.mubr.msk.f32.vlgmr.msra.gmra.mxu1 %vm106_vm3, %v2465_v42  ;;  %v373_v51 = vmul.f32 %v2941_v40, %v357_v48  ;;  %v2498_v41 = vld [vmem:[%s4986_s2 + $0xb8] sm:$0xff] }
  0x7f   :  { %274 = vmatprep.subr.mxu1 %v76_v43  ;;  %195 = vmatprep.mubr.f32.mxu0 %v2728_v2  ;;  %v2509_v42 = vld [vmem:[%s4986_s2 + $0xd8] sm:$0xff]  ;;  %v2510_v43 = vld [vmem:[%s4986_s2 + $0xe0] sm:$0xff] }
  0x80   :  { %275 = vmatpush1.msra.mxu1 %v75_v45  ;;  %422 = vmatprep.subr.mxu0 %v373_v51  ;;  %v515_v55 = vpop.permute.xlu1 %514  ;;  %v513_v57 = vpop.permute.xlu0 %512  ;;  %v4992_v45 = vmov 7  }
  0x81   :  { %219 = vmatprep.mubr.f32.mxu1 %v2728_v2  ;;  %423 = vmatpush1.msra.mxu0 %v372_v50  ;;  %v517_v58 = vsel %vm516_vm4, %v513_v57, %v515_v55  ;;  %v518_v59 = vsel %vm516_vm4, %v515_v55, %v513_v57 }
  0x82   :  { %2469 = vmatmul.mubr.msk.f32.gmra.mxu0 %vm106_vm3, %v2462_v53  ;;  %2473 = vmatmul.mubr.msk.f32.gmra.mxu1 %vm106_vm3, %v2466_v54  ;;  %v533_v60 = vmul.f32 %v2965_v52, %v517_v58  ;;  %v532_v63 = vmul.f32 %v2975_v56, %v518_v59 }
  0x83   :  { %201 = vmatprep.mubr.f32.mxu0 %v2728_v2  ;;  %308 = vmatprep.mubr.f32.mxu1 %v2728_v2 }
  0x84   :  { %582 = vmatprep.subr.mxu1 %v533_v60  ;;  %720 = vmatprep.subr.mxu0 %v2805_v1  ;;  %v49_v1 = vld [vmem:[%s4986_s2 + $0x10] sm:$0xff] }
  0x85   :  { %2608 = vset.pattern.permute.xlu1 %v4998_v14  ;;  %2611 = vset.pattern.permute.xlu0 %v4992_v45 }
  0x86   :  { %2470 = vmatmul.mubr.msk.f32.gmra.mxu0 %vm106_vm3, %v2463_v61  ;;  %2474 = vmatmul.mubr.msk.f32.vlgmr.msra.gmra.mxu1 %vm106_vm3, %v47_v62 }
  0x87   :  { %207 = vmatprep.mubr.f32.mxu0 %v2728_v2  ;;  %314 = vmatprep.mubr.f32.mxu1 %v2728_v2 }
  0x88   :  { %583 = vmatpush1.msra.mxu1 %v532_v63  ;;  %2021 = vperm.xlu1 %2608, %v2859_v10  }
  0x89   :  { %1705 = vperm.xlu0 %2611, %v2859_v10  }
  0x8a   :  { %2471 = vmatmul.mubr.msk.f32.gmra.mxu0 %vm106_vm3, %v2464_v11  ;;  %2475 = vmatmul.mubr.msk.f32.gmra.mxu1 %vm106_vm3, %v48_v12 }
  0x8b   :  { %320 = vmatprep.mubr.f32.mxu1 %v2728_v2  ;;  %456 = vmatprep.mubr.f32.mxu0 %v2728_v2 }
  0x8c   :  { %2609 = vset.pattern.permute.xlu1 %v4996_v21 }
  0x8d   :  { %2117 = vperm.xlu1 %2609, %v2859_v10   ;;  %1701 = vperm.xlu0 %2611, %v2838_v6   ;;  %v3156_v60 = vpop.permute.xlu0 %938 }
  0x8e   :  { %2476 = vmatmul.mubr.msk.f32.gmra.mxu1 %vm106_vm3, %v49_v1  ;;  %2487 = vmatmul.mubr.msk.f32.vlgmr.msra.gmra.mxu0 %vm106_vm3, %v2480_v13  ;;  %5181 = vst [vmem:[#allocation13_spill] sm:$0xff] %v3156_v60 }
  0x8f   :  { %326 = vmatprep.mubr.f32.mxu1 %v2728_v2  ;;  %462 = vmatprep.mubr.f32.mxu0 %v2728_v2 }
  0x90   :  { %721 = vmatpush1.msra.mxu0 %v2796_v0  ;;  %v52_v0 = vld [vmem:[%s4986_s2 + $0x28] sm:$0xff] }
  0x91   :  { %2610 = vset.pattern.permute.xlu1 %v4994_v28  ;;  %1697 = vperm.xlu0 %2611, %v2852_v9  }
  0x92   :  { %2477 = vmatmul.mubr.msk.f32.gmra.mxu1 %vm106_vm3, %v50_v16  ;;  %2488 = vmatmul.mubr.msk.f32.gmra.mxu0 %vm106_vm3, %v2481_v17 }
  0x93   :  { %332 = vmatprep.mubr.f32.mxu1 %v2728_v2  ;;  %468 = vmatprep.mubr.f32.mxu0 %v2728_v2 }
  0x94   :  { %2165 = vperm.xlu1 %2610, %v2859_v10  }
  0x95   :  { %1693 = vperm.xlu0 %2611, %v2832_v5  }
  0x96   :  { %2478 = vmatmul.mubr.msk.f32.gmra.mxu1 %vm106_vm3, %v51_v22  ;;  %2489 = vmatmul.mubr.msk.f32.gmra.mxu0 %vm106_vm3, %v2482_v23  ;;  %v3160_v23 = vpop.permute.xlu0 %953 }
  0x97   :  { %338 = vmatprep.mubr.f32.mxu1 %v2728_v2  ;;  %474 = vmatprep.mubr.f32.mxu0 %v2728_v2 }
  0x98   :  { %2161 = vperm.xlu1 %2610, %v2838_v6  }
  0x99   :  { %1689 = vperm.xlu0 %2611, %v2825_v4  }
  0x9a   :  { %2479 = vmatmul.mubr.msk.f32.gmra.mxu1 %vm106_vm3, %v52_v0  ;;  %2490 = vmatmul.mubr.msk.f32.gmra.mxu0 %vm106_vm3, %v2483_v24 }
  0x9b   :  { %480 = vmatprep.mubr.f32.mxu0 %v2728_v2  ;;  %616 = vmatprep.mubr.f32.mxu1 %v2728_v2 }
  0x9c   :  { %2612 = vset.pattern.permute.xlu1 %v2737_v15  ;;  %v2496_v15 = vld [vmem:[%s4986_s2 + $0xa8] sm:$0xff] }
  0x9d   :  { %1589 = vperm.xlu1 %2612, %v2844_v8   ;;  %v2497_v8 = vld [vmem:[%s4986_s2 + $0xb0] sm:$0xff]  ;;  %2613 = vset.pattern.permute.xlu0 %v2738_v25  ;;  %s2744_s2 = smov 33  }
  0x9e   :  { %2491 = vmatmul.mubr.msk.f32.gmra.mxu0 %vm106_vm3, %v2484_v31  ;;  %2500 = vmatmul.mubr.msk.f32.vlgmr.msra.gmra.mxu1 %vm106_vm3, %v2493_v32 }
  0x9f   :  { %486 = vmatprep.mubr.f32.mxu0 %v2728_v2  ;;  %622 = vmatprep.mubr.f32.mxu1 %v2728_v2 }
  0xa0   :  { %1797 = vperm.xlu0 %2613, %v2838_v6  }
  0xa1   :  { %2614 = vset.pattern.permute.xlu1 %v4994_v28 }
  0xa2   :  { %2492 = vmatmul.mubr.msk.f32.gmra.mxu0 %vm106_vm3, %v2485_v33  ;;  %2501 = vmatmul.mubr.msk.f32.gmra.mxu1 %vm106_vm3, %v2494_v34 }
  0xa3   :  { %628 = vmatprep.mubr.f32.mxu1 %v2728_v2  ;;  %754 = vmatprep.mubr.f32.mxu0 %v2728_v2 }
  0xa4   :  { %1793 = vperm.xlu0 %2613, %v2852_v9  }
  0xa6   :  { %2502 = vmatmul.mubr.msk.f32.gmra.mxu1 %vm106_vm3, %v2495_v35  ;;  %2512 = vmatmul.mubr.msk.f32.vlgmr.msra.gmra.mxu0 %vm106_vm3, %v2506_v36 }
  0xa7   :  { %634 = vmatprep.mubr.f32.mxu1 %v2728_v2  ;;  %760 = vmatprep.mubr.f32.mxu0 %v2728_v2 }
  0xa8   :  { %1789 = vperm.xlu0 %2613, %v2832_v5  }
  0xaa   :  { %2503 = vmatmul.mubr.msk.f32.gmra.mxu1 %vm106_vm3, %v2496_v15  ;;  %2513 = vmatmul.mubr.msk.f32.gmra.mxu0 %vm106_vm3, %v2507_v37 }
  0xab   :  { %640 = vmatprep.mubr.f32.mxu1 %v2728_v2  ;;  %766 = vmatprep.mubr.f32.mxu0 %v2728_v2 }
  0xac   :  { %1785 = vperm.xlu0 %2613, %v2825_v4  }
  0xae   :  { %2504 = vmatmul.mubr.msk.f32.gmra.mxu1 %vm106_vm3, %v2497_v8  ;;  %2514 = vmatmul.mubr.msk.f32.gmra.mxu0 %vm106_vm3, %v2508_v39 }
  0xaf   :  { %646 = vmatprep.mubr.f32.mxu1 %v2728_v2  ;;  %772 = vmatprep.mubr.f32.mxu0 %v2728_v2 }
  0xb2   :  { %2505 = vmatmul.mubr.msk.f32.gmra.mxu1 %vm106_vm3, %v2498_v41  ;;  %2515 = vmatmul.mubr.msk.f32.gmra.mxu0 %vm106_vm3, %v2509_v42  ;;  %v3170_v41 = vpop.permute.xlu0 %963 }
  0xb3   :  { %778 = vmatprep.mubr.f32.mxu0 %v2728_v2  ;;  %2435 = vmatprep.mubr.f32.mxu1 %v2728_v2  ;;  %5184 = vst [vmem:[#allocation16_spill] sm:$0xff] %v3170_v41 }
  0xb6   :  { %2516 = vmatmul.mubr.msk.f32.gmra.mxu0 %vm106_vm3, %v2510_v43 }
  0xb7   :  { %784 = vmatprep.mubr.f32.mxu0 %v2728_v2  ;;  %v3142_v2 = vpop.permute.xlu1 %943 }
  0xb8   :  { %5180 = vst [vmem:[#allocation12_spill] sm:$0xff] %v3142_v2 }
  0xba   :  { %2517 = vmatmul.mubr.msk.f32.gmra.mxu0 %vm106_vm3, %v2511_v44 }
  0xbb   :  { %v3146_v51 = vpop.permute.xlu1 %948 }
  0xbf   :  { %v3150_v55 = vpop.permute.xlu1 %958 }
  0xc3   :  { %v3158_v63 = vpop.permute.xlu1 %1053 }
  0xc4   :  { %5182 = vst [vmem:[#allocation14_spill] sm:$0xff] %v3158_v63 }
  0xc7   :  { %v3164_v31 = vpop.permute.xlu1 %1061 }
  0xc8   :  { %5183 = vst [vmem:[#allocation15_spill] sm:$0xff] %v3164_v31 }
  0xcb   :  { %v3172_v44 = vpop.permute.xlu1 %1065 }
 0x13e   :  { %v191_v10 = vpop.f32.mrf.mxu0  ;;  %v215_v46 = vpop.f32.mrf.mxu1 }
 0x140   :  { %v193_v47 = vpop.f32.mrf.mxu0  ;;  %v217_v48 = vpop.f32.mrf.mxu1 }
 0x142   :  { %v3144_v49 = vpop.f32.mrf.mxu0  ;;  %v221_v50 = vpop.f32.mrf.mxu1 }
 0x144   :  { %v3148_v25 = vpop.f32.mrf.mxu0  ;;  %v223_v6 = vpop.f32.mrf.mxu1 }
 0x146   :  { %v203_v53 = vpop.f32.mrf.mxu0  ;;  %v310_v9 = vpop.f32.mrf.mxu1 }
 0x148   :  { %v205_v54 = vpop.f32.mrf.mxu0  ;;  %v312_v5 = vpop.f32.mrf.mxu1 }
 0x14a   :  { %v209_v4 = vpop.f32.mrf.mxu0  ;;  %v3152_v57 = vpop.f32.mrf.mxu1 }
 0x14c   :  { %v211_v58 = vpop.f32.mrf.mxu0  ;;  %v3154_v59 = vpop.f32.mrf.mxu1 }
 0x14e   :  { %v322_v61 = vpop.f32.mrf.mxu1  ;;  %v458_v62 = vpop.f32.mrf.mxu0 }
 0x14f   :  { %v323_v11 = vadd.f32 %v322_v61, %v203_v53 }
 0x150   :  { %v324_v12 = vpop.f32.mrf.mxu1  ;;  %v460_v1 = vpop.f32.mrf.mxu0 }
 0x151   :  { %v325_v13 = vadd.f32 %v324_v12, %v205_v54 }
 0x152   :  { %v328_v16 = vpop.f32.mrf.mxu1  ;;  %v464_v17 = vpop.f32.mrf.mxu0 }
 0x153   :  { %v329_v22 = vadd.f32 %v328_v16, %v209_v4 }
 0x154   :  { %v330_v0 = vpop.f32.mrf.mxu1  ;;  %v3162_v24 = vpop.f32.mrf.mxu0 }
 0x155   :  { %v331_v32 = vadd.f32 %v330_v0, %v211_v58  ;;  %v311_v0 = vadd.f32 %v310_v9, %v191_v10 }
 0x156   :  { %v334_v33 = vpop.f32.mrf.mxu1  ;;  %v470_v34 = vpop.f32.mrf.mxu0 }
 0x157   :  { %v335_v35 = vadd.f32 %v334_v33, %v215_v46  ;;  %v3166_v36 = vadd.f32 %v470_v34, %v323_v11  ;;  %v3184_v34 = vpop.permute.xlu1 %1073 }
 0x158   :  { %v336_v15 = vpop.f32.mrf.mxu1  ;;  %v472_v37 = vpop.f32.mrf.mxu0  ;;  %5186 = vst [vmem:[#allocation18_spill] sm:$0xff] %v3184_v34 }
 0x159   :  { %v337_v8 = vadd.f32 %v336_v15, %v217_v48  ;;  %v3168_v39 = vadd.f32 %v472_v37, %v325_v13  ;;  %v3180_v48 = vpop.permute.xlu0 %1057  ;;  %v493_v15 = vadd.f32 %v458_v62, %v311_v0 }
 0x15a   :  { %v340_v42 = vpop.f32.mrf.mxu1  ;;  %v476_v43 = vpop.f32.mrf.mxu0  ;;  %5185 = vst [vmem:[#allocation17_spill] sm:$0xff] %v3180_v48 }
 0x15b   :  { %v341_v53 = vadd.f32 %v340_v42, %v221_v50  ;;  %v3174_v54 = vadd.f32 %v476_v43, %v329_v22  ;;  %v313_v22 = vadd.f32 %v312_v5, %v193_v47  ;;  %v3192_v9 = vpop.permute.xlu1 %1167 }
 0x15c   :  { %v342_v4 = vpop.f32.mrf.mxu1  ;;  %v478_v58 = vpop.f32.mrf.mxu0  ;;  %5188 = vst [vmem:[#allocation20_spill] sm:$0xff] %v3192_v9 }
 0x15d   :  { %v343_v61 = vadd.f32 %v342_v4, %v223_v6  ;;  %v3176_v46 = vadd.f32 %v478_v58, %v331_v32  ;;  %v494_v42 = vadd.f32 %v460_v1, %v313_v22  ;;  %v3190_v58 = vpop.permute.xlu0 %1069  ;;  %v317_v1 = vadd.f32 %v3152_v57, %v3144_v49 }
 0x15e   :  { %v482_v11 = vpop.f32.mrf.mxu0  ;;  %v618_v13 = vpop.f32.mrf.mxu1  ;;  %5187 = vst [vmem:[#allocation19_spill] sm:$0xff] %v3190_v58  ;;  %v319_v49 = vadd.f32 %v3154_v59, %v3148_v25 }
 0x15f   :  { %v3178_v12 = vadd.f32 %v482_v11, %v335_v35  ;;  %v653_v43 = vadd.f32 %v618_v13, %v493_v15  ;;  %v495_v13 = vadd.f32 %v464_v17, %v317_v1 }
 0x160   :  { %v484_v16 = vpop.f32.mrf.mxu0  ;;  %v620_v6 = vpop.f32.mrf.mxu1 }
 0x161   :  { %v3182_v33 = vadd.f32 %v484_v16, %v337_v8  ;;  %v654_v11 = vadd.f32 %v620_v6, %v494_v42  ;;  %v3194_v5 = vpop.permute.xlu0 %1163 }
 0x162   :  { %v488_v50 = vpop.f32.mrf.mxu0  ;;  %5189 = vst [vmem:[#allocation21_spill] sm:$0xff] %v3194_v5 }
 0x163   :  { %v3186_v37 = vadd.f32 %v488_v50, %v341_v53  ;;  %v3196_v53 = vpop.permute.xlu1 %1171 }
 0x164   :  { %v490_v32 = vpop.f32.mrf.mxu0 }
 0x165   :  { %v3188_v35 = vadd.f32 %v490_v32, %v343_v61  ;;  %v624_v61 = vpop.f32.mrf.mxu1  ;;  %v3200_v22 = vpop.permute.xlu0 %1175 }
 0x166   :  { %v756_v4 = vpop.f32.mrf.mxu0  ;;  %v655_v15 = vadd.f32 %v624_v61, %v495_v13 }
 0x167   :  { %v791_v10 = vadd.f32 %v756_v4, %v653_v43  ;;  %v3202_v6 = vpop.permute.xlu1 %1179  ;;  %v626_v17 = vpop.f32.mrf.mxu1 }
 0x168   :  { %v758_v8 = vpop.f32.mrf.mxu0 }
 0x169   :  { %v815_v16 = vmin.f32 %v791_v10, 0.0  ;;  %v792_v45 = vadd.f32 %v758_v8, %v654_v11  ;;  %v3204_v42 = vpop.permute.xlu0 %1183  ;;  %vm803_vm5 = vcmp.gt.f32.partialorder %v791_v10, 0.0  ;;  %v496_v8 = vadd.f32 %v3162_v24, %v319_v49 }
 0x16a   :  { %v762_v50 = vpop.f32.mrf.mxu0  ;;  %5190 = vst [vmem:[#allocation22_spill] sm:$0xff] %v3204_v42 }
 0x16b   :  { %v827_v47 = vmul.f32 1.442695, %v815_v16  ;;  %v816_v62 = vmin.f32 %v792_v45, 0.0  ;;  %v793_v32 = vadd.f32 %v762_v50, %v655_v15  ;;  %v3206_v11 = vpop.permute.xlu1 %1273  ;;  %v656_v25 = vadd.f32 %v626_v17, %v496_v8 }
 0x16c   :  { %5191 = vst [vmem:[#allocation23_spill] sm:$0xff] %v3206_v11  ;;  %vm804_vm6 = vcmp.gt.f32.partialorder %v792_v45, 0.0 }
 0x16d   :  { %2625 = vpow2.f32 %v827_v47  ;;  %v829_v0 = vmul.f32 1.442695, %v816_v62  ;;  %v817_v43 = vmin.f32 %v793_v32, 0.0  ;;  %v764_v62 = vpop.f32.mrf.mxu0  ;;  %v3217_v1 = vpop.permute.xlu0 %1277  ;;  %vm805_vm7 = vcmp.gt.f32.partialorder %v793_v32, 0.0 }
 0x16e   :  { %5193 = vst [vmem:[#allocation25_spill] sm:$0xff] %v3217_v1  ;;  %v794_v61 = vadd.f32 %v764_v62, %v656_v25 }
 0x16f   :  { %2627 = vpow2.f32 %v829_v0  ;;  %v831_v47 = vmul.f32 1.442695, %v817_v43  ;;  %v3219_v59 = vpop.permute.xlu1 %1281  ;;  %v768_v8 = vpop.f32.mrf.mxu0 }
 0x170   :  { %5194 = vst [vmem:[#allocation26_spill] sm:$0xff] %v3219_v59  ;;  %v818_v0 = vmin.f32 %v794_v61, 0.0  ;;  %vm806_vm8 = vcmp.gt.f32.partialorder %v794_v61, 0.0 }
 0x171   :  { %2629 = vpow2.f32 %v831_v47  ;;  %v770_v3 = vpop.f32.mrf.mxu0 }
 0x172   :  { %v833_v43 = vmul.f32 1.442695, %v818_v0 }
 0x173   :  { %v3227_v50 = vpop.permute.xlu1 %1285  ;;  %v774_v7 = vpop.f32.mrf.mxu0 }
 0x174   :  { %2631 = vpow2.f32 %v833_v43 }
 0x177   :  { %v3241_v49 = vpop.permute.xlu1 %1293 }
 0x178   :  { %5198 = vst [vmem:[#allocation30_spill] sm:$0xff] %v3241_v49 }
 0x17a   :  { %v2626_v4 = vpop.eup %2625 }
 0x17b   :  { %v2518_v57 = vadd.f32 -1.0, %v2626_v4 }
 0x17c   :  { %v2628_v24 = vpop.eup %2627 }
 0x17d   :  { %v3211_v16 = vsel %vm803_vm5, %v791_v10, %v2518_v57  ;;  %v3225_v10 = vpop.permute.xlu0 %1289  ;;  %v2519_v13 = vadd.f32 -1.0, %v2628_v24  ;;  %v630_v57 = vpop.f32.mrf.mxu1  ;;  %vm899_vm5 = vcmp.lt.s32.totalorder %v2895_v18, 34 }
 0x17e   :  { %5192 = vst [vmem:[#allocation24_spill] sm:$0xff] %v3211_v16  ;;  %990 = vrot.lane.b32.xlu1 %v3211_v16, %s2744_s2  ;;  %875 = vrot.lane.b32.xlu0 %v3211_v16, %s2745_s13  ;;  %5195 = vst [vmem:[#allocation27_spill] sm:$0xff] %v3225_v10  ;;  %v2630_v17 = vpop.eup %2629  ;;  %v3250_v24 = vpop.permute.xlu1 %1387 }
 0x17f   :  { %v3233_v15 = vsel %vm804_vm6, %v792_v45, %v2519_v13  ;;  %v657_v45 = vadd.f32 %v630_v57, %v3166_v36  ;;  %v2520_v62 = vadd.f32 -1.0, %v2630_v17  ;;  %5199 = vst [vmem:[#allocation31_spill] sm:$0xff] %v3250_v24  ;;  %vm1124_vm6 = vcmp.lt.s32.totalorder %v2895_v18, 32 }
 0x180   :  { %5196 = vst [vmem:[#allocation28_spill] sm:$0xff] %v3233_v15 }
 0x181   :  { %v3239_v4 = vpop.permute.xlu0 %1383  ;;  %v795_v25 = vadd.f32 %v768_v8, %v657_v45  ;;  %v3256_v13 = vsel %vm805_vm7, %v793_v32, %v2520_v62  ;;  %v2632_v17 = vpop.eup %2631  ;;  %vm1344_vm7 = vcmp.lt.s32.totalorder %v2895_v18, 30 }
 0x182   :  { %1210 = vrot.lane.b32.xlu1 %v3211_v16, %s2746_s14  ;;  %1100 = vrot.lane.b32.xlu0 %v3211_v16, %s2747_s15  ;;  %5197 = vst [vmem:[#allocation29_spill] sm:$0xff] %v3239_v4  ;;  %5200 = vst [vmem:[#allocation32_spill] sm:$0xff] %v3256_v13  ;;  %v3264_v43 = vpop.permute.xlu1 %1391  ;;  %v632_v32 = vpop.f32.mrf.mxu1  ;;  %v2521_v45 = vadd.f32 -1.0, %v2632_v17 }
 0x183   :  { %v819_v0 = vmin.f32 %v795_v25, 0.0  ;;  %vm807_vm9 = vcmp.gt.f32.partialorder %v795_v25, 0.0 }
 0x184   :  { %v3279_v28 = vsel %vm806_vm8, %v794_v61, %v2521_v45  ;;  %v636_v45 = vpop.f32.mrf.mxu1  ;;  %vm1014_vm8 = vcmp.lt.s32.totalorder %v2895_v18, 33 }
 0x185   :  { %v3248_v47 = vpop.permute.xlu0 %1395  ;;  %v835_v57 = vmul.f32 1.442695, %v819_v0  ;;  %v658_v0 = vadd.f32 %v632_v32, %v3168_v39  ;;  %5203 = vst [vmem:[#allocation35_spill] sm:$0xff] %v3279_v28 }
 0x186   :  { %1430 = vrot.lane.b32.xlu1 %v3211_v16, %s2748_s16  ;;  %1320 = vrot.lane.b32.xlu0 %v3211_v16, %s2749_s17  ;;  %v3272_v62 = vpop.permute.xlu1 %1399 }
 0x187   :  { %2633 = vpow2.f32 %v835_v57  ;;  %v796_v21 = vadd.f32 %v770_v3, %v658_v0 }
 0x189   :  { %v3262_v36 = vpop.permute.xlu0 %1403  ;;  %v820_v14 = vmin.f32 %v796_v21, 0.0  ;;  %vm808_vm10 = vcmp.gt.f32.partialorder %v796_v21, 0.0 }
 0x18a   :  { %1002 = vrot.lane.b32.xlu1 %v3233_v15, %s2744_s2  ;;  %887 = vrot.lane.b32.xlu0 %v3233_v15, %s2745_s13  ;;  %5201 = vst [vmem:[#allocation33_spill] sm:$0xff] %v3262_v36  ;;  %v3287_v17 = vpop.permute.xlu1 %1493 }
 0x18b   :  { %5205 = vst [vmem:[#allocation37_spill] sm:$0xff] %v3287_v17  ;;  %v837_v3 = vmul.f32 1.442695, %v820_v14 }
 0x18d   :  { %v3270_v8 = vpop.permute.xlu0 %1497  ;;  %2635 = vpow2.f32 %v837_v3 }
 0x18e   :  { %1222 = vrot.lane.b32.xlu1 %v3233_v15, %s2746_s14  ;;  %1112 = vrot.lane.b32.xlu0 %v3233_v15, %s2747_s15  ;;  %5202 = vst [vmem:[#allocation34_spill] sm:$0xff] %v3270_v8  ;;  %v3295_v32 = vpop.permute.xlu1 %1501 }
 0x18f   :  { %5207 = vst [vmem:[#allocation39_spill] sm:$0xff] %v3295_v32  ;;  %v659_v32 = vadd.f32 %v636_v45, %v3174_v54 }
 0x191   :  { %v3285_v57 = vpop.permute.xlu0 %1609  ;;  %v797_v24 = vadd.f32 %v774_v7, %v659_v32  ;;  %v638_v32 = vpop.f32.mrf.mxu1 }
 0x192   :  { %1442 = vrot.lane.b32.xlu1 %v3233_v15, %s2748_s16  ;;  %1332 = vrot.lane.b32.xlu0 %v3233_v15, %s2749_s17  ;;  %5204 = vst [vmem:[#allocation36_spill] sm:$0xff] %v3285_v57  ;;  %v3308_v59 = vpop.permute.xlu1 %1513 }
 0x193   :  { %5209 = vst [vmem:[#allocation41_spill] sm:$0xff] %v3308_v59  ;;  %vm809_vm11 = vcmp.gt.f32.partialorder %v797_v24, 0.0 }
 0x194   :  { %v2634_v61 = vpop.eup %2633 }
 0x195   :  { %v3293_v39 = vpop.permute.xlu0 %1601  ;;  %v2522_v0 = vadd.f32 -1.0, %v2634_v61  ;;  %v821_v61 = vmin.f32 %v797_v24, 0.0 }
 0x196   :  { %992 = vrot.lane.b32.xlu0 %v3256_v13, %s2744_s2  ;;  %877 = vrot.lane.b32.xlu1 %v3256_v13, %s2745_s13  ;;  %5206 = vst [vmem:[#allocation38_spill] sm:$0xff] %v3293_v39  ;;  %v3318_v8 = vpop.permute.xlu1 %1509 }
 0x197   :  { %v3310_v31 = vsel %vm807_vm9, %v795_v25, %v2522_v0  ;;  %5212 = vst [vmem:[#allocation44_spill] sm:$0xff] %v3318_v8  ;;  %v839_v54 = vmul.f32 1.442695, %v821_v61  ;;  %v660_v61 = vadd.f32 %v638_v32, %v3176_v46  ;;  %vm1234_vm9 = vcmp.lt.s32.totalorder %v2895_v18, 31 }
 0x198   :  { %5210 = vst [vmem:[#allocation42_spill] sm:$0xff] %v3310_v31 }
 0x199   :  { %v3305_v14 = vpop.permute.xlu0 %1597  ;;  %2637 = vpow2.f32 %v839_v54 }
 0x19a   :  { %1212 = vrot.lane.b32.xlu0 %v3256_v13, %s2746_s14  ;;  %1102 = vrot.lane.b32.xlu1 %v3256_v13, %s2747_s15  ;;  %5208 = vst [vmem:[#allocation40_spill] sm:$0xff] %v3305_v14  ;;  %v2636_v25 = vpop.eup %2635  ;;  %v3330_v45 = vpop.permute.xlu1 %1605 }
 0x19b   :  { %v2523_v0 = vadd.f32 -1.0, %v2636_v25  ;;  %v776_v14 = vpop.f32.mrf.mxu0 }
 0x19c   :  { %v798_v1 = vadd.f32 %v776_v14, %v660_v61 }
 0x19d   :  { %v3316_v3 = vpop.permute.xlu0 %1593  ;;  %v3339_v9 = vsel %vm808_vm10, %v796_v21, %v2523_v0  ;;  %v642_v21 = vpop.f32.mrf.mxu1  ;;  %vm1454_vm10 = vcmp.lt.s32.totalorder %v2895_v18, 18 }
 0x19e   :  { %1432 = vrot.lane.b32.xlu0 %v3256_v13, %s2748_s16  ;;  %1322 = vrot.lane.b32.xlu1 %v3256_v13, %s2749_s17  ;;  %5211 = vst [vmem:[#allocation43_spill] sm:$0xff] %v3316_v3  ;;  %5215 = vst [vmem:[#allocation47_spill] sm:$0xff] %v3339_v9  ;;  %v3341_v2 = vpop.permute.xlu1 %1801  ;;  %v822_v54 = vmin.f32 %v798_v1, 0.0  ;;  %v780_v0 = vpop.f32.mrf.mxu0  ;;  %v661_v61 = vadd.f32 %v642_v21, %v3178_v12  ;;  %vm810_vm12 = vcmp.gt.f32.partialorder %v798_v1, 0.0 }
 0x19f   :  { %5216 = vst [vmem:[#allocation48_spill] sm:$0xff] %v3341_v2 }
 0x1a0   :  { %v841_v14 = vmul.f32 1.442695, %v822_v54  ;;  %v799_v17 = vadd.f32 %v780_v0, %v661_v61 }
 0x1a1   :  { %v3328_v7 = vpop.permute.xlu0 %1705 }
 0x1a2   :  { %1542 = vrot.lane.b32.xlu1 %v3256_v13, %s2726_s26  ;;  %1004 = vrot.lane.b32.xlu0 %v3279_v28, %s2744_s2  ;;  %5213 = vst [vmem:[#allocation45_spill] sm:$0xff] %v3328_v7  ;;  %v3353_v25 = vpop.permute.xlu1 %1505  ;;  %2639 = vpow2.f32 %v841_v14  ;;  %v823_v5 = vmin.f32 %v799_v17, 0.0  ;;  %vm811_vm13 = vcmp.gt.f32.partialorder %v799_v17, 0.0 }
 0x1a4   :  { %v843_v14 = vmul.f32 1.442695, %v823_v5  ;;  %v782_v5 = vpop.f32.mrf.mxu0 }
 0x1a5   :  { %v3337_v3 = vpop.permute.xlu0 %1701 }
 0x1a6   :  { %1224 = vrot.lane.b32.xlu0 %v3279_v28, %s2746_s14  ;;  %889 = vrot.lane.b32.xlu1 %v3279_v28, %s2745_s13  ;;  %5214 = vst [vmem:[#allocation46_spill] sm:$0xff] %v3337_v3  ;;  %v2638_v32 = vpop.eup %2637  ;;  %v3362_v60 = vpop.permute.xlu1 %1911  ;;  %2641 = vpow2.f32 %v843_v14 }
 0x1a7   :  { %v2524_v4 = vadd.f32 -1.0, %v2638_v32  ;;  %5219 = vst [vmem:[#allocation51_spill] sm:$0xff] %v3362_v60 }
 0x1a9   :  { %v3351_v46 = vpop.permute.xlu0 %1697  ;;  %v3368_v54 = vsel %vm809_vm11, %v797_v24, %v2524_v4  ;;  %v644_v24 = vpop.f32.mrf.mxu1  ;;  %vm1852_vm11 = vcmp.lt.s32.totalorder %v2895_v18, 14 }
 0x1aa   :  { %1444 = vrot.lane.b32.xlu0 %v3279_v28, %s2748_s16  ;;  %1114 = vrot.lane.b32.xlu1 %v3279_v28, %s2747_s15  ;;  %5217 = vst [vmem:[#allocation49_spill] sm:$0xff] %v3351_v46  ;;  %5220 = vst [vmem:[#allocation52_spill] sm:$0xff] %v3368_v54  ;;  %v3376_v21 = vpop.permute.xlu1 %2021  ;;  %v662_v61 = vadd.f32 %v644_v24, %v3182_v33 }
 0x1ab   :  { %5222 = vst [vmem:[#allocation54_spill] sm:$0xff] %v3376_v21  ;;  %v648_v24 = vpop.f32.mrf.mxu1 }
 0x1ad   :  { %v3360_v48 = vpop.permute.xlu0 %1693 }
 0x1ae   :  { %1554 = vrot.lane.b32.xlu0 %v3279_v28, %s2726_s26  ;;  %1334 = vrot.lane.b32.xlu1 %v3279_v28, %s2749_s17  ;;  %5218 = vst [vmem:[#allocation50_spill] sm:$0xff] %v3360_v48  ;;  %v3384_v0 = vpop.permute.xlu1 %2117  ;;  %v800_v48 = vadd.f32 %v782_v5, %v662_v61 }
 0x1af   :  { %v2640_v32 = vpop.eup %2639  ;;  %5224 = vst [vmem:[#allocation56_spill] sm:$0xff] %v3384_v0 }
 0x1b0   :  { %v824_v3 = vmin.f32 %v800_v48, 0.0  ;;  %vm812_vm14 = vcmp.gt.f32.partialorder %v800_v48, 0.0 }
 0x1b1   :  { %v3374_v12 = vpop.permute.xlu0 %1689 }
 0x1b2   :  { %994 = vrot.lane.b32.xlu1 %v3310_v31, %s2744_s2  ;;  %879 = vrot.lane.b32.xlu0 %v3310_v31, %s2745_s13  ;;  %5221 = vst [vmem:[#allocation53_spill] sm:$0xff] %v3374_v12  ;;  %v2525_v12 = vadd.f32 -1.0, %v2640_v32  ;;  %v3397_v11 = vpop.permute.xlu1 %2165  ;;  %v845_v5 = vmul.f32 1.442695, %v824_v3 }
 0x1b3   :  { %v2642_v32 = vpop.eup %2641 }
 0x1b4   :  { %v3399_v63 = vsel %vm810_vm12, %v798_v1, %v2525_v12  ;;  %v786_v1 = vpop.f32.mrf.mxu0  ;;  %v663_v12 = vadd.f32 %v648_v24, %v3186_v37  ;;  %2643 = vpow2.f32 %v845_v5  ;;  %vm1962_vm12 = vcmp.lt.s32.totalorder %v2895_v18, 2 }
 0x1b5   :  { %v3382_v4 = vpop.permute.xlu0 %1797  ;;  %5226 = vst [vmem:[#allocation58_spill] sm:$0xff] %v3399_v63 }
 0x1b6   :  { %1214 = vrot.lane.b32.xlu1 %v3310_v31, %s2746_s14  ;;  %1104 = vrot.lane.b32.xlu0 %v3310_v31, %s2747_s15  ;;  %5223 = vst [vmem:[#allocation55_spill] sm:$0xff] %v3382_v4  ;;  %v3407_v61 = vpop.permute.xlu1 %2161  ;;  %v2526_v4 = vadd.f32 -1.0, %v2642_v32  ;;  %v801_v8 = vadd.f32 %v786_v1, %v663_v12  ;;  %v650_v32 = vpop.f32.mrf.mxu1 }
 0x1b7   :  { %5228 = vst [vmem:[#allocation60_spill] sm:$0xff] %v3407_v61 }
 0x1b8   :  { %v3422_v61 = vsel %vm811_vm13, %v799_v17, %v2526_v4  ;;  %v825_v10 = vmin.f32 %v801_v8, 0.0  ;;  %v788_v17 = vpop.f32.mrf.mxu0  ;;  %v664_v4 = vadd.f32 %v650_v32, %v3188_v35  ;;  %vm813_vm15 = vcmp.gt.f32.partialorder %v801_v8, 0.0 }
 0x1b9   :  { %v3395_v14 = vpop.permute.xlu0 %1793  ;;  %5231 = vst [vmem:[#allocation63_spill] sm:$0xff] %v3422_v61 }
 0x1ba   :  { %1434 = vrot.lane.b32.xlu1 %v3310_v31, %s2748_s16  ;;  %1324 = vrot.lane.b32.xlu0 %v3310_v31, %s2749_s17  ;;  %5225 = vst [vmem:[#allocation57_spill] sm:$0xff] %v3395_v14  ;;  %v3418_v3 = vpop.permute.xlu1 %1589  ;;  %v847_v5 = vmul.f32 1.442695, %v825_v10 }
 0x1bb   :  { %5229 = vst [vmem:[#allocation61_spill] sm:$0xff] %v3418_v3  ;;  %v802_v3 = vadd.f32 %v788_v17, %v664_v4 }
 0x1bc   :  { %2645 = vpow2.f32 %v847_v5 }
 0x1bd   :  { %v3405_v33 = vpop.permute.xlu0 %1789  ;;  %v826_v58 = vmin.f32 %v802_v3, 0.0  ;;  %vm814_vm3 = vcmp.gt.f32.partialorder %v802_v3, 0.0 }
 0x1be   :  { %1736 = vrot.lane.b32.xlu1 %v3310_v31, %s2729_s30  ;;  %1544 = vrot.lane.b32.xlu0 %v3310_v31, %s2726_s26  ;;  %5227 = vst [vmem:[#allocation59_spill] sm:$0xff] %v3405_v33 }
 0x1bf   :  { %v849_v17 = vmul.f32 1.442695, %v826_v58 }
 0x1c1   :  { %v3420_v33 = vpop.permute.xlu0 %1785  ;;  %v2644_v10 = vpop.eup %2643  ;;  %2647 = vpow2.f32 %v849_v17 }
 0x1c2   :  { %1640 = vrot.lane.b32.xlu0 %v3310_v31, %s2727_s27  ;;  %1006 = vrot.lane.b32.xlu1 %v3339_v9, %s2744_s2  ;;  %5230 = vst [vmem:[#allocation62_spill] sm:$0xff] %v3420_v33 }
 0x1c6   :  { %1226 = vrot.lane.b32.xlu1 %v3339_v9, %s2746_s14  ;;  %891 = vrot.lane.b32.xlu0 %v3339_v9, %s2745_s13 }
 0x1ca   :  { %1446 = vrot.lane.b32.xlu1 %v3339_v9, %s2748_s16  ;;  %1116 = vrot.lane.b32.xlu0 %v3339_v9, %s2747_s15 }
 0x1ce   :  { %1556 = vrot.lane.b32.xlu1 %v3339_v9, %s2726_s26  ;;  %1336 = vrot.lane.b32.xlu0 %v3339_v9, %s2749_s17 }
 0x1d2   :  { %1652 = vrot.lane.b32.xlu1 %v3339_v9, %s2727_s27  ;;  %996 = vrot.lane.b32.xlu0 %v3368_v54, %s2744_s2 }
 0x1d6   :  { %1748 = vrot.lane.b32.xlu1 %v3339_v9, %s2729_s30  ;;  %1216 = vrot.lane.b32.xlu0 %v3368_v54, %s2746_s14 }
 0x1da   :  { %881 = vrot.lane.b32.xlu1 %v3368_v54, %s2745_s13  ;;  %1436 = vrot.lane.b32.xlu0 %v3368_v54, %s2748_s16 }
 0x1de   :  { %1106 = vrot.lane.b32.xlu1 %v3368_v54, %s2747_s15  ;;  %1546 = vrot.lane.b32.xlu0 %v3368_v54, %s2726_s26 }
 0x1e2   :  { %1326 = vrot.lane.b32.xlu1 %v3368_v54, %s2749_s17  ;;  %1008 = vrot.lane.b32.xlu0 %v3399_v63, %s2744_s2 }
 0x1e6   :  { %1642 = vrot.lane.b32.xlu1 %v3368_v54, %s2727_s27  ;;  %1228 = vrot.lane.b32.xlu0 %v3399_v63, %s2746_s14 }
 0x1ea   :  { %1738 = vrot.lane.b32.xlu1 %v3368_v54, %s2729_s30  ;;  %1448 = vrot.lane.b32.xlu0 %v3399_v63, %s2748_s16 }
 0x1ee   :  { %893 = vrot.lane.b32.xlu1 %v3399_v63, %s2745_s13  ;;  %883 = vrot.lane.b32.xlu0 %v3422_v61, %s2745_s13 }
 0x1f0   :  { %v3428_v37 = vpop.permute.xlu1 %990  ;;  %v3430_v24 = vpop.permute.xlu0 %875 }
 0x1f1   :  { %5232 = vst [vmem:[#allocation64_spill] sm:$0xff] %v3428_v37  ;;  %5233 = vst [vmem:[#allocation65_spill] sm:$0xff] %v3430_v24  ;;  %v2527_v37 = vadd.f32 -1.0, %v2644_v10 }
 0x1f2   :  { %1118 = vrot.lane.b32.xlu1 %v3399_v63, %s2747_s15  ;;  %1108 = vrot.lane.b32.xlu0 %v3422_v61, %s2747_s15 }
 0x1f3   :  { %v3457_v5 = vsel %vm812_vm14, %v800_v48, %v2527_v37 }
 0x1f4   :  { %v3437_v1 = vpop.permute.xlu1 %1210  ;;  %v3439_v12 = vpop.permute.xlu0 %1100  ;;  %5240 = vst [vmem:[#allocation72_spill] sm:$0xff] %v3457_v5 }
 0x1f5   :  { %5234 = vst [vmem:[#allocation66_spill] sm:$0xff] %v3437_v1  ;;  %5235 = vst [vmem:[#allocation67_spill] sm:$0xff] %v3439_v12 }
 0x1f6   :  { %1338 = vrot.lane.b32.xlu1 %v3399_v63, %s2749_s17  ;;  %1328 = vrot.lane.b32.xlu0 %v3422_v61, %s2749_s17 }
 0x1f8   :  { %v3445_v33 = vpop.permute.xlu1 %1430  ;;  %v3447_v24 = vpop.permute.xlu0 %1320 }
 0x1f9   :  { %5236 = vst [vmem:[#allocation68_spill] sm:$0xff] %v3445_v33  ;;  %5237 = vst [vmem:[#allocation69_spill] sm:$0xff] %v3447_v24  ;;  %v2646_v24 = vpop.eup %2645 }
 0x1fa   :  { %1558 = vrot.lane.b32.xlu1 %v3399_v63, %s2726_s26  ;;  %1548 = vrot.lane.b32.xlu0 %v3422_v61, %s2726_s26  ;;  %v2528_v37 = vadd.f32 -1.0, %v2646_v24 }
 0x1fc   :  { %v3453_v35 = vpop.permute.xlu1 %1002  ;;  %v3455_v32 = vpop.permute.xlu0 %887 }
 0x1fd   :  { %5238 = vst [vmem:[#allocation70_spill] sm:$0xff] %v3453_v35  ;;  %5239 = vst [vmem:[#allocation71_spill] sm:$0xff] %v3455_v32  ;;  %v3603_v35 = vld [vmem:[%s4987_s3 + $0x18] sm:$0xff] }
 0x1fe   :  { %1654 = vrot.lane.b32.xlu1 %v3399_v63, %s2727_s27  ;;  %895 = vrot.lane.b32.xlu0 %v3457_v5, %s2745_s13 }
 0x200   :  { %v3463_v4 = vpop.permute.xlu1 %1222  ;;  %v3465_v10 = vpop.permute.xlu0 %1112 }
 0x201   :  { %5241 = vst [vmem:[#allocation73_spill] sm:$0xff] %v3463_v4  ;;  %5242 = vst [vmem:[#allocation74_spill] sm:$0xff] %v3465_v10  ;;  %v3483_v10 = vsel %vm813_vm15, %v801_v8, %v2528_v37 }
 0x202   :  { %1750 = vrot.lane.b32.xlu1 %v3399_v63, %s2729_s30  ;;  %1120 = vrot.lane.b32.xlu0 %v3457_v5, %s2747_s15 }
 0x204   :  { %v3471_v48 = vpop.permute.xlu1 %1442  ;;  %v3473_v58 = vpop.permute.xlu0 %1332 }
 0x205   :  { %5243 = vst [vmem:[#allocation75_spill] sm:$0xff] %v3471_v48  ;;  %5244 = vst [vmem:[#allocation76_spill] sm:$0xff] %v3473_v58  ;;  %v2648_v48 = vpop.eup %2647 }
 0x206   :  { %998 = vrot.lane.b32.xlu1 %v3422_v61, %s2744_s2  ;;  %1340 = vrot.lane.b32.xlu0 %v3457_v5, %s2749_s17  ;;  %v2529_v37 = vadd.f32 -1.0, %v2648_v48 }
 0x208   :  { %v3479_v33 = vpop.permute.xlu1 %877  ;;  %v3481_v17 = vpop.permute.xlu0 %992 }
 0x209   :  { %5245 = vst [vmem:[#allocation77_spill] sm:$0xff] %v3479_v33  ;;  %5246 = vst [vmem:[#allocation78_spill] sm:$0xff] %v3481_v17  ;;  %v3509_v17 = vsel %vm814_vm3, %v802_v3, %v2529_v37 }
 0x20a   :  { %1218 = vrot.lane.b32.xlu1 %v3422_v61, %s2746_s14  ;;  %1000 = vrot.lane.b32.xlu0 %v3483_v10, %s2744_s2 }
 0x20c   :  { %v3489_v24 = vpop.permute.xlu1 %1102  ;;  %v3491_v58 = vpop.permute.xlu0 %1212 }
 0x20d   :  { %5247 = vst [vmem:[#allocation79_spill] sm:$0xff] %v3489_v24  ;;  %5248 = vst [vmem:[#allocation80_spill] sm:$0xff] %v3491_v58 }
 0x20e   :  { %1438 = vrot.lane.b32.xlu1 %v3422_v61, %s2748_s16  ;;  %1220 = vrot.lane.b32.xlu0 %v3483_v10, %s2746_s14 }
 0x210   :  { %v3497_v33 = vpop.permute.xlu1 %1322  ;;  %v3499_v8 = vpop.permute.xlu0 %1432 }
 0x211   :  { %5249 = vst [vmem:[#allocation81_spill] sm:$0xff] %v3497_v33  ;;  %5250 = vst [vmem:[#allocation82_spill] sm:$0xff] %v3499_v8 }
 0x212   :  { %1644 = vrot.lane.b32.xlu1 %v3422_v61, %s2727_s27  ;;  %1440 = vrot.lane.b32.xlu0 %v3483_v10, %s2748_s16 }
 0x214   :  { %v3505_v24 = vpop.permute.xlu1 %1542  ;;  %v3507_v58 = vpop.permute.xlu0 %1004 }
 0x215   :  { %5251 = vst [vmem:[#allocation83_spill] sm:$0xff] %v3505_v24  ;;  %5252 = vst [vmem:[#allocation84_spill] sm:$0xff] %v3507_v58 }
 0x216   :  { %1740 = vrot.lane.b32.xlu1 %v3422_v61, %s2729_s30  ;;  %1012 = vrot.lane.b32.xlu0 %v3509_v17, %s2744_s2 }
 0x218   :  { %v3515_v48 = vpop.permute.xlu1 %889  ;;  %v3517_v33 = vpop.permute.xlu0 %1224 }
 0x219   :  { %5253 = vst [vmem:[#allocation85_spill] sm:$0xff] %v3515_v48  ;;  %5254 = vst [vmem:[#allocation86_spill] sm:$0xff] %v3517_v33 }
 0x21a   :  { %1836 = vrot.lane.b32.xlu1 %v3422_v61, %s2750_s18  ;;  %1232 = vrot.lane.b32.xlu0 %v3509_v17, %s2746_s14 }
 0x21c   :  { %v3523_v24 = vpop.permute.xlu1 %1114  ;;  %v3525_v3 = vpop.permute.xlu0 %1444 }
 0x21d   :  { %5255 = vst [vmem:[#allocation87_spill] sm:$0xff] %v3523_v24  ;;  %5256 = vst [vmem:[#allocation88_spill] sm:$0xff] %v3525_v3 }
 0x21e   :  { %1946 = vrot.lane.b32.xlu1 %v3422_v61, %s2751_s19  ;;  %1452 = vrot.lane.b32.xlu0 %v3509_v17, %s2748_s16 }
 0x220   :  { %v3531_v37 = vpop.permute.xlu1 %1334  ;;  %v3533_v8 = vpop.permute.xlu0 %1554 }
 0x221   :  { %5257 = vst [vmem:[#allocation89_spill] sm:$0xff] %v3531_v37  ;;  %5258 = vst [vmem:[#allocation90_spill] sm:$0xff] %v3533_v8 }
 0x222   :  { %1010 = vrot.lane.b32.xlu1 %v3457_v5, %s2744_s2  ;;  %1562 = vrot.lane.b32.xlu0 %v3509_v17, %s2726_s26 }
 0x224   :  { %v3539_v24 = vpop.permute.xlu1 %994  ;;  %v880_v3 = vpop.permute.xlu0 %879 }
 0x225   :  { %5259 = vst [vmem:[#allocation91_spill] sm:$0xff] %v3539_v24 }
 0x226   :  { %1230 = vrot.lane.b32.xlu1 %v3457_v5, %s2746_s14  ;;  %1552 = vrot.lane.b32.xlu0 %v3233_v15, %s2726_s26 }
 0x228   :  { %v3545_v33 = vpop.permute.xlu1 %1214  ;;  %v1105_v37 = vpop.permute.xlu0 %1104 }
 0x229   :  { %5260 = vst [vmem:[#allocation92_spill] sm:$0xff] %v3545_v33  ;;  %v3566_v33 = vld [vmem:[%s4987_s3] sm:$0xff] }
 0x22a   :  { %1450 = vrot.lane.b32.xlu1 %v3457_v5, %s2748_s16  ;;  %1650 = vrot.lane.b32.xlu0 %v3279_v28, %s2727_s27 }
 0x22c   :  { %v3551_v8 = vpop.permute.xlu1 %1434  ;;  %v1325_v48 = vpop.permute.xlu0 %1324 }
 0x22d   :  { %5261 = vst [vmem:[#allocation93_spill] sm:$0xff] %v3551_v8 }
 0x22e   :  { %1560 = vrot.lane.b32.xlu1 %v3457_v5, %s2726_s26  ;;  %1734 = vrot.lane.b32.xlu0 %v3256_v13, %s2729_s30 }
 0x230   :  { %v3557_v24 = vpop.permute.xlu1 %1736  ;;  %v3559_v58 = vpop.permute.xlu0 %1544 }
 0x231   :  { %5262 = vst [vmem:[#allocation94_spill] sm:$0xff] %v3557_v24  ;;  %5263 = vst [vmem:[#allocation95_spill] sm:$0xff] %v3559_v58  ;;  %v5266_v24 = vmov 9   ;;  %v3579_v58 = vld [vmem:[%s4987_s3 + $0x20] sm:$0xff] }
 0x232   :  { %1656 = vrot.lane.b32.xlu1 %v3457_v5, %s2727_s27  ;;  %1781 = vperm.xlu0 %2613, %v3566_v33  }
 0x234   :  { %v3569_v8 = vpop.permute.xlu1 %1006  ;;  %v3571_v12 = vpop.permute.xlu0 %1640 }
 0x235   :  { %5264 = vst [vmem:[#allocation96_spill] sm:$0xff] %v3569_v8  ;;  %5265 = vst [vmem:[#allocation97_spill] sm:$0xff] %v3571_v12  ;;  %v2531_v8 = vld [vmem:[%s4990_s6 + $0x2] ss:$8 sm:$0x3] }
 0x236   :  { %1752 = vrot.lane.b32.xlu1 %v3457_v5, %s2729_s30  ;;  %2616 = vset.pattern.permute.xlu0 %v5266_v24  ;;  %v912_v12 = vld [vmem:[%s4990_s6] ss:$8 sm:$0x3]  ;;  %v3595_v32 = vrot.slane %v2531_v8, %v2897_v19 }
 0x237   :  { %1907 = vperm.xlu0 %2616, %v3579_v58   ;;  %v3617_v7 = vrot.slane %v912_v12, %v2897_v19  ;;  %v3620_v2 = vrot.slane %v912_v12, %v2899_v20  ;;  %v3634_v12 = vld [vmem:[%s4987_s3 + $0x10] sm:$0xff] }
 0x238   :  { %v3582_v4 = vpop.permute.xlu1 %1226  ;;  %v892_v1 = vpop.permute.xlu0 %891  ;;  %5268 = vst [vmem:[#allocation99_spill] sm:$0xff] %v3595_v32 }
 0x239   :  { %5267 = vst [vmem:[#allocation98_spill] sm:$0xff] %v3582_v4  ;;  %v3598_v4 = vrot.slane %v2531_v8, %v2899_v20  ;;  %v902_v56 = vsel %vm899_vm5, %v880_v3, %v892_v1  ;;  %v908_v21 = vsel %vm899_vm5, %v892_v1, %v880_v3  ;;  %5271 = vst [vmem:[#allocation102_spill] sm:$0xff] %v3617_v7 }
 0x23a   :  { %1848 = vrot.lane.b32.xlu1 %v3457_v5, %s2750_s18  ;;  %5272 = vst [vmem:[#allocation103_spill] sm:$0xff] %v3620_v2  ;;  %v928_v57 = vmul.f32 %v3617_v7, %v908_v21 }
 0x23b   :  { %5269 = vst [vmem:[#allocation100_spill] sm:$0xff] %v3598_v4  ;;  %1903 = vperm.xlu0 %2616, %v3603_v35  }
 0x23c   :  { %v3606_v0 = vpop.permute.xlu1 %1446  ;;  %v1117_v52 = vpop.permute.xlu0 %1116  ;;  %v970_v36 = vmul.f32 %v3146_v51, %v928_v57 }
 0x23d   :  { %5270 = vst [vmem:[#allocation101_spill] sm:$0xff] %v3606_v0  ;;  %v1127_v8 = vsel %vm1124_vm6, %v1105_v37, %v1117_v52  ;;  %v1133_v60 = vsel %vm1124_vm6, %v1117_v52, %v1105_v37  ;;  %v2533_v0 = vld [vmem:[%s4990_s6 + $0x4] ss:$8 sm:$0x3]  ;;  %v929_v52 = vmul.f32 %v3620_v2, %v902_v56 }
 0x23e   :  { %1958 = vrot.lane.b32.xlu1 %v3457_v5, %s2751_s19  ;;  %v1154_v1 = vmul.f32 %v3595_v32, %v1133_v60  ;;  %v1155_v3 = vmul.f32 %v3598_v4, %v1127_v8  ;;  %v3641_v60 = vrot.slane %v2533_v0, %v2897_v19  ;;  %v3644_v8 = vrot.slane %v2533_v0, %v2899_v20 }
 0x23f   :  { %1899 = vperm.xlu0 %2616, %v3634_v12   ;;  %v971_v41 = vmul.f32 %v3146_v51, %v929_v52  ;;  %v5279_v52 = vmov 10  }
 0x240   :  { %v3637_v37 = vpop.permute.xlu1 %1556  ;;  %v1337_v59 = vpop.permute.xlu0 %1336  ;;  %5274 = vst [vmem:[#allocation105_spill] sm:$0xff] %v3641_v60  ;;  %5275 = vst [vmem:[#allocation106_spill] sm:$0xff] %v3644_v8  ;;  %v1190_v56 = vmul.f32 %v3196_v53, %v1154_v1  ;;  %v1191_v21 = vmul.f32 %v3196_v53, %v1155_v3  ;;  %v3661_v53 = vld [vmem:[%s4987_s3 + $0x8] sm:$0xff] }
 0x241   :  { %5273 = vst [vmem:[#allocation104_spill] sm:$0xff] %v3637_v37  ;;  %v1347_v34 = vsel %vm1344_vm7, %v1325_v48, %v1337_v59  ;;  %v1353_v37 = vsel %vm1344_vm7, %v1337_v59, %v1325_v48 }
 0x242   :  { %885 = vrot.lane.b32.xlu1 %v3483_v10, %s2745_s13  ;;  %v1374_v0 = vmul.f32 %v3641_v60, %v1353_v37  ;;  %v1375_v42 = vmul.f32 %v3644_v8, %v1347_v34  ;;  %v1202_v49 = vadd.f32 %v1190_v56, %v970_v36  ;;  %v1203_v59 = vadd.f32 %v1191_v21, %v971_v41 }
 0x243   :  { %1895 = vperm.xlu0 %2616, %v3661_v53  }
 0x244   :  { %v3664_v1 = vpop.permute.xlu1 %1652  ;;  %v997_v3 = vpop.permute.xlu0 %996  ;;  %v1410_v57 = vmul.f32 %v3264_v43, %v1374_v0  ;;  %v1411_v51 = vmul.f32 %v3264_v43, %v1375_v42  ;;  %v2530_v43 = vld [vmem:[%s4990_s6 + $0x1] ss:$8 sm:$0x3]  ;;  %v2532_v0 = vld [vmem:[%s4990_s6 + $0x3] ss:$8 sm:$0x3] }
 0x245   :  { %5276 = vst [vmem:[#allocation107_spill] sm:$0xff] %v3664_v1 }
 0x246   :  { %1110 = vrot.lane.b32.xlu1 %v3483_v10, %s2747_s15  ;;  %v3670_v34 = vadd.f32 %v1410_v57, %v1202_v49  ;;  %v3672_v48 = vadd.f32 %v1411_v51, %v1203_v59  ;;  %v3707_v51 = vrot.slane %v2530_v43, %v2897_v19 }
 0x247   :  { %2617 = vset.pattern.permute.xlu0 %v5279_v52  ;;  %v3710_v52 = vrot.slane %v2530_v43, %v2899_v20 }
 0x248   :  { %5277 = vst [vmem:[#allocation108_spill] sm:$0xff] %v3670_v34  ;;  %5278 = vst [vmem:[#allocation109_spill] sm:$0xff] %v3672_v48  ;;  %v3675_v37 = vpop.permute.xlu1 %1748  ;;  %v1217_v14 = vpop.permute.xlu0 %1216  ;;  %2017 = vperm.xlu0 %2617, %v3579_v58   ;;  %v3716_v48 = vrot.slane %v2532_v0, %v2897_v19  ;;  %v3719_v34 = vrot.slane %v2532_v0, %v2899_v20 }
 0x249   :  { %5280 = vst [vmem:[#allocation110_spill] sm:$0xff] %v3675_v37  ;;  %5281 = vst [vmem:[#allocation111_spill] sm:$0xff] %v3707_v51 }
 0x24a   :  { %1330 = vrot.lane.b32.xlu1 %v3483_v10, %s2749_s17  ;;  %5282 = vst [vmem:[#allocation112_spill] sm:$0xff] %v3710_v52  ;;  %5283 = vst [vmem:[#allocation113_spill] sm:$0xff] %v3716_v48 }
 0x24b   :  { %5284 = vst [vmem:[#allocation114_spill] sm:$0xff] %v3719_v34 }
 0x24c   :  { %v3680_v41 = vpop.permute.xlu1 %881  ;;  %v1437_v42 = vpop.permute.xlu0 %1436  ;;  %2013 = vperm.xlu0 %2617, %v3603_v35  }
 0x24e   :  { %1550 = vrot.lane.b32.xlu1 %v3483_v10, %s2726_s26 }
 0x250   :  { %v3685_v49 = vpop.permute.xlu1 %1106  ;;  %v3687_v36 = vpop.permute.xlu0 %1546  ;;  %2009 = vperm.xlu0 %2617, %v3634_v12  }
 0x252   :  { %1646 = vrot.lane.b32.xlu1 %v3483_v10, %s2727_s27 }
 0x254   :  { %v3696_v56 = vpop.permute.xlu1 %1326  ;;  %v1009_v21 = vpop.permute.xlu0 %1008  ;;  %2005 = vperm.xlu0 %2617, %v3661_v53  }
 0x255   :  { %v1018_v59 = vsel %vm1014_vm8, %v997_v3, %v1009_v21  ;;  %v1024_v57 = vsel %vm1014_vm8, %v1009_v21, %v997_v3  ;;  %v2534_v3 = vld [vmem:[%s4990_s6 + $0x5] ss:$8 sm:$0x3] }
 0x256   :  { %1742 = vrot.lane.b32.xlu1 %v3483_v10, %s2729_s30  ;;  %v1046_v21 = vmul.f32 %v3707_v51, %v1024_v57  ;;  %v1047_v43 = vmul.f32 %v3710_v52, %v1018_v59  ;;  %v3740_v59 = vrot.slane %v2534_v3, %v2897_v19  ;;  %v3743_v57 = vrot.slane %v2534_v3, %v2899_v20 }
 0x258   :  { %v3726_v37 = vpop.permute.xlu1 %1642  ;;  %v1229_v1 = vpop.permute.xlu0 %1228  ;;  %1648 = vrot.lane.b32.xlu0 %v3233_v15, %s2727_s27  ;;  %5285 = vst [vmem:[#allocation115_spill] sm:$0xff] %v3740_v59  ;;  %5286 = vst [vmem:[#allocation116_spill] sm:$0xff] %v3743_v57  ;;  %v1082_v52 = vmul.f32 %v3172_v44, %v1046_v21  ;;  %v1083_v51 = vmul.f32 %v3172_v44, %v1047_v43 }
 0x259   :  { %v1238_v40 = vsel %vm1234_vm9, %v1217_v14, %v1229_v1  ;;  %v1244_v0 = vsel %vm1234_vm9, %v1229_v1, %v1217_v14 }
 0x25a   :  { %v1266_v46 = vmul.f32 %v3716_v48, %v1244_v0  ;;  %v1267_v38 = vmul.f32 %v3719_v34, %v1238_v40  ;;  %1838 = vrot.lane.b32.xlu1 %v3483_v10, %s2750_s18 }
 0x25c   :  { %v1302_v14 = vmul.f32 %v3227_v50, %v1266_v46  ;;  %v1303_v1 = vmul.f32 %v3227_v50, %v1267_v38  ;;  %v3749_v40 = vpop.permute.xlu1 %1738  ;;  %v1449_v0 = vpop.permute.xlu0 %1448  ;;  %1744 = vrot.lane.b32.xlu0 %v3233_v15, %s2729_s30 }
 0x25d   :  { %v1458_v34 = vsel %vm1454_vm10, %v1437_v42, %v1449_v0  ;;  %v1464_v3 = vsel %vm1454_vm10, %v1449_v0, %v1437_v42  ;;  %v5289_v0 = vmov 11  }
 0x25e   :  { %v1314_v48 = vadd.f32 %v1302_v14, %v1082_v52  ;;  %v1315_v21 = vadd.f32 %v1303_v1, %v1083_v51  ;;  %v1486_v44 = vmul.f32 %v3740_v59, %v1464_v3  ;;  %v1487_v46 = vmul.f32 %v3743_v57, %v1458_v34  ;;  %1948 = vrot.lane.b32.xlu1 %v3483_v10, %s2751_s19 }
 0x260   :  { %v1522_v38 = vmul.f32 %v3353_v25, %v1486_v44  ;;  %v1523_v50 = vmul.f32 %v3353_v25, %v1487_v46  ;;  %v3763_v43 = vpop.permute.xlu1 %893  ;;  %v884_v26 = vpop.permute.xlu0 %883  ;;  %1842 = vrot.lane.b32.xlu0 %v3279_v28, %s2750_s18 }
 0x262   :  { %v3767_v42 = vadd.f32 %v1522_v38, %v1314_v48  ;;  %v3769_v51 = vadd.f32 %v1523_v50, %v1315_v21  ;;  %2058 = vrot.lane.b32.xlu1 %v3483_v10, %s2730_s8 }
 0x264   :  { %5287 = vst [vmem:[#allocation117_spill] sm:$0xff] %v3767_v42  ;;  %5288 = vst [vmem:[#allocation118_spill] sm:$0xff] %v3769_v51  ;;  %v3773_v34 = vpop.permute.xlu1 %1118  ;;  %v1109_v52 = vpop.permute.xlu0 %1108  ;;  %1940 = vrot.lane.b32.xlu0 %v3256_v13, %s2751_s19 }
 0x266   :  { %897 = vrot.lane.b32.xlu1 %v3509_v17, %s2745_s13 }
 0x268   :  { %v3779_v25 = vpop.permute.xlu1 %1338  ;;  %v1329_v14 = vpop.permute.xlu0 %1328  ;;  %2001 = vperm.xlu0 %2617, %v3566_v33  }
 0x26a   :  { %1122 = vrot.lane.b32.xlu1 %v3509_v17, %s2747_s15 }
 0x26c   :  { %v3784_v48 = vpop.permute.xlu1 %1558  ;;  %v3786_v1 = vpop.permute.xlu0 %1548  ;;  %2620 = vset.pattern.permute.xlu0 %v5289_v0 }
 0x26d   :  { %2113 = vperm.xlu0 %2620, %v3579_v58  }
 0x26e   :  { %1342 = vrot.lane.b32.xlu1 %v3509_v17, %s2749_s17 }
 0x270   :  { %v3792_v3 = vpop.permute.xlu1 %1654  ;;  %v896_v21 = vpop.permute.xlu0 %895 }
 0x271   :  { %2109 = vperm.xlu0 %2620, %v3603_v35   ;;  %v904_v44 = vsel %vm899_vm5, %v884_v26, %v896_v21  ;;  %v910_v46 = vsel %vm899_vm5, %v896_v21, %v884_v26 }
 0x272   :  { %1658 = vrot.lane.b32.xlu1 %v3509_v17, %s2727_s27  ;;  %v932_v58 = vmul.f32 %v3617_v7, %v910_v46  ;;  %v933_v50 = vmul.f32 %v3620_v2, %v904_v44 }
 0x274   :  { %v3801_v38 = vpop.permute.xlu1 %1750  ;;  %v1121_v51 = vpop.permute.xlu0 %1120  ;;  %v974_v44 = vmul.f32 %v3150_v55, %v932_v58  ;;  %v975_v46 = vmul.f32 %v3150_v55, %v933_v50 }
 0x275   :  { %2105 = vperm.xlu0 %2620, %v3634_v12   ;;  %v1129_v42 = vsel %vm1124_vm6, %v1109_v52, %v1121_v51  ;;  %v1135_v0 = vsel %vm1124_vm6, %v1121_v51, %v1109_v52 }
 0x276   :  { %1754 = vrot.lane.b32.xlu1 %v3509_v17, %s2729_s30  ;;  %v1158_v26 = vmul.f32 %v3595_v32, %v1135_v0  ;;  %v1159_v21 = vmul.f32 %v3598_v4, %v1129_v42 }
 0x278   :  { %v3814_v57 = vpop.permute.xlu1 %998  ;;  %v1341_v59 = vpop.permute.xlu0 %1340  ;;  %v1194_v27 = vmul.f32 %v3202_v6, %v1158_v26  ;;  %v1195_v39 = vmul.f32 %v3202_v6, %v1159_v21  ;;  %v5291_v21 = vmov 12  }
 0x279   :  { %v1349_v51 = vsel %vm1344_vm7, %v1329_v14, %v1341_v59  ;;  %v1355_v52 = vsel %vm1344_vm7, %v1341_v59, %v1329_v14  ;;  %2101 = vperm.xlu0 %2620, %v3661_v53  }
 0x27a   :  { %v1378_v42 = vmul.f32 %v3641_v60, %v1355_v52  ;;  %v1379_v0 = vmul.f32 %v3644_v8, %v1349_v51  ;;  %1850 = vrot.lane.b32.xlu1 %v3509_v17, %s2750_s18  ;;  %v1206_v55 = vadd.f32 %v1194_v27, %v974_v44  ;;  %v1207_v58 = vadd.f32 %v1195_v39, %v975_v46 }
 0x27c   :  { %v3829_v50 = vpop.permute.xlu1 %1218  ;;  %v1414_v6 = vmul.f32 %v3272_v62, %v1378_v42  ;;  %v1415_v26 = vmul.f32 %v3272_v62, %v1379_v0  ;;  %v3840_v27 = vpop.permute.xlu0 %1000  ;;  %v5296_v42 = vmov 0  }
 0x27d   :  { %5290 = vst [vmem:[#allocation119_spill] sm:$0xff] %v3829_v50  ;;  %1840 = vrot.lane.b32.xlu0 %v3233_v15, %s2750_s18 }
 0x27e   :  { %v1426_v59 = vadd.f32 %v1414_v6, %v1206_v55  ;;  %v1427_v14 = vadd.f32 %v1415_v26, %v1207_v58  ;;  %1960 = vrot.lane.b32.xlu1 %v3509_v17, %s2751_s19  ;;  %2623 = vset.pattern.permute.xlu0 %v5291_v21 }
 0x280   :  { %v3838_v51 = vpop.permute.xlu1 %1438  ;;  %v3852_v39 = vpop.permute.xlu0 %1220 }
 0x281   :  { %5292 = vst [vmem:[#allocation120_spill] sm:$0xff] %v3838_v51  ;;  %1950 = vrot.lane.b32.xlu0 %v3233_v15, %s2751_s19  ;;  %v5301_v51 = vmov 7  }
 0x282   :  { %2070 = vrot.lane.b32.xlu1 %v3509_v17, %s2730_s8 }
 0x284   :  { %v3846_v62 = vpop.permute.xlu1 %1644  ;;  %v3861_v52 = vpop.permute.xlu0 %1440 }
 0x285   :  { %5293 = vst [vmem:[#allocation121_spill] sm:$0xff] %v3846_v62  ;;  %2062 = vrot.lane.b32.xlu0 %v3279_v28, %s2730_s8 }
 0x286   :  { %1834 = vrot.lane.b32.xlu1 %v3368_v54, %s2750_s18 }
 0x288   :  { %v3854_v44 = vpop.permute.xlu1 %1740  ;;  %v3870_v55 = vpop.permute.xlu0 %1012 }
 0x289   :  { %5294 = vst [vmem:[#allocation122_spill] sm:$0xff] %v3854_v44  ;;  %2145 = vperm.xlu0 %2623, %v3566_v33  }
 0x28a   :  { %1846 = vrot.lane.b32.xlu1 %v3399_v63, %s2750_s18 }
 0x28c   :  { %v3859_v46 = vpop.permute.xlu1 %1836  ;;  %v3878_v26 = vpop.permute.xlu0 %1232 }
 0x28d   :  { %5295 = vst [vmem:[#allocation123_spill] sm:$0xff] %v3859_v46  ;;  %2624 = vset.pattern.permute.xlu0 %v5296_v42 }
 0x28e   :  { %1944 = vrot.lane.b32.xlu1 %v3368_v54, %s2751_s19 }
 0x290   :  { %v3866_v0 = vpop.permute.xlu1 %1946  ;;  %v3885_v46 = vpop.permute.xlu0 %1452 }
 0x291   :  { %5297 = vst [vmem:[#allocation124_spill] sm:$0xff] %v3866_v0 }
 0x292   :  { %1956 = vrot.lane.b32.xlu1 %v3399_v63, %s2751_s19 }
 0x294   :  { %v3872_v58 = vpop.permute.xlu1 %1010  ;;  %v3902_v50 = vpop.permute.xlu0 %1562 }
 0x296   :  { %2056 = vrot.lane.b32.xlu1 %v3422_v61, %s2730_s8 }
 0x298   :  { %v3876_v6 = vpop.permute.xlu1 %1230 }
 0x299   :  { %5298 = vst [vmem:[#allocation125_spill] sm:$0xff] %v3876_v6 }
 0x29a   :  { %2068 = vrot.lane.b32.xlu1 %v3457_v5, %s2730_s8 }
 0x29c   :  { %v3882_v42 = vpop.permute.xlu1 %1450 }
 0x29d   :  { %5299 = vst [vmem:[#allocation126_spill] sm:$0xff] %v3882_v42 }
 0x29e   :  { %2157 = vperm.xlu1 %2614, %v3603_v35  }
 0x2a0   :  { %v1561_v0 = vpop.permute.xlu1 %1560 }
 0x2a1   :  { %v1568_v15 = vsel %vm59_vm0, %v3786_v1, %v1561_v0  ;;  %v1574_v61 = vsel %vm59_vm0, %v1561_v0, %v3786_v1 }
 0x2a2   :  { %v1584_v62 = vmul.f32 %v1574_v61, %v2924_v30  ;;  %v1585_v44 = vmul.f32 %v1568_v15, %v2921_v29  ;;  %1540 = vrot.lane.b32.xlu1 %v3211_v16, %s2726_s26  ;;  %v3913_v61 = vpop.permute.xlu0 %1552 }
 0x2a3   :  { %2615 = vset.pattern.permute.xlu1 %v5301_v51  ;;  %5305 = vst [vmem:[#allocation131_spill] sm:$0xff] %v3913_v61 }
 0x2a4   :  { %v1620_v35 = vmul.f32 %v3330_v45, %v1584_v62  ;;  %v1621_v5 = vmul.f32 %v3330_v45, %v1585_v44  ;;  %v3899_v42 = vpop.permute.xlu1 %1656 }
 0x2a5   :  { %5300 = vst [vmem:[#allocation127_spill] sm:$0xff] %v3899_v42 }
 0x2a6   :  { %v3904_v6 = vadd.f32 %v1620_v35, %v1426_v59  ;;  %v3906_v1 = vadd.f32 %v1621_v5, %v1427_v14  ;;  %1638 = vrot.lane.b32.xlu1 %v3256_v13, %s2727_s27  ;;  %v3922_v5 = vpop.permute.xlu0 %1650 }
 0x2a7   :  { %5308 = vst [vmem:[#allocation134_spill] sm:$0xff] %v3922_v5 }
 0x2a8   :  { %5302 = vst [vmem:[#allocation128_spill] sm:$0xff] %v3904_v6  ;;  %5303 = vst [vmem:[#allocation129_spill] sm:$0xff] %v3906_v1  ;;  %v3910_v15 = vpop.permute.xlu1 %1752 }
 0x2a9   :  { %5304 = vst [vmem:[#allocation130_spill] sm:$0xff] %v3910_v15 }
 0x2aa   :  { %1685 = vperm.xlu1 %2615, %v3566_v33   ;;  %v3930_v14 = vpop.permute.xlu0 %1734 }
 0x2ab   :  { %5309 = vst [vmem:[#allocation135_spill] sm:$0xff] %v3930_v14 }
 0x2ac   :  { %v3915_v45 = vpop.permute.xlu1 %1848 }
 0x2ad   :  { %5306 = vst [vmem:[#allocation132_spill] sm:$0xff] %v3915_v45 }
 0x2ae   :  { %1746 = vrot.lane.b32.xlu1 %v3279_v28, %s2729_s30  ;;  %v3936_v44 = vpop.permute.xlu0 %1781 }
 0x2af   :  { %2618 = vset.pattern.permute.xlu1 %v5291_v21  ;;  %5310 = vst [vmem:[#allocation136_spill] sm:$0xff] %v3936_v44 }
 0x2b0   :  { %v3919_v51 = vpop.permute.xlu1 %1958 }
 0x2b1   :  { %5307 = vst [vmem:[#allocation133_spill] sm:$0xff] %v3919_v51 }
 0x2b2   :  { %1832 = vrot.lane.b32.xlu1 %v3310_v31, %s2750_s18  ;;  %v3944_v5 = vpop.permute.xlu0 %1907 }
 0x2b3   :  { %5311 = vst [vmem:[#allocation137_spill] sm:$0xff] %v3944_v5 }
 0x2b4   :  { %v3926_v59 = vpop.permute.xlu1 %885 }
 0x2b6   :  { %1844 = vrot.lane.b32.xlu1 %v3339_v9, %s2750_s18  ;;  %v3952_v61 = vpop.permute.xlu0 %1903 }
 0x2b7   :  { %5312 = vst [vmem:[#allocation138_spill] sm:$0xff] %v3952_v61 }
 0x2b8   :  { %v3932_v62 = vpop.permute.xlu1 %1110 }
 0x2ba   :  { %1942 = vrot.lane.b32.xlu1 %v3310_v31, %s2751_s19  ;;  %v3959_v6 = vpop.permute.xlu0 %1899 }
 0x2bb   :  { %5313 = vst [vmem:[#allocation139_spill] sm:$0xff] %v3959_v6  ;;  %v903_v6 = vsel %vm899_vm5, %v3680_v41, %v3763_v43 }
 0x2bc   :  { %v3938_v0 = vpop.permute.xlu1 %1330  ;;  %v931_v42 = vmul.f32 %v3620_v2, %v903_v6 }
 0x2be   :  { %1954 = vrot.lane.b32.xlu1 %v3339_v9, %s2751_s19 }
 0x2c0   :  { %v3942_v35 = vpop.permute.xlu1 %1550 }
 0x2c2   :  { %2054 = vrot.lane.b32.xlu1 %v3368_v54, %s2730_s8  ;;  %v1348_v54 = vsel %vm1344_vm7, %v3696_v56, %v3779_v25 }
 0x2c3   :  { %v1377_v15 = vmul.f32 %v3644_v8, %v1348_v54  ;;  %v2535_v54 = vld [vmem:[%s4990_s6 + $0x11] ss:$8 sm:$0x3] }
 0x2c4   :  { %v3948_v14 = vpop.permute.xlu1 %1646 }
 0x2c6   :  { %2066 = vrot.lane.b32.xlu1 %v3399_v63, %s2730_s8  ;;  %v1128_v63 = vsel %vm1124_vm6, %v3685_v49, %v3773_v34 }
 0x2c8   :  { %v3954_v44 = vpop.permute.xlu1 %1742 }
 0x2ca   :  { %2153 = vperm.xlu1 %2618, %v3634_v12   ;;  %v1134_v12 = vsel %vm1124_vm6, %v3773_v34, %v3685_v49  ;;  %v1354_v49 = vsel %vm1344_vm7, %v3779_v25, %v3696_v56  ;;  %v3992_v34 = vpop.permute.xlu0 %1895  ;;  %v1567_v56 = vsel %vm59_vm0, %v3687_v36, %v3784_v48 }
 0x2cb   :  { %5314 = vst [vmem:[#allocation140_spill] sm:$0xff] %v3992_v34  ;;  %v1156_v51 = vmul.f32 %v3595_v32, %v1134_v12  ;;  %v1376_v61 = vmul.f32 %v3641_v60, %v1354_v49  ;;  %v973_v49 = vmul.f32 %v3160_v23, %v931_v42 }
 0x2cc   :  { %v3957_v1 = vpop.permute.xlu1 %1838 }
 0x2cd   :  { %v1192_v6 = vmul.f32 %v3200_v22, %v1156_v51  ;;  %v4031_v51 = vmul.f32 %v3397_v11, %v3483_v10  ;;  %v1669_v10 = vsel %vm88_vm1, %v3792_v3, %v3726_v37 }
 0x2ce   :  { %1636 = vrot.lane.b32.xlu1 %v3211_v16, %s2727_s27  ;;  %v4019_v34 = vpop.permute.xlu0 %2017 }
 0x2cf   :  { %2619 = vset.pattern.permute.xlu1 %v5266_v24  ;;  %v909_v24 = vsel %vm899_vm5, %v3763_v43, %v3680_v41  ;;  %v1157_v41 = vmul.f32 %v3598_v4, %v1128_v63  ;;  %v1573_v63 = vsel %vm59_vm0, %v3784_v48, %v3687_v36  ;;  %5316 = vst [vmem:[#allocation142_spill] sm:$0xff] %v4019_v34 }
 0x2d0   :  { %v3963_v5 = vpop.permute.xlu1 %1948  ;;  %v930_v43 = vmul.f32 %v3617_v7, %v909_v24  ;;  %v1582_v36 = vmul.f32 %v1573_v63, %v2924_v30  ;;  %v1583_v48 = vmul.f32 %v1567_v56, %v2921_v29 }
 0x2d1   :  { %v1193_v12 = vmul.f32 %v3200_v22, %v1157_v41  ;;  %v2536_v22 = vld [vmem:[%s4990_s6 + $0x12] ss:$8 sm:$0x3]  ;;  %v1663_v41 = vsel %vm88_vm1, %v3726_v37, %v3792_v3  ;;  %s2752_s6 = smov [#allocation2]  }
 0x2d2   :  { %1732 = vrot.lane.b32.xlu1 %v3211_v16, %s2729_s30  ;;  %v972_v24 = vmul.f32 %v3160_v23, %v930_v43  ;;  %v4035_v23 = vmul.f32 %v3397_v11, %v3509_v17  ;;  %v1765_v11 = vsel %vm356_vm2, %v3801_v38, %v3749_v40  ;;  %v4053_v17 = vrot.slane %v2535_v54, %v2899_v20 }
 0x2d3   :  { %v4056_v43 = vrot.slane %v2536_v22, %v2897_v19  ;;  %v4059_v56 = vrot.slane %v2536_v22, %v2899_v20  ;;  %v1240_v20 = vsel %vm1234_vm9, %v3852_v39, %v3878_v26 }
 0x2d4   :  { %v3994_v45 = vpop.permute.xlu1 %2058  ;;  %5318 = vst [vmem:[#allocation144_spill] sm:$0xff] %v4053_v17 }
 0x2d5   :  { %5315 = vst [vmem:[#allocation141_spill] sm:$0xff] %v3994_v45  ;;  %v1413_v45 = vmul.f32 %v3248_v47, %v1377_v15  ;;  %v1204_v15 = vadd.f32 %v1192_v6, %v972_v24  ;;  %5319 = vst [vmem:[#allocation145_spill] sm:$0xff] %v4056_v43 }
 0x2d6   :  { %1830 = vrot.lane.b32.xlu1 %v3256_v13, %s2750_s18  ;;  %v1412_v13 = vmul.f32 %v3248_v47, %v1376_v61  ;;  %v4038_v47 = vrot.slane %v2535_v54, %v2897_v19  ;;  %v1205_v61 = vadd.f32 %v1193_v12, %v973_v49  ;;  %5320 = vst [vmem:[#allocation146_spill] sm:$0xff] %v4059_v56  ;;  %v5321_v12 = vld [vmem:[#allocation38_spill] sm:$0xff]  ;;  %v5323_v19 = vld [vmem:[#allocation5_spill] sm:$0xff] }
 0x2d7   :  { %v4066_v37 = vmul.f32 %v5321_v12, %v1582_v36  ;;  %v4069_v3 = vmul.f32 %v5321_v12, %v1583_v48  ;;  %v5322_v54 = vld [vmem:[#allocation6_spill] sm:$0xff]  ;;  %v1679_v49 = vmul.f32 %v1663_v41, %v5323_v19  ;;  %v1759_v36 = vsel %vm356_vm2, %v3749_v40, %v3801_v38  ;;  %v5325_v48 = vld [vmem:[#allocation8_spill] sm:$0xff]  ;;  %v5326_v41 = vld [vmem:[#allocation113_spill] sm:$0xff] }
 0x2d8   :  { %v898_v25 = vpop.permute.xlu1 %897  ;;  %5317 = vst [vmem:[#allocation143_spill] sm:$0xff] %v4038_v47  ;;  %v4061_v63 = vadd.f32 %v1412_v13, %v1204_v15  ;;  %v4063_v6 = vadd.f32 %v1413_v45, %v1205_v61  ;;  %v1678_v24 = vmul.f32 %v1669_v10, %v5322_v54  ;;  %v1246_v13 = vsel %vm1234_vm9, %v3878_v26, %v3852_v39  ;;  %v4083_v45 = vpop.permute.xlu0 %2013 }
 0x2d9   :  { %5324 = vst [vmem:[#allocation38_spill] sm:$0xff] %v4083_v45  ;;  %v1774_v22 = vmul.f32 %v1765_v11, %v5325_v48  ;;  %v911_v26 = vsel %vm899_vm5, %v898_v25, %v3926_v59  ;;  %v5328_v11 = vld [vmem:[#allocation49_spill] sm:$0xff] }
 0x2da   :  { %1891 = vperm.xlu1 %2619, %v3566_v33   ;;  %v4122_v12 = vmul.f32 %v5328_v11, %v1678_v24  ;;  %v5329_v24 = vld [vmem:[#allocation9_spill] sm:$0xff] }
 0x2db   :  { %v4135_v34 = vmul.f32 %v1759_v36, %v5329_v24  ;;  %v1466_v36 = vsel %vm1454_vm10, %v3885_v46, %v3861_v52 }
 0x2dc   :  { %v1123_v42 = vpop.permute.xlu1 %1122  ;;  %v4142_v45 = vpop.permute.xlu0 %2009 }
 0x2dd   :  { %v1130_v15 = vsel %vm1124_vm6, %v3932_v62, %v1123_v42  ;;  %v1136_v61 = vsel %vm1124_vm6, %v1123_v42, %v3932_v62  ;;  %v1020_v62 = vsel %vm1014_vm8, %v3840_v27, %v3870_v55  ;;  %v1026_v42 = vsel %vm1014_vm8, %v3870_v55, %v3840_v27  ;;  %5334 = vst [vmem:[#allocation5_spill] sm:$0xff] %v4142_v45 }
 0x2de   :  { %1952 = vrot.lane.b32.xlu1 %v3279_v28, %s2751_s19  ;;  %v1161_v28 = vmul.f32 %v3598_v4, %v1130_v15  ;;  %v934_v27 = vmul.f32 %v3617_v7, %v911_v26  ;;  %v5333_v15 = vld [vmem:[#allocation112_spill] sm:$0xff]  ;;  %v5335_v26 = vld [vmem:[#allocation30_spill] sm:$0xff] }
 0x2df   :  { %2621 = vset.pattern.permute.xlu1 %v5291_v21  ;;  %v905_v21 = vsel %vm899_vm5, %v3926_v59, %v898_v25  ;;  %v1270_v59 = vmul.f32 %v5326_v41, %v1246_v13  ;;  %v5327_v25 = vld [vmem:[#allocation114_spill] sm:$0xff]  ;;  %v1051_v4 = vmul.f32 %v5333_v15, %v1020_v62 }
 0x2e0   :  { %v1343_v39 = vpop.permute.xlu1 %1342  ;;  %v1271_v10 = vmul.f32 %v5327_v25, %v1240_v20  ;;  %v935_v55 = vmul.f32 %v3620_v2, %v905_v21  ;;  %v5336_v62 = vld [vmem:[#allocation22_spill] sm:$0xff] }
 0x2e1   :  { %v1350_v40 = vsel %vm1344_vm7, %v3938_v0, %v1343_v39  ;;  %v1356_v38 = vsel %vm1344_vm7, %v1343_v39, %v3938_v0  ;;  %v4125_v0 = vmul.f32 %v5328_v11, %v1679_v49  ;;  %v1160_v39 = vmul.f32 %v3595_v32, %v1136_v61  ;;  %v5330_v49 = vld [vmem:[#allocation57_spill] sm:$0xff]  ;;  %v5332_v61 = vld [vmem:[#allocation111_spill] sm:$0xff] }
 0x2e2   :  { %2052 = vrot.lane.b32.xlu1 %v3310_v31, %s2730_s8  ;;  %v1380_v20 = vmul.f32 %v3641_v60, %v1356_v38  ;;  %v1381_v13 = vmul.f32 %v3644_v8, %v1350_v40  ;;  %v4138_v11 = vmul.f32 %v5330_v49, %v1774_v22  ;;  %v1050_v32 = vmul.f32 %v5332_v61, %v1026_v42 }
 0x2e3   :  { %v1306_v7 = vmul.f32 %v5335_v26, %v1270_v59  ;;  %v1307_v21 = vmul.f32 %v5335_v26, %v1271_v10  ;;  %v1460_v40 = vsel %vm1454_vm10, %v3861_v52, %v3885_v46  ;;  %v1569_v22 = vsel %vm59_vm0, %v3942_v35, %v3902_v50  ;;  %v5337_v46 = vld [vmem:[#allocation16_spill] sm:$0xff]  ;;  %v5338_v26 = vld [vmem:[#allocation33_spill] sm:$0xff] }
 0x2e4   :  { %v1659_v31 = vpop.permute.xlu1 %1658  ;;  %5331 = vst [vmem:[#allocation6_spill] sm:$0xff] %v4138_v11  ;;  %v1575_v38 = vsel %vm59_vm0, %v3902_v50, %v3942_v35  ;;  %v1196_v42 = vmul.f32 %v5336_v62, %v1160_v39  ;;  %v1197_v59 = vmul.f32 %v5336_v62, %v1161_v28  ;;  %v976_v52 = vmul.f32 %v5337_v46, %v934_v27  ;;  %v5339_v39 = vld [vmem:[#allocation115_spill] sm:$0xff]  ;;  %v5342_v11 = vld [vmem:[#allocation18_spill] sm:$0xff] }
 0x2e5   :  { %v977_v10 = vmul.f32 %v5337_v46, %v935_v55  ;;  %v1417_v45 = vmul.f32 %v5338_v26, %v1381_v13  ;;  %v1665_v60 = vsel %vm88_vm1, %v3948_v14, %v1659_v31  ;;  %v1671_v50 = vsel %vm88_vm1, %v1659_v31, %v3948_v14  ;;  %v5340_v55 = vld [vmem:[#allocation116_spill] sm:$0xff]  ;;  %v4188_v46 = vpop.permute.xlu0 %2005 }
 0x2e6   :  { %2064 = vrot.lane.b32.xlu1 %v3339_v9, %s2730_s8  ;;  %v1416_v9 = vmul.f32 %v5338_v26, %v1380_v20  ;;  %v1490_v27 = vmul.f32 %v5339_v39, %v1466_v36  ;;  %v1491_v20 = vmul.f32 %v5340_v55, %v1460_v40  ;;  %v1586_v13 = vmul.f32 %v1575_v38, %v2924_v30 }
 0x2e7   :  { %v1587_v62 = vmul.f32 %v1569_v22, %v2921_v29  ;;  %5341 = vst [vmem:[#allocation8_spill] sm:$0xff] %v4188_v46  ;;  %v1208_v31 = vadd.f32 %v1196_v42, %v976_v52  ;;  %v1209_v14 = vadd.f32 %v1197_v59, %v977_v10  ;;  %v1682_v40 = vmul.f32 %v1671_v50, %v5322_v54  ;;  %v5412_v46 = vld [vmem:[#allocation21_spill] sm:$0xff] }
 0x2e8   :  { %v1755_v8 = vpop.permute.xlu1 %1754  ;;  %v1683_v36 = vmul.f32 %v1665_v60, %v5323_v19  ;;  %v5344_v60 = vld [vmem:[#allocation36_spill] sm:$0xff] }
 0x2e9   :  { %v1761_v28 = vsel %vm356_vm2, %v3954_v44, %v1755_v8  ;;  %v1767_v35 = vsel %vm356_vm2, %v1755_v8, %v3954_v44  ;;  %v1086_v8 = vmul.f32 %v5342_v11, %v1050_v32  ;;  %v1087_v44 = vmul.f32 %v5342_v11, %v1051_v4  ;;  %v5343_v32 = vld [vmem:[#allocation41_spill] sm:$0xff]  ;;  %v5345_v11 = vld [vmem:[#allocation48_spill] sm:$0xff] }
 0x2ea   :  { %2149 = vperm.xlu1 %2621, %v3661_v53   ;;  %v1778_v26 = vmul.f32 %v1767_v35, %v5325_v48  ;;  %v1779_v2 = vmul.f32 %v1761_v28, %v5329_v24  ;;  %v1428_v22 = vadd.f32 %v1416_v9, %v1208_v31  ;;  %v1429_v29 = vadd.f32 %v1417_v45, %v1209_v14  ;;  %v4215_v14 = vpop.permute.xlu0 %1648 }
 0x2eb   :  { %v1318_v59 = vadd.f32 %v1306_v7, %v1086_v8  ;;  %v1319_v52 = vadd.f32 %v1307_v21, %v1087_v44  ;;  %v1526_v10 = vmul.f32 %v5343_v32, %v1490_v27  ;;  %v1527_v4 = vmul.f32 %v5343_v32, %v1491_v20  ;;  %5348 = vst [vmem:[#allocation113_spill] sm:$0xff] %v4215_v14 }
 0x2ec   :  { %v1851_v38 = vpop.permute.xlu1 %1850  ;;  %v1622_v9 = vmul.f32 %v5344_v60, %v1586_v13  ;;  %v1623_v45 = vmul.f32 %v5344_v60, %v1587_v62  ;;  %v1814_v50 = vmul.f32 %v5345_v11, %v1778_v26  ;;  %v1815_v28 = vmul.f32 %v5345_v11, %v1779_v2  ;;  %v5350_v60 = vld [vmem:[#allocation54_spill] sm:$0xff] }
 0x2ed   :  { %v1858_v53 = vsel %vm1852_vm11, %v3957_v1, %v1851_v38  ;;  %v1864_v42 = vsel %vm1852_vm11, %v1851_v38, %v3957_v1  ;;  %v5346_v35 = vmov 11   ;;  %v5347_v1 = vld [vmem:[#allocation45_spill] sm:$0xff]  ;;  %v1019_v26 = vsel %vm1014_vm8, %v3814_v57, %v3872_v58 }
 0x2ee   :  { %1828 = vrot.lane.b32.xlu1 %v3211_v16, %s2750_s18  ;;  %v1718_v7 = vmul.f32 %v5347_v1, %v1682_v40  ;;  %v1719_v21 = vmul.f32 %v5347_v1, %v1683_v36  ;;  %v1888_v27 = vmul.f32 %v4038_v47, %v1864_v42  ;;  %v1889_v20 = vmul.f32 %v4053_v17, %v1858_v53  ;;  %v5349_v53 = vld [vmem:[#allocation51_spill] sm:$0xff] }
 0x2ef   :  { %2622 = vset.pattern.permute.xlu1 %v5346_v35  ;;  %v1634_v13 = vadd.f32 %v1622_v9, %v1428_v22  ;;  %v1635_v8 = vadd.f32 %v1623_v45, %v1429_v29  ;;  %v1025_v44 = vsel %vm1014_vm8, %v3872_v58, %v3814_v57  ;;  %v1538_v36 = vadd.f32 %v1526_v10, %v1318_v59  ;;  %v5351_v35 = vld [vmem:[#allocation141_spill] sm:$0xff] }
 0x2f0   :  { %v1961_v31 = vpop.permute.xlu1 %1960  ;;  %v1539_v38 = vadd.f32 %v1527_v4, %v1319_v52  ;;  %v1924_v42 = vmul.f32 %v5349_v53, %v1888_v27  ;;  %v1925_v32 = vmul.f32 %v5349_v53, %v1889_v20  ;;  %v5352_v4 = vld [vmem:[#allocation11_spill] sm:$0xff]  ;;  %v5354_v20 = vld [vmem:[#allocation32_spill] sm:$0xff] }
 0x2f1   :  { %v1968_v62 = vsel %vm1962_vm12, %v3963_v5, %v1961_v31  ;;  %v1974_v2 = vsel %vm1962_vm12, %v1961_v31, %v3963_v5  ;;  %v1826_v5 = vadd.f32 %v1814_v50, %v1634_v13  ;;  %v1827_v22 = vadd.f32 %v1815_v28, %v1635_v8  ;;  %v5353_v28 = vld [vmem:[#allocation10_spill] sm:$0xff]  ;;  %v5355_v31 = vld [vmem:[#allocation125_spill] sm:$0xff]  ;;  %v5356_v13 = vld [vmem:[#allocation119_spill] sm:$0xff] }
 0x2f2   :  { %v1998_v29 = vmul.f32 %v4056_v43, %v1974_v2  ;;  %v1999_v40 = vmul.f32 %v4059_v56, %v1968_v62  ;;  %1938 = vrot.lane.b32.xlu1 %v3211_v16, %s2751_s19  ;;  %v1730_v58 = vadd.f32 %v1718_v7, %v1538_v36  ;;  %v1731_v11 = vadd.f32 %v1719_v21, %v1539_v38  ;;  %v4260_v2 = vpop.permute.xlu0 %1744  ;;  %v5358_v36 = vld [vmem:[#allocation56_spill] sm:$0xff] }
 0x2f3   :  { %v1811_v7 = vmul.f32 %v5330_v49, %v4135_v34  ;;  %v1048_v21 = vmul.f32 %v5332_v61, %v1025_v44  ;;  %v1239_v8 = vsel %vm1234_vm9, %v5356_v13, %v5355_v31  ;;  %v1245_v62 = vsel %vm1234_vm9, %v5355_v31, %v5356_v13  ;;  %5357 = vst [vmem:[#allocation114_spill] sm:$0xff] %v4260_v2  ;;  %v5366_v13 = vld [vmem:[#allocation27_spill] sm:$0xff]  ;;  %v5413_v2 = vld [vmem:[#allocation106_spill] sm:$0xff] }
 0x2f4   :  { %v2034_v9 = vmul.f32 %v5350_v60, %v1998_v29  ;;  %v2035_v45 = vmul.f32 %v5350_v60, %v1999_v40  ;;  %v2071_v57 = vpop.permute.xlu1 %2070  ;;  %v1936_v29 = vadd.f32 %v1924_v42, %v1730_v58  ;;  %v1937_v40 = vadd.f32 %v1925_v32, %v1731_v11 }
 0x2f5   :  { %v2077_v1 = vsel %vm516_vm4, %v5351_v35, %v2071_v57  ;;  %v2083_v59 = vsel %vm516_vm4, %v2071_v57, %v5351_v35  ;;  %v1630_v44 = vadd.f32 %v4066_v37, %v4061_v63  ;;  %v1049_v60 = vmul.f32 %v5333_v15, %v1019_v26  ;;  %v5360_v57 = vld [vmem:[#allocation118_spill] sm:$0xff] }
 0x2f6   :  { %v2046_v52 = vadd.f32 %v2034_v9, %v1826_v5  ;;  %v2047_v10 = vadd.f32 %v2035_v45, %v1827_v22  ;;  %v2094_v50 = vmul.f32 %v2083_v59, %v5352_v4  ;;  %v2095_v27 = vmul.f32 %v2077_v1, %v5353_v28  ;;  %2050 = vrot.lane.b32.xlu1 %v5354_v20, %s2730_s8  ;;  %v5359_v22 = vld [vmem:[#allocation117_spill] sm:$0xff]  ;;  %v5361_v37 = vld [vmem:[#allocation6_spill] sm:$0xff]  ;;  %v5363_v1 = vld [vmem:[#allocation120_spill] sm:$0xff] }
 0x2f7   :  { %v1631_v5 = vadd.f32 %v4069_v3, %v4063_v6  ;;  %v1726_v53 = vadd.f32 %v4122_v12, %v5359_v22  ;;  %v1727_v58 = vadd.f32 %v4125_v0, %v5360_v57  ;;  %v1268_v63 = vmul.f32 %v5326_v41, %v1245_v62  ;;  %v5362_v12 = vld [vmem:[#allocation19_spill] sm:$0xff]  ;;  %v5364_v0 = vld [vmem:[#allocation126_spill] sm:$0xff] }
 0x2f8   :  { %v2130_v38 = vmul.f32 %v5358_v36, %v2094_v50  ;;  %v2131_v34 = vmul.f32 %v5358_v36, %v2095_v27  ;;  %v1835_v49 = vpop.permute.xlu1 %1834  ;;  %v2190_v9 = vadd.f32 %v4031_v51, %v2046_v52  ;;  %v2191_v42 = vadd.f32 %v4035_v23, %v2047_v10  ;;  %v4293_v52 = vpop.permute.xlu0 %1842 }
 0x2f9   :  { %v1269_v6 = vmul.f32 %v5327_v25, %v1239_v8  ;;  %v4279_v3 = vadd.f32 %v5361_v37, %v1630_v44  ;;  %v1084_v26 = vmul.f32 %v5362_v12, %v1048_v21  ;;  %v4286_v35 = vadd.f32 %v1811_v7, %v1631_v5  ;;  %5365 = vst [vmem:[#allocation49_spill] sm:$0xff] %v4293_v52  ;;  %v5369_v44 = vld [vmem:[#allocation138_spill] sm:$0xff] }
 0x2fa   :  { %v2142_v32 = vadd.f32 %v2130_v38, %v1936_v29  ;;  %v2143_v45 = vadd.f32 %v2131_v34, %v1937_v40  ;;  %2097 = vperm.xlu1 %2622, %v3566_v33   ;;  %v1085_v33 = vmul.f32 %v5362_v12, %v1049_v60  ;;  %v1465_v59 = vsel %vm1454_vm10, %v5364_v0, %v5363_v1  ;;  %v5367_v29 = vld [vmem:[#allocation130_spill] sm:$0xff] }
 0x2fb   :  { %v1304_v8 = vmul.f32 %v5366_v13, %v1268_v63  ;;  %v1305_v62 = vmul.f32 %v5366_v13, %v1269_v6  ;;  %v5368_v40 = vld [vmem:[#allocation122_spill] sm:$0xff] }
 0x2fc   :  { %v4282_v11 = vadd.f32 %v2190_v9, %v2142_v32  ;;  %v4284_v51 = vadd.f32 %v2191_v42, %v2143_v45  ;;  %v1847_v23 = vpop.permute.xlu1 %1846  ;;  %v1760_v36 = vsel %vm356_vm2, %v5368_v40, %v5367_v29  ;;  %v1766_v38 = vsel %vm356_vm2, %v5367_v29, %v5368_v40  ;;  %v5370_v32 = vld [vmem:[#allocation127_spill] sm:$0xff]  ;;  %v5371_v45 = vld [vmem:[#allocation121_spill] sm:$0xff] }
 0x2fd   :  { %v1856_v10 = vsel %vm1852_vm11, %v1835_v49, %v1847_v23  ;;  %v1862_v50 = vsel %vm1852_vm11, %v1847_v23, %v1835_v49  ;;  %v1459_v9 = vsel %vm1454_vm10, %v5363_v1, %v5364_v0  ;;  %v1488_v42 = vmul.f32 %v5339_v39, %v1465_v59  ;;  %v5372_v23 = vld [vmem:[#allocation28_spill] sm:$0xff]  ;;  %v5377_v29 = vld [vmem:[#allocation55_spill] sm:$0xff] }
 0x2fe   :  { %v2226_v27 = vmin.f32 %v4282_v11, 0.0  ;;  %v2227_v7 = vmin.f32 %v4284_v51, 0.0  ;;  %v1884_v21 = vmul.f32 %v4038_v47, %v1862_v50  ;;  %v1885_v31 = vmul.f32 %v4053_v17, %v1856_v10  ;;  %2048 = vrot.lane.b32.xlu1 %v3211_v16, %s2730_s8  ;;  %v4338_v10 = vpop.permute.xlu0 %1940  ;;  %v5410_v16 = vld [vmem:[#allocation105_spill] sm:$0xff] }
 0x2ff   :  { %v1664_v57 = vsel %vm88_vm1, %v5371_v45, %v5370_v32  ;;  %v1670_v63 = vsel %vm88_vm1, %v5370_v32, %v5371_v45  ;;  %v1776_v6 = vmul.f32 %v1766_v38, %v5325_v48  ;;  %v1316_v1 = vadd.f32 %v1304_v8, %v1084_v26  ;;  %5373 = vst [vmem:[#allocation9_spill] sm:$0xff] %v4338_v10  ;;  %v5379_v38 = vld [vmem:[#allocation132_spill] sm:$0xff]  ;;  %v5380_v32 = vld [vmem:[#allocation46_spill] sm:$0xff] }
 0x300   :  { %v2248_v34 = vmul.f32 1.442695, %v2226_v27  ;;  %v2250_v49 = vmul.f32 1.442695, %v2227_v7  ;;  %v1920_v5 = vmul.f32 %v5369_v44, %v1884_v21  ;;  %v1921_v22 = vmul.f32 %v5369_v44, %v1885_v31  ;;  %v1945_v60 = vpop.permute.xlu1 %1944  ;;  %v5374_v7 = vld [vmem:[#allocation133_spill] sm:$0xff]  ;;  %v5375_v21 = vld [vmem:[#allocation124_spill] sm:$0xff] }
 0x301   :  { %v1317_v0 = vadd.f32 %v1305_v62, %v1085_v33  ;;  %v1777_v59 = vmul.f32 %v1760_v36, %v5329_v24  ;;  %v1489_v50 = vmul.f32 %v5340_v55, %v1459_v9  ;;  %v1680_v27 = vmul.f32 %v1670_v63, %v5322_v54  ;;  %v5376_v33 = vld [vmem:[#allocation44_spill] sm:$0xff]  ;;  %v5378_v36 = vld [vmem:[#allocation123_spill] sm:$0xff] }
 0x302   :  { %2649 = vpow2.f32 %v2248_v34  ;;  %v4331_v37 = vadd.f32 %v1920_v5, %v1726_v53  ;;  %v4333_v12 = vadd.f32 %v1921_v22, %v1727_v58  ;;  %2060 = vrot.lane.b32.xlu1 %v5372_v23, %s2730_s8  ;;  %v1967_v53 = vsel %vm1962_vm12, %v5375_v21, %v5374_v7  ;;  %s2452_s8 = sshll.u32 %s2752_s6, 4  ;;  %s2453_s8 = int_to_ptr.vmem [resolvable:$true] %s2452_s8 }
 0x303   :  { %2651 = vpow2.f32 %v2250_v49  ;;  %v1973_v58 = vsel %vm1962_vm12, %v5374_v7, %v5375_v21  ;;  %v1524_v31 = vmul.f32 %v5376_v33, %v1488_v42  ;;  %v1681_v13 = vmul.f32 %v1664_v57, %v5323_v19  ;;  %v5381_v57 = vld [vmem:[#allocation38_spill] sm:$0xff]  ;;  %p2709_p1 = scmp.lt.s32.totalorder %s2453_s8, %s2453_s8 }
 0x304   :  { %v1957_v26 = vpop.permute.xlu1 %1956  ;;  %v1812_v40 = vmul.f32 %v5377_v29, %v1776_v6  ;;  %v1863_v34 = vsel %vm1852_vm11, %v5379_v38, %v5378_v36  ;;  %v1813_v5 = vmul.f32 %v5377_v29, %v1777_v59  ;;  %v1857_v22 = vsel %vm1852_vm11, %v5378_v36, %v5379_v38  ;;  %v4377_v29 = vpop.permute.xlu0 %2001  ;;  %v5386_v38 = vld [vmem:[#allocation129_spill] sm:$0xff] }
 0x305   :  { %v1966_v8 = vsel %vm1962_vm12, %v1945_v60, %v1957_v26  ;;  %v1972_v62 = vsel %vm1962_vm12, %v1957_v26, %v1945_v60  ;;  %v1996_v60 = vmul.f32 %v4056_v43, %v1973_v58  ;;  %v1997_v9 = vmul.f32 %v4059_v56, %v1967_v53  ;;  %v5382_v26 = vld [vmem:[#allocation142_spill] sm:$0xff]  ;;  %5383 = vst [vmem:[#allocation57_spill] sm:$0xff] %v4377_v29 }
 0x306   :  { %v1994_v49 = vmul.f32 %v4056_v43, %v1972_v62  ;;  %v1995_v44 = vmul.f32 %v4059_v56, %v1966_v8  ;;  %v1525_v42 = vmul.f32 %v5376_v33, %v1489_v50  ;;  %v1716_v45 = vmul.f32 %v5380_v32, %v1680_v27  ;;  %v5384_v33 = vld [vmem:[#allocation137_spill] sm:$0xff]  ;;  %v5423_v56 = vld [vmem:[#allocation79_spill] sm:$0xff] }
 0x307   :  { %v1536_v21 = vadd.f32 %v1524_v31, %v1316_v1  ;;  %v1886_v59 = vmul.f32 %v4038_v47, %v1863_v34  ;;  %v2032_v8 = vmul.f32 %v5382_v26, %v1996_v60  ;;  %v2033_v62 = vmul.f32 %v5382_v26, %v1997_v9  ;;  %v5385_v31 = vld [vmem:[#allocation128_spill] sm:$0xff]  ;;  %v5424_v43 = vld [vmem:[#allocation87_spill] sm:$0xff] }
 0x308   :  { %v2030_v63 = vmul.f32 %v5381_v57, %v1994_v49  ;;  %v2031_v6 = vmul.f32 %v5381_v57, %v1995_v44  ;;  %v2057_v7 = vpop.permute.xlu1 %2056  ;;  %v1717_v53 = vmul.f32 %v5380_v32, %v1681_v13  ;;  %v1887_v50 = vmul.f32 %v4053_v17, %v1857_v22 }
 0x309   :  { %v1922_v1 = vmul.f32 %v5384_v33, %v1886_v59  ;;  %v1824_v36 = vadd.f32 %v1812_v40, %v5385_v31  ;;  %v1825_v34 = vadd.f32 %v1813_v5, %v5386_v38  ;;  %v1537_v49 = vadd.f32 %v1525_v42, %v1317_v0  ;;  %v5387_v5 = vld [vmem:[#allocation63_spill] sm:$0xff]  ;;  %v5388_v0 = vld [vmem:[#allocation60_spill] sm:$0xff]  ;;  %v2114_v59 = vpop.permute.xlu0 %2113 }
 0x30a   :  { %v4382_v27 = vadd.f32 %v2030_v63, %v4279_v3  ;;  %v4385_v58 = vadd.f32 %v2031_v6, %v4286_v35  ;;  %v1728_v44 = vadd.f32 %v1716_v45, %v1536_v21  ;;  %v1923_v60 = vmul.f32 %v5384_v33, %v1887_v50  ;;  %v5389_v45 = vld [vmem:[#allocation72_spill] sm:$0xff] }
 0x30b   :  { %v2044_v13 = vadd.f32 %v2032_v8, %v1824_v36  ;;  %v2045_v32 = vadd.f32 %v2033_v62, %v1825_v34  ;;  %v1729_v22 = vadd.f32 %v1717_v53, %v1537_v49  ;;  %v2176_v42 = vmul.f32 %v5388_v0, %v5387_v5  ;;  %v40_v36 = vld [vmem:[%s4985_s1 + $0x58] sm:$0xff] }
 0x30c   :  { %v2069_v9 = vpop.permute.xlu1 %2068  ;;  %v2177_v6 = vmul.f32 %v5388_v0, %v5389_v45  ;;  %v1934_v21 = vadd.f32 %v1922_v1, %v1728_v44  ;;  %vm2214_vm13 = vcmp.gt.f32.partialorder %v4282_v11, 0.0  ;;  %vm2215_vm14 = vcmp.gt.f32.partialorder %v4284_v51, 0.0 }
 0x30d   :  { %v2076_v3 = vsel %vm516_vm4, %v2057_v7, %v2069_v9  ;;  %v2082_v35 = vsel %vm516_vm4, %v2069_v9, %v2057_v7  ;;  %v1935_v8 = vadd.f32 %v1923_v60, %v1729_v22  ;;  %v39_v7 = vld [vmem:[%s4985_s1 + $0x50] sm:$0xff]  ;;  %v2188_v33 = vadd.f32 %v2176_v42, %v2044_v13 }
 0x30e   :  { %v2092_v57 = vmul.f32 %v2082_v35, %v5352_v4  ;;  %v2093_v40 = vmul.f32 %v2076_v3, %v5353_v28  ;;  %v2189_v31 = vadd.f32 %v2177_v6, %v2045_v32  ;;  %v1132_v47 = vsel %vm1124_vm6, %v5424_v43, %v5423_v56 }
 0x30f   :  { %v2650_v63 = vpop.eup %2649 }
 0x310   :  { %v2652_v26 = vpop.eup %2651  ;;  %v2128_v62 = vmul.f32 %v2114_v59, %v2092_v57  ;;  %v2129_v50 = vmul.f32 %v2114_v59, %v2093_v40  ;;  %v2547_v53 = vadd.f32 -1.0, %v2650_v63 }
 0x311   :  { %v2548_v38 = vadd.f32 -1.0, %v2652_v26 }
 0x312   :  { %v2140_v1 = vadd.f32 %v2128_v62, %v1934_v21  ;;  %v2141_v34 = vadd.f32 %v2129_v50, %v1935_v8  ;;  %v2274_v49 = vsel %vm2214_vm13, %v4282_v11, %v2547_v53  ;;  %v37_v8 = vld [vmem:[%s4985_s1 + $0x40] sm:$0xff]  ;;  %v5393_v53 = vld [vmem:[#allocation64_spill] sm:$0xff] }
 0x313   :  { %v2275_v44 = vsel %vm2215_vm14, %v4284_v51, %v2548_v38  ;;  %v2286_v60 = vadd.f32 %v2274_v49, %v39_v7  ;;  %v5392_v7 = vld [vmem:[#allocation70_spill] sm:$0xff]  ;;  %v38_v38 = vld [vmem:[%s4985_s1 + $0x48] sm:$0xff] }
 0x314   :  { %v2200_v9 = vadd.f32 %v2188_v33, %v2140_v1  ;;  %v2201_v3 = vadd.f32 %v2189_v31, %v2141_v34  ;;  %v2287_v13 = vadd.f32 %v2275_v44, %v40_v36  ;;  %v1015_v33 = vsel %vm1014_vm8, %v5393_v53, %v5392_v7 }
 0x315   :  { %v2311_v32 = vmin.f32 %v2286_v60, 0.0  ;;  %v1021_v31 = vsel %vm1014_vm8, %v5392_v7, %v5393_v53  ;;  %vm2299_vm3 = vcmp.gt.f32.partialorder %v2286_v60, 0.0  ;;  %v5401_v53 = vld [vmem:[#allocation102_spill] sm:$0xff] }
 0x316   :  { %v2224_v35 = vmin.f32 %v2200_v9, 0.0  ;;  %v2225_v22 = vmin.f32 %v2201_v3, 0.0  ;;  %v2312_v57 = vmin.f32 %v2287_v13, 0.0  ;;  %vm2212_vm15 = vcmp.gt.f32.partialorder %v2200_v9, 0.0 }
 0x317   :  { %v2333_v40 = vmul.f32 1.442695, %v2311_v32  ;;  %vm2213_vm13 = vcmp.gt.f32.partialorder %v2201_v3, 0.0  ;;  %vm2300_vm14 = vcmp.gt.f32.partialorder %v2287_v13, 0.0 }
 0x318   :  { %v2244_v63 = vmul.f32 1.442695, %v2224_v35  ;;  %v2246_v5 = vmul.f32 1.442695, %v2225_v22  ;;  %v2335_v0 = vmul.f32 1.442695, %v2312_v57 }
 0x319   :  { %v4411_v42 = vpop.permute.xlu1 %2157  ;;  %2653 = vpow2.f32 %v2333_v40  ;;  %v5395_v22 = vld [vmem:[#allocation65_spill] sm:$0xff]  ;;  %v5396_v57 = vld [vmem:[#allocation71_spill] sm:$0xff] }
 0x31a   :  { %2655 = vpow2.f32 %v2244_v63  ;;  %v906_v40 = vsel %vm899_vm5, %v5396_v57, %v5395_v22 }
 0x31b   :  { %2657 = vpow2.f32 %v2246_v5 }
 0x31c   :  { %2659 = vpow2.f32 %v2335_v0  ;;  %v1040_v0 = vmul.f32 %v5332_v61, %v1021_v31  ;;  %v924_v31 = vmul.f32 %v5401_v53, %v906_v40 }
 0x31d   :  { %v4413_v11 = vpop.permute.xlu1 %1540 }
 0x321   :  { %v4415_v51 = vpop.permute.xlu1 %1638 }
 0x322   :  { %5390 = vst [vmem:[#allocation111_spill] sm:$0xff] %v4415_v51 }
 0x325   :  { %v4417_v45 = vpop.permute.xlu1 %1685 }
 0x326   :  { %5391 = vst [vmem:[#allocation112_spill] sm:$0xff] %v4417_v45  ;;  %v2654_v6 = vpop.eup %2653  ;;  %v5411_v45 = vld [vmem:[#allocation23_spill] sm:$0xff] }
 0x327   :  { %v2656_v21 = vpop.eup %2655  ;;  %v2559_v59 = vadd.f32 -1.0, %v2654_v6  ;;  %v5397_v6 = vld [vmem:[#allocation66_spill] sm:$0xff] }
 0x328   :  { %v2658_v26 = vpop.eup %2657  ;;  %v2545_v62 = vadd.f32 -1.0, %v2656_v21 }
 0x329   :  { %v2660_v50 = vpop.eup %2659  ;;  %v4430_v36 = vpop.permute.xlu1 %1746  ;;  %v2546_v1 = vadd.f32 -1.0, %v2658_v26  ;;  %v2359_v44 = vsel %vm2299_vm3, %v2286_v60, %v2559_v59  ;;  %v5398_v60 = vld [vmem:[#allocation73_spill] sm:$0xff] }
 0x32a   :  { %5394 = vst [vmem:[#allocation30_spill] sm:$0xff] %v4430_v36  ;;  %v2560_v34 = vadd.f32 -1.0, %v2660_v50  ;;  %v2272_v49 = vsel %vm2212_vm15, %v2200_v9, %v2545_v62  ;;  %v900_v9 = vsel %vm899_vm5, %v5395_v22, %v5396_v57  ;;  %v1235_v26 = vsel %vm1234_vm9, %v5397_v6, %v5398_v60  ;;  %v5400_v62 = vld [vmem:[#allocation74_spill] sm:$0xff] }
 0x32b   :  { %v2273_v32 = vsel %vm2213_vm13, %v2201_v3, %v2546_v1  ;;  %v4435_v35 = vadd.f32 %v2272_v49, %v37_v8  ;;  %v1241_v3 = vsel %vm1234_vm9, %v5398_v60, %v5397_v6  ;;  %v5399_v8 = vld [vmem:[#allocation67_spill] sm:$0xff] }
 0x32c   :  { %v2360_v63 = vsel %vm2300_vm14, %v2287_v13, %v2560_v34  ;;  %v4441_v5 = vadd.f32 %v2273_v32, %v38_v38  ;;  %v1041_v13 = vmul.f32 %v5333_v15, %v1015_v33  ;;  %v1131_v50 = vsel %vm1124_vm6, %v5400_v62, %v5399_v8  ;;  %v5402_v38 = vld [vmem:[#allocation68_spill] sm:$0xff]  ;;  %v5403_v1 = vld [vmem:[#allocation75_spill] sm:$0xff] }
 0x32d   :  { %2391 = vmatprep.subr.mxu1 %v2360_v63  ;;  %v4452_v21 = vpop.permute.xlu1 %1832  ;;  %v2309_v59 = vmin.f32 %v4435_v35, 0.0  ;;  %v1125_v33 = vsel %vm1124_vm6, %v5399_v8, %v5400_v62  ;;  %v1461_v34 = vsel %vm1454_vm10, %v5403_v1, %v5402_v38  ;;  %v5404_v32 = vld [vmem:[#allocation103_spill] sm:$0xff]  ;;  %v1260_v57 = vmul.f32 %v5326_v41, %v1241_v3  ;;  %v5406_v8 = vld [vmem:[#allocation69_spill] sm:$0xff]  ;;  %v5407_v62 = vld [vmem:[#allocation76_spill] sm:$0xff] }
 0x32e   :  { %2392 = vmatpush1.msra.mxu1 %v2359_v44  ;;  %v2310_v7 = vmin.f32 %v4441_v5, 0.0  ;;  %v925_v22 = vmul.f32 %v5404_v32, %v900_v9  ;;  %v1455_v44 = vsel %vm1454_vm10, %v5402_v38, %v5403_v1  ;;  %v1261_v63 = vmul.f32 %v5327_v25, %v1235_v26  ;;  %v5405_v6 = vld [vmem:[#allocation99_spill] sm:$0xff]  ;;  %v5408_v9 = vld [vmem:[#allocation100_spill] sm:$0xff] }
 0x32f   :  { %v2329_v49 = vmul.f32 1.442695, %v2309_v59  ;;  %v1150_v60 = vmul.f32 %v5405_v6, %v1131_v50  ;;  %v1351_v23 = vsel %vm1344_vm7, %v5407_v62, %v5406_v8  ;;  %v1151_v3 = vmul.f32 %v5408_v9, %v1125_v33  ;;  %v5409_v50 = vld [vmem:[#allocation14_spill] sm:$0xff] }
 0x330   :  { %v2331_v40 = vmul.f32 1.442695, %v2310_v7  ;;  %v1480_v29 = vmul.f32 %v5339_v39, %v1461_v34  ;;  %v1345_v7 = vsel %vm1344_vm7, %v5406_v8, %v5407_v62  ;;  %v1481_v26 = vmul.f32 %v5340_v55, %v1455_v44  ;;  %v5414_v8 = vld [vmem:[#allocation13_spill] sm:$0xff] }
 0x331   :  { %v4486_v59 = vpop.permute.xlu1 %1844  ;;  %2661 = vpow2.f32 %v2329_v49  ;;  %v1076_v38 = vmul.f32 %v5409_v50, %v1040_v0  ;;  %v1077_v1 = vmul.f32 %v5409_v50, %v1041_v13  ;;  %v1370_v20 = vmul.f32 %v5410_v16, %v1351_v23  ;;  %v5415_v62 = vld [vmem:[#allocation37_spill] sm:$0xff]  ;;  %v2361_v23 = vld [vmem:[%s4989_s5] sm:$0xff]  ;;  %v5421_v50 = vld [vmem:[#allocation86_spill] sm:$0xff] }
 0x332   :  { %2663 = vpow2.f32 %v2331_v40  ;;  %v1296_v49 = vmul.f32 %v5411_v45, %v1260_v57  ;;  %v1297_v33 = vmul.f32 %v5411_v45, %v1261_v63  ;;  %v1186_v34 = vmul.f32 %v5412_v46, %v1150_v60  ;;  %v5416_v57 = vld [vmem:[#allocation84_spill] sm:$0xff]  ;;  %v5417_v63 = vld [vmem:[#allocation78_spill] sm:$0xff]  ;;  %2364 = vperm.xlu0 %2624, %v2361_v23  }
 0x333   :  { %v1371_v10 = vmul.f32 %v5413_v2, %v1345_v7  ;;  %v966_v40 = vmul.f32 %v5414_v8, %v924_v31  ;;  %v967_v44 = vmul.f32 %v5414_v8, %v925_v22  ;;  %v1187_v0 = vmul.f32 %v5412_v46, %v1151_v3  ;;  %v5418_v22 = vld [vmem:[#allocation77_spill] sm:$0xff]  ;;  %v5422_v8 = vld [vmem:[#allocation80_spill] sm:$0xff] }
 0x334   :  { %v1516_v13 = vmul.f32 %v5415_v62, %v1480_v29  ;;  %v1517_v45 = vmul.f32 %v5415_v62, %v1481_v26  ;;  %v1016_v60 = vsel %vm1014_vm8, %v5417_v63, %v5416_v57  ;;  %v1022_v31 = vsel %vm1014_vm8, %v5416_v57, %v5417_v63  ;;  %v5419_v46 = vld [vmem:[#allocation85_spill] sm:$0xff] }
 0x335   :  { %v4502_v14 = vpop.permute.xlu1 %1942  ;;  %v907_v29 = vsel %vm899_vm5, %v5419_v46, %v5418_v22  ;;  %v5420_v3 = vld [vmem:[#allocation29_spill] sm:$0xff]  ;;  %v901_v26 = vsel %vm899_vm5, %v5418_v22, %v5419_v46  ;;  %v1236_v62 = vsel %vm1234_vm9, %v5422_v8, %v5421_v50  ;;  %v1242_v57 = vsel %vm1234_vm9, %v5421_v50, %v5422_v8 }
 0x336   :  { %v1406_v7 = vmul.f32 %v5420_v3, %v1370_v20  ;;  %v1308_v63 = vadd.f32 %v1296_v49, %v1076_v38  ;;  %v1309_v52 = vadd.f32 %v1297_v33, %v1077_v1  ;;  %v1198_v23 = vadd.f32 %v1186_v34, %v966_v40 }
 0x337   :  { %v1407_v20 = vmul.f32 %v5420_v3, %v1371_v10  ;;  %v1042_v17 = vmul.f32 %v5332_v61, %v1022_v31  ;;  %v1043_v22 = vmul.f32 %v5333_v15, %v1016_v60  ;;  %v926_v46 = vmul.f32 %v5401_v53, %v907_v29 }
 0x338   :  { %v1199_v51 = vadd.f32 %v1187_v0, %v967_v44  ;;  %v927_v38 = vmul.f32 %v5404_v32, %v901_v26  ;;  %v1262_v1 = vmul.f32 %v5326_v41, %v1242_v57  ;;  %v1263_v10 = vmul.f32 %v5327_v25, %v1236_v62  ;;  %v5425_v32 = vld [vmem:[#allocation82_spill] sm:$0xff]  ;;  %v5426_v0 = vld [vmem:[#allocation88_spill] sm:$0xff] }
 0x339   :  { %v4538_v36 = vpop.permute.xlu1 %1954  ;;  %v4550_v49 = vadd.f32 %v1516_v13, %v1308_v63  ;;  %v4552_v33 = vadd.f32 %v1517_v45, %v1309_v52  ;;  %v4554_v34 = vadd.f32 %v1406_v7, %v1198_v23  ;;  %v1126_v53 = vsel %vm1124_vm6, %v5423_v56, %v5424_v43  ;;  %v5427_v52 = vld [vmem:[#allocation17_spill] sm:$0xff]  ;;  %v5430_v57 = vld [vmem:[#allocation20_spill] sm:$0xff] }
 0x33a   :  { %v4556_v40 = vadd.f32 %v1407_v20, %v1199_v51  ;;  %v1152_v44 = vmul.f32 %v5405_v6, %v1132_v47  ;;  %v1462_v60 = vsel %vm1454_vm10, %v5426_v0, %v5425_v32  ;;  %v1078_v45 = vmul.f32 %v5427_v52, %v1042_v17  ;;  %v5428_v51 = vld [vmem:[#allocation12_spill] sm:$0xff]  ;;  %v5429_v6 = vld [vmem:[#allocation25_spill] sm:$0xff] }
 0x33b   :  { %v1079_v29 = vmul.f32 %v5427_v52, %v1043_v22  ;;  %v968_v3 = vmul.f32 %v5428_v51, %v926_v46  ;;  %v1456_v43 = vsel %vm1454_vm10, %v5425_v32, %v5426_v0  ;;  %v969_v47 = vmul.f32 %v5428_v51, %v927_v38  ;;  %v5431_v46 = vld [vmem:[#allocation81_spill] sm:$0xff]  ;;  %v5434_v0 = vld [vmem:[#allocation58_spill] sm:$0xff] }
 0x33c   :  { %v1298_v7 = vmul.f32 %v5429_v6, %v1262_v1  ;;  %v1299_v26 = vmul.f32 %v5429_v6, %v1263_v10  ;;  %v1153_v8 = vmul.f32 %v5408_v9, %v1126_v53  ;;  %v1482_v17 = vmul.f32 %v5339_v39, %v1462_v60  ;;  %v5432_v38 = vld [vmem:[#allocation89_spill] sm:$0xff] }
 0x33d   :  { %v2055_v13 = vpop.permute.xlu1 %2054  ;;  %vm2297_vm5 = vcmp.gt.f32.partialorder %v4435_v35, 0.0  ;;  %v1188_v63 = vmul.f32 %v5430_v57, %v1152_v44  ;;  %v1483_v23 = vmul.f32 %v5340_v55, %v1456_v43  ;;  %vm2298_vm6 = vcmp.gt.f32.partialorder %v4441_v5, 0.0  ;;  %v5433_v44 = vld [vmem:[#allocation52_spill] sm:$0xff] }
 0x33e   :  { %v2662_v31 = vpop.eup %2661  ;;  %v1352_v1 = vsel %vm1344_vm7, %v5432_v38, %v5431_v46  ;;  %v2174_v32 = vmul.f32 %v4411_v42, %v5433_v44  ;;  %v2175_v60 = vmul.f32 %v4411_v42, %v5434_v0  ;;  %v4599_v52 = vadd.f32 %v1298_v7, %v1078_v45 }
 0x33f   :  { %v2664_v56 = vpop.eup %2663  ;;  %v2557_v50 = vadd.f32 -1.0, %v2662_v31  ;;  %v4601_v51 = vadd.f32 %v1299_v26, %v1079_v29  ;;  %v1189_v43 = vmul.f32 %v5430_v57, %v1153_v8  ;;  %v1346_v42 = vsel %vm1344_vm7, %v5431_v46, %v5432_v38  ;;  %v5436_v26 = vld [vmem:[#allocation91_spill] sm:$0xff]  ;;  %v5437_v8 = vld [vmem:[#allocation96_spill] sm:$0xff] }
 0x340   :  { %v2558_v62 = vadd.f32 -1.0, %v2664_v56  ;;  %v1372_v6 = vmul.f32 %v5410_v16, %v1352_v1  ;;  %v1200_v29 = vadd.f32 %v1188_v63, %v968_v3  ;;  %v5438_v57 = vld [vmem:[#allocation92_spill] sm:$0xff]  ;;  %v2186_v46 = vadd.f32 %v2174_v32, %v4382_v27  ;;  %v5441_v1 = vld [vmem:[#allocation83_spill] sm:$0xff] }
 0x341   :  { %v2067_v20 = vpop.permute.xlu1 %2066  ;;  %v2357_v22 = vsel %vm2297_vm5, %v4435_v35, %v2557_v50  ;;  %v2187_v16 = vadd.f32 %v2175_v60, %v4385_v58  ;;  %v1373_v63 = vmul.f32 %v5413_v2, %v1346_v42  ;;  %v1017_v2 = vsel %vm1014_vm8, %v5436_v26, %v5437_v8  ;;  %v5443_v60 = vld [vmem:[#allocation101_spill] sm:$0xff] }
 0x342   :  { %v2075_v9 = vsel %vm516_vm4, %v2055_v13, %v2067_v20  ;;  %v2081_v10 = vsel %vm516_vm4, %v2067_v20, %v2055_v13  ;;  %v2358_v53 = vsel %vm2298_vm6, %v4441_v5, %v2558_v62  ;;  %v5435_v13 = vld [vmem:[#allocation34_spill] sm:$0xff]  ;;  %v2110_v5 = vpop.permute.xlu0 %2109 }
 0x343   :  { %v2090_v35 = vmul.f32 %v2081_v10, %v5352_v4  ;;  %v2091_v31 = vmul.f32 %v2075_v9, %v5353_v28  ;;  %2393 = vmatprep.subr.mxu1 %v2358_v53  ;;  %v4605_v56 = vmul.f32 %v5435_v13, %v1482_v17  ;;  %v1519_v7 = vmul.f32 %v5435_v13, %v1483_v23  ;;  %v5439_v20 = vld [vmem:[#allocation98_spill] sm:$0xff] }
 0x344   :  { %2394 = vmatpush1.msra.mxu1 %v2357_v22  ;;  %v1023_v17 = vsel %vm1014_vm8, %v5437_v8, %v5436_v26  ;;  %v1243_v22 = vsel %vm1234_vm9, %v5439_v20, %v5438_v57  ;;  %v5440_v23 = vld [vmem:[#allocation90_spill] sm:$0xff]  ;;  %v1237_v27 = vsel %vm1234_vm9, %v5438_v57, %v5439_v20  ;;  %v1045_v8 = vmul.f32 %v5333_v15, %v1017_v2 }
 0x345   :  { %v2126_v50 = vmul.f32 %v2110_v5, %v2090_v35  ;;  %v2127_v62 = vmul.f32 %v2110_v5, %v2091_v31  ;;  %v4612_v45 = vpop.permute.xlu1 %2153  ;;  %v1565_v9 = vsel %vm59_vm0, %v5441_v1, %v5440_v23  ;;  %v1571_v10 = vsel %vm59_vm0, %v5440_v23, %v5441_v1  ;;  %v5444_v35 = vld [vmem:[#allocation93_spill] sm:$0xff]  ;;  %v5451_v1 = vld [vmem:[#allocation107_spill] sm:$0xff] }
 0x346   :  { %v1044_v32 = vmul.f32 %v5332_v61, %v1023_v17  ;;  %v1264_v0 = vmul.f32 %v5326_v41, %v1243_v22  ;;  %v1457_v31 = vsel %vm1454_vm10, %v5444_v35, %v5443_v60  ;;  %v1463_v13 = vsel %vm1454_vm10, %v5443_v60, %v5444_v35  ;;  %v5446_v22 = vld [vmem:[#allocation15_spill] sm:$0xff] }
 0x347   :  { %v2138_v38 = vadd.f32 %v2126_v50, %v4331_v37  ;;  %v2139_v3 = vadd.f32 %v2127_v62, %v4333_v12  ;;  %v5442_v37 = vld [vmem:[#allocation31_spill] sm:$0xff]  ;;  %v1201_v5 = vadd.f32 %v1189_v43, %v969_v47  ;;  %v1265_v42 = vmul.f32 %v5327_v25, %v1237_v27  ;;  %v5453_v27 = vld [vmem:[#allocation94_spill] sm:$0xff] }
 0x348   :  { %v1408_v58 = vmul.f32 %v5442_v37, %v1372_v6  ;;  %v1409_v61 = vmul.f32 %v5442_v37, %v1373_v63  ;;  %v1578_v41 = vmul.f32 %v1571_v10, %v2924_v30  ;;  %v5445_v62 = vld [vmem:[#allocation7_spill] sm:$0xff]  ;;  %v1484_v17 = vmul.f32 %v5339_v39, %v1463_v13  ;;  %v5449_v63 = vld [vmem:[#allocation104_spill] sm:$0xff]  ;;  %v5452_v10 = vld [vmem:[#allocation110_spill] sm:$0xff] }
 0x349   :  { %v4645_v12 = vadd.f32 %v2186_v46, %v2138_v38  ;;  %v4647_v53 = vadd.f32 %v2187_v16, %v2139_v3  ;;  %v4649_v44 = vpop.permute.xlu1 %1636  ;;  %v1579_v26 = vmul.f32 %v1565_v9, %v5445_v62  ;;  %v1485_v57 = vmul.f32 %v5340_v55, %v1457_v31  ;;  %v5447_v16 = vld [vmem:[#allocation26_spill] sm:$0xff]  ;;  %v5448_v3 = vld [vmem:[#allocation95_spill] sm:$0xff]  ;;  %v5450_v55 = vld [vmem:[#allocation97_spill] sm:$0xff] }
 0x34a   :  { %v1420_v25 = vadd.f32 %v1408_v58, %v1200_v29  ;;  %v1080_v46 = vmul.f32 %v5446_v22, %v1044_v32  ;;  %v1300_v38 = vmul.f32 %v5447_v16, %v1264_v0  ;;  %v1572_v23 = vsel %vm59_vm0, %v5449_v63, %v5448_v3  ;;  %v5454_v32 = vld [vmem:[#allocation39_spill] sm:$0xff] }
 0x34b   :  { %v2222_v6 = vmin.f32 %v4645_v12, 0.0  ;;  %v2223_v50 = vmin.f32 %v4647_v53, 0.0  ;;  %v1301_v15 = vmul.f32 %v5447_v16, %v1265_v42  ;;  %v1566_v39 = vsel %vm59_vm0, %v5448_v3, %v5449_v63  ;;  %v5455_v13 = vld [vmem:[#allocation43_spill] sm:$0xff] }
 0x34c   :  { %v1668_v29 = vsel %vm88_vm1, %v5451_v1, %v5450_v55  ;;  %v1662_v9 = vsel %vm88_vm1, %v5450_v55, %v5451_v1  ;;  %v1758_v37 = vsel %vm356_vm2, %v5453_v27, %v5452_v10  ;;  %v1764_v58 = vsel %vm356_vm2, %v5452_v10, %v5453_v27  ;;  %v5457_v1 = vld [vmem:[#allocation50_spill] sm:$0xff]  ;;  %v5460_v27 = vld [vmem:[#allocation109_spill] sm:$0xff] }
 0x34d   :  { %v2240_v20 = vmul.f32 1.442695, %v2222_v6  ;;  %v2242_v47 = vmul.f32 1.442695, %v2223_v50  ;;  %v4670_v43 = vpop.permute.xlu1 %1732  ;;  %v1081_v2 = vmul.f32 %v5446_v22, %v1045_v8  ;;  %v1520_v0 = vmul.f32 %v5454_v32, %v1484_v17 }
 0x34e   :  { %v1521_v60 = vmul.f32 %v5454_v32, %v1485_v57  ;;  %v1580_v35 = vmul.f32 %v1572_v23, %v2924_v30  ;;  %v1614_v42 = vmul.f32 %v5455_v13, %v1578_v41  ;;  %v1312_v6 = vadd.f32 %v1300_v38, %v1080_v46  ;;  %v5456_v23 = vld [vmem:[#allocation40_spill] sm:$0xff] }
 0x34f   :  { %2665 = vpow2.f32 %v2240_v20  ;;  %v1581_v50 = vmul.f32 %v1566_v39, %v5445_v62  ;;  %v1676_v20 = vmul.f32 %v1668_v29, %v5322_v54  ;;  %v1313_v16 = vadd.f32 %v1301_v15, %v1081_v2 }
 0x350   :  { %2667 = vpow2.f32 %v2242_v47  ;;  %v1677_v47 = vmul.f32 %v1662_v9, %v5323_v19  ;;  %v1772_v8 = vmul.f32 %v1764_v58, %v5325_v48  ;;  %v1773_v17 = vmul.f32 %v1758_v37, %v5329_v24  ;;  %v5459_v9 = vld [vmem:[#allocation108_spill] sm:$0xff]  ;;  %v5461_v58 = vld [vmem:[#allocation131_spill] sm:$0xff] }
 0x351   :  { %v4703_v31 = vpop.permute.xlu1 %1830  ;;  %v4713_v57 = vadd.f32 %v4605_v56, %v4599_v52  ;;  %v4716_v22 = vadd.f32 %v1519_v7, %v4601_v51  ;;  %v1421_v41 = vadd.f32 %v1409_v61, %v1201_v5  ;;  %v1615_v46 = vmul.f32 %v5455_v13, %v1579_v26  ;;  %v5458_v7 = vld [vmem:[#allocation59_spill] sm:$0xff]  ;;  %v4737_v26 = vpop.permute.xlu0 %2105 }
 0x352   :  { %v4719_v38 = vadd.f32 %v1614_v42, %v1420_v25  ;;  %v1532_v3 = vadd.f32 %v1520_v0, %v1312_v6  ;;  %v1533_v63 = vadd.f32 %v1521_v60, %v1313_v16  ;;  %v1616_v15 = vmul.f32 %v5456_v23, %v1580_v35  ;;  %v5464_v35 = vld [vmem:[#allocation143_spill] sm:$0xff]  ;;  %v5465_v42 = vld [vmem:[#allocation145_spill] sm:$0xff] }
 0x353   :  { %v1617_v55 = vmul.f32 %v5456_v23, %v1581_v50  ;;  %v1712_v29 = vmul.f32 %v5457_v1, %v1676_v20  ;;  %v1861_v52 = vsel %vm1852_vm11, %v4486_v59, %v4452_v21  ;;  %v1971_v51 = vsel %vm1962_vm12, %v4538_v36, %v4502_v14 }
 0x354   :  { %v1713_v56 = vmul.f32 %v5457_v1, %v1677_v47  ;;  %v1808_v5 = vmul.f32 %v5458_v7, %v1772_v8  ;;  %v1809_v61 = vmul.f32 %v5458_v7, %v1773_v17  ;;  %v1965_v25 = vsel %vm1962_vm12, %v4502_v14, %v4538_v36  ;;  %v5462_v14 = vld [vmem:[#allocation111_spill] sm:$0xff]  ;;  %v5463_v36 = vld [vmem:[#allocation134_spill] sm:$0xff]  ;;  %v5467_v8 = vld [vmem:[#allocation144_spill] sm:$0xff] }
 0x355   :  { %v4722_v39 = vpop.permute.xlu1 %1891  ;;  %v1628_v10 = vadd.f32 %v1616_v15, %v5459_v9  ;;  %v1629_v37 = vadd.f32 %v1617_v55, %v5460_v27  ;;  %v1564_v2 = vsel %vm59_vm0, %v4413_v11, %v5461_v58  ;;  %v1855_v32 = vsel %vm1852_vm11, %v4452_v21, %v4486_v59  ;;  %v5466_v59 = vld [vmem:[#allocation146_spill] sm:$0xff]  ;;  %v5470_v7 = vld [vmem:[#allocation139_spill] sm:$0xff] }
 0x356   :  { %v1570_v0 = vsel %vm59_vm0, %v5461_v58, %v4413_v11  ;;  %v1667_v60 = vsel %vm88_vm1, %v5463_v36, %v5462_v14  ;;  %v1882_v13 = vmul.f32 %v5464_v35, %v1861_v52  ;;  %v1992_v6 = vmul.f32 %v5465_v42, %v1971_v51  ;;  %v4784_v51 = vpop.permute.xlu0 %2101 }
 0x357   :  { %v4763_v20 = vadd.f32 %v1615_v46, %v1421_v41  ;;  %v1724_v16 = vadd.f32 %v1712_v29, %v1532_v3  ;;  %v1661_v21 = vsel %vm88_vm1, %v5462_v14, %v5463_v36  ;;  %v1993_v11 = vmul.f32 %v5466_v59, %v1965_v25  ;;  %v5468_v3 = vld [vmem:[#allocation135_spill] sm:$0xff]  ;;  %v5469_v29 = vld [vmem:[#allocation30_spill] sm:$0xff] }
 0x358   :  { %v1725_v47 = vadd.f32 %v1713_v56, %v1533_v63  ;;  %v1883_v17 = vmul.f32 %v5467_v8, %v1855_v32  ;;  %v1820_v23 = vadd.f32 %v1808_v5, %v1628_v10  ;;  %v1821_v15 = vadd.f32 %v1809_v61, %v1629_v37  ;;  %v36_v37 = vld [vmem:[%s4985_s1 + $0x38] sm:$0xff] }
 0x359   :  { %v1953_v50 = vpop.permute.xlu1 %1952  ;;  %v4772_v1 = vmul.f32 %v1570_v0, %v2924_v30  ;;  %v4775_v41 = vmul.f32 %v1564_v2, %v5445_v62  ;;  %v4778_v46 = vmul.f32 %v1667_v60, %v5322_v54  ;;  %v1763_v52 = vsel %vm356_vm2, %v5469_v29, %v5468_v3  ;;  %v5471_v30 = vld [vmem:[#allocation5_spill] sm:$0xff]  ;;  %v5472_v14 = vld [vmem:[#allocation42_spill] sm:$0xff]  ;;  %v5473_v60 = vld [vmem:[#allocation47_spill] sm:$0xff] }
 0x35a   :  { %v1675_v56 = vmul.f32 %v1661_v21, %v5323_v19  ;;  %v1918_v5 = vmul.f32 %v5470_v7, %v1882_v13  ;;  %v2028_v61 = vmul.f32 %v5471_v30, %v1992_v6  ;;  %v35_v62 = vld [vmem:[%s4985_s1 + $0x30] sm:$0xff]  ;;  %v1757_v10 = vsel %vm356_vm2, %v5468_v3, %v5469_v29 }
 0x35b   :  { %v2029_v27 = vmul.f32 %v5471_v30, %v1993_v11  ;;  %vm2210_vm0 = vcmp.gt.f32.partialorder %v4645_v12, 0.0  ;;  %v1770_v2 = vmul.f32 %v1763_v52, %v5325_v48  ;;  %v1919_v32 = vmul.f32 %v5470_v7, %v1883_v17  ;;  %v4820_v7 = vpop.permute.xlu0 %1840 }
 0x35c   :  { %v2666_v55 = vpop.eup %2665  ;;  %vm2211_vm7 = vcmp.gt.f32.partialorder %v4647_v53, 0.0  ;;  %v2172_v36 = vmul.f32 %v4612_v45, %v5472_v14  ;;  %v2173_v13 = vmul.f32 %v4612_v45, %v5473_v60  ;;  %v1771_v11 = vmul.f32 %v1757_v10, %v5329_v24 }
 0x35d   :  { %v2668_v63 = vpop.eup %2667  ;;  %v2053_v25 = vpop.permute.xlu1 %2052  ;;  %v2543_v9 = vadd.f32 -1.0, %v2666_v55  ;;  %v1930_v55 = vadd.f32 %v1918_v5, %v1724_v16  ;;  %v2040_v3 = vadd.f32 %v2028_v61, %v1820_v23  ;;  %v2041_v52 = vadd.f32 %v2029_v27, %v1821_v15  ;;  %v5474_v15 = vld [vmem:[#allocation49_spill] sm:$0xff] }
 0x35e   :  { %v2544_v58 = vadd.f32 -1.0, %v2668_v63 }
 0x35f   :  { %v2270_v0 = vsel %vm2210_vm0, %v4645_v12, %v2543_v9  ;;  %v2184_v5 = vadd.f32 %v2172_v36, %v2040_v3  ;;  %v2185_v61 = vadd.f32 %v2173_v13, %v2041_v52  ;;  %v5477_v13 = vld [vmem:[#allocation114_spill] sm:$0xff]  ;;  %v1951_v52 = vpop.permute.xlu0 %1950  ;;  %vm2367_vm0 = vcmask 392192  }
 0x360   :  { %v2271_v6 = vsel %vm2211_vm7, %v4647_v53, %v2544_v58  ;;  %v4810_v21 = vadd.f32 %v2270_v0, %v35_v62  ;;  %v1931_v53 = vadd.f32 %v1919_v32, %v1725_v47  ;;  %v1854_v62 = vsel %vm1852_vm11, %v4703_v31, %v5474_v15  ;;  %v5475_v58 = vld [vmem:[#allocation113_spill] sm:$0xff] }
 0x361   :  { %v2065_v29 = vpop.permute.xlu1 %2064  ;;  %v4813_v17 = vadd.f32 %v2271_v6, %v36_v37  ;;  %v1660_v32 = vsel %vm88_vm1, %v4649_v44, %v5475_v58  ;;  %v5476_v0 = vld [vmem:[#allocation9_spill] sm:$0xff]  ;;  %v1756_v6 = vsel %vm356_vm2, %v4670_v43, %v5477_v13  ;;  %v1762_v3 = vsel %vm356_vm2, %v5477_v13, %v4670_v43  ;;  %v5479_v43 = vld [vmem:[#allocation62_spill] sm:$0xff] }
 0x362   :  { %v2074_v12 = vsel %vm516_vm4, %v2053_v25, %v2065_v29  ;;  %v2080_v63 = vsel %vm516_vm4, %v2065_v29, %v2053_v25  ;;  %v2307_v45 = vmin.f32 %v4810_v21, 0.0  ;;  %v1860_v25 = vsel %vm1852_vm11, %v5474_v15, %v4703_v31 }
 0x363   :  { %v2088_v30 = vmul.f32 %v2080_v63, %v5352_v4  ;;  %v2089_v16 = vmul.f32 %v2074_v12, %v5353_v28  ;;  %v2308_v23 = vmin.f32 %v4813_v17, 0.0  ;;  %v1964_v14 = vsel %vm1962_vm12, %v5476_v0, %v1953_v50 }
 0x364   :  { %v2325_v9 = vmul.f32 1.442695, %v2307_v45  ;;  %v1970_v36 = vsel %vm1962_vm12, %v1953_v50, %v5476_v0  ;;  %v1666_v31 = vsel %vm88_vm1, %v5475_v58, %v4649_v44  ;;  %v1880_v50 = vmul.f32 %v5464_v35, %v1860_v25 }
 0x365   :  { %v2124_v47 = vmul.f32 %v4737_v26, %v2088_v30  ;;  %v2125_v10 = vmul.f32 %v4737_v26, %v2089_v16  ;;  %v2150_v27 = vpop.permute.xlu1 %2149  ;;  %v2327_v37 = vmul.f32 1.442695, %v2308_v23  ;;  %v1881_v29 = vmul.f32 %v5467_v8, %v1854_v62 }
 0x366   :  { %2669 = vpow2.f32 %v2325_v9  ;;  %v1990_v44 = vmul.f32 %v5465_v42, %v1970_v36  ;;  %v1806_v23 = vmul.f32 %v5479_v43, %v1770_v2  ;;  %v1807_v15 = vmul.f32 %v5479_v43, %v1771_v11  ;;  %v2063_v36 = vpop.permute.xlu0 %2062  ;;  %v5486_v43 = vld [vmem:[#allocation35_spill] sm:$0xff] }
 0x367   :  { %v2136_v26 = vadd.f32 %v2124_v47, %v1930_v55  ;;  %v2137_v60 = vadd.f32 %v2125_v10, %v1931_v53  ;;  %2671 = vpow2.f32 %v2327_v37  ;;  %v1991_v55 = vmul.f32 %v5466_v59, %v1964_v14  ;;  %v5478_v53 = vld [vmem:[#allocation53_spill] sm:$0xff]  ;;  %v5480_v10 = vld [vmem:[#allocation140_spill] sm:$0xff] }
 0x368   :  { %v1710_v30 = vmul.f32 %v5478_v53, %v4778_v46  ;;  %v1711_v16 = vmul.f32 %v5478_v53, %v1675_v56  ;;  %v1672_v62 = vmul.f32 %v1666_v31, %v5322_v54  ;;  %v1673_v9 = vmul.f32 %v1660_v32, %v5323_v19  ;;  %v5481_v37 = vld [vmem:[#allocation8_spill] sm:$0xff]  ;;  %v5482_v19 = vld [vmem:[#allocation61_spill] sm:$0xff] }
 0x369   :  { %v4861_v12 = vadd.f32 %v2184_v5, %v2136_v26  ;;  %v4863_v63 = vadd.f32 %v2185_v61, %v2137_v60  ;;  %v1829_v45 = vpop.permute.xlu1 %1828  ;;  %v1768_v61 = vmul.f32 %v1762_v3, %v5325_v48  ;;  %v1769_v47 = vmul.f32 %v1756_v6, %v5329_v24  ;;  %v5483_v60 = vld [vmem:[#allocation112_spill] sm:$0xff] }
 0x36a   :  { %v1916_v46 = vmul.f32 %v5480_v10, %v1880_v50  ;;  %v1917_v56 = vmul.f32 %v5480_v10, %v1881_v29  ;;  %v2026_v2 = vmul.f32 %v5481_v37, %v1990_v44  ;;  %v2027_v11 = vmul.f32 %v5481_v37, %v1991_v55  ;;  %v5484_v3 = vld [vmem:[#allocation136_spill] sm:$0xff] }
 0x36b   :  { %v2220_v25 = vmin.f32 %v4861_v12, 0.0  ;;  %v2221_v5 = vmin.f32 %v4863_v63, 0.0  ;;  %v1612_v32 = vmul.f32 %v5482_v19, %v4772_v1  ;;  %v1613_v14 = vmul.f32 %v5482_v19, %v4775_v41  ;;  %v5485_v55 = vld [vmem:[#allocation32_spill] sm:$0xff] }
 0x36c   :  { %v1722_v48 = vadd.f32 %v1710_v30, %v4713_v57  ;;  %v1723_v24 = vadd.f32 %v1711_v16, %v4716_v22  ;;  %v1818_v31 = vadd.f32 %v1806_v23, %v4719_v38  ;;  %v1819_v26 = vadd.f32 %v1807_v15, %v4763_v20  ;;  %v5487_v19 = vld [vmem:[#allocation24_spill] sm:$0xff] }
 0x36d   :  { %v2236_v58 = vmul.f32 1.442695, %v2220_v25  ;;  %v2238_v54 = vmul.f32 1.442695, %v2221_v5  ;;  %v1939_v0 = vpop.permute.xlu1 %1938  ;;  %v1708_v13 = vmul.f32 %v5483_v60, %v1672_v62  ;;  %v1709_v6 = vmul.f32 %v5483_v60, %v1673_v9 }
 0x36e   :  { %v1804_v50 = vmul.f32 %v5484_v3, %v1768_v61  ;;  %v1805_v1 = vmul.f32 %v5484_v3, %v1769_v47  ;;  %v1928_v41 = vadd.f32 %v1916_v46, %v1722_v48  ;;  %v1929_v29 = vadd.f32 %v1917_v56, %v1723_v24 }
 0x36f   :  { %2673 = vpow2.f32 %v2236_v58  ;;  %v2038_v57 = vadd.f32 %v2026_v2, %v1818_v31  ;;  %v2039_v44 = vadd.f32 %v2027_v11, %v1819_v26  ;;  %v2170_v53 = vmul.f32 %v2150_v27, %v5485_v55 }
 0x370   :  { %2675 = vpow2.f32 %v2238_v54  ;;  %v1969_v38 = vsel %vm1962_vm12, %v1951_v52, %v1939_v0  ;;  %v2171_v23 = vmul.f32 %v2150_v27, %v5486_v43  ;;  %v1963_v15 = vsel %vm1962_vm12, %v1939_v0, %v1951_v52  ;;  %v2146_v27 = vpop.permute.xlu0 %2145 }
 0x371   :  { %v2051_v22 = vpop.permute.xlu1 %2050  ;;  %v1853_v5 = vsel %vm1852_vm11, %v1829_v45, %v4820_v7  ;;  %v1859_v61 = vsel %vm1852_vm11, %v4820_v7, %v1829_v45  ;;  %vm2295_vm1 = vcmp.gt.f32.partialorder %v4810_v21, 0.0  ;;  %v1988_v10 = vmul.f32 %v5465_v42, %v1969_v38  ;;  %v34_v38 = vld [vmem:[%s4985_s1 + $0x28] sm:$0xff] }
 0x372   :  { %v2073_v20 = vsel %vm516_vm4, %v2051_v22, %v2063_v36  ;;  %v2079_v30 = vsel %vm516_vm4, %v2063_v36, %v2051_v22  ;;  %v2182_v2 = vadd.f32 %v2170_v53, %v2038_v57  ;;  %v1989_v11 = vmul.f32 %v5466_v59, %v1963_v15  ;;  %v5488_v36 = vld [vmem:[#allocation57_spill] sm:$0xff] }
 0x373   :  { %v2670_v16 = vpop.eup %2669  ;;  %v2086_v62 = vmul.f32 %v2079_v30, %v5352_v4  ;;  %v2087_v9 = vmul.f32 %v2073_v20, %v5353_v28  ;;  %vm2296_vm2 = vcmp.gt.f32.partialorder %v4813_v17, 0.0  ;;  %v2183_v7 = vadd.f32 %v2171_v23, %v2039_v44 }
 0x374   :  { %v2672_v25 = vpop.eup %2671  ;;  %v2555_v47 = vadd.f32 -1.0, %v2670_v16  ;;  %v2168_v42 = vmul.f32 %v2146_v27, %v5487_v19  ;;  %v1624_v48 = vadd.f32 %v1612_v32, %v4554_v34  ;;  %v1879_v24 = vmul.f32 %v5467_v8, %v1853_v5 }
 0x375   :  { %v2122_v52 = vmul.f32 %v4784_v51, %v2086_v62  ;;  %v2123_v46 = vmul.f32 %v4784_v51, %v2087_v9  ;;  %v2098_v56 = vpop.permute.xlu1 %2097  ;;  %v2556_v37 = vadd.f32 -1.0, %v2672_v25  ;;  %v1878_v51 = vmul.f32 %v5464_v35, %v1859_v61 }
 0x376   :  { %v2355_v58 = vsel %vm2295_vm1, %v4810_v21, %v2555_v47  ;;  %v1625_v59 = vadd.f32 %v1613_v14, %v4556_v40  ;;  %v2024_v31 = vmul.f32 %v5488_v36, %v1988_v10  ;;  %v1721_v34 = vadd.f32 %v1709_v6, %v4552_v33 }
 0x377   :  { %v2134_v45 = vadd.f32 %v2122_v52, %v1928_v41  ;;  %v2135_v54 = vadd.f32 %v2123_v46, %v1929_v29  ;;  %v2356_v0 = vsel %vm2296_vm2, %v4813_v17, %v2556_v37  ;;  %v5489_v17 = vld [vmem:[#allocation28_spill] sm:$0xff]  ;;  %v1720_v41 = vadd.f32 %v1708_v13, %v4550_v49 }
 0x378   :  { %2395 = vmatprep.subr.mxu1 %v2356_v0  ;;  %v2169_v3 = vmul.f32 %v2146_v27, %v5489_v17  ;;  %v2025_v35 = vmul.f32 %v5488_v36, %v1989_v11  ;;  %v1816_v8 = vadd.f32 %v1804_v50, %v1624_v48  ;;  %v1817_v32 = vadd.f32 %v1805_v1, %v1625_v59  ;;  %v33_v50 = vld [vmem:[%s4985_s1 + $0x20] sm:$0xff]  ;;  %v32_v0 = vld [vmem:[%s4985_s1 + $0x18] sm:$0xff] }
 0x379   :  { %v4924_v26 = vadd.f32 %v2182_v2, %v2134_v45  ;;  %v4926_v21 = vadd.f32 %v2183_v7, %v2135_v54  ;;  %2396 = vmatpush1.msra.mxu1 %v2355_v58  ;;  %v2049_v60 = vpop.permute.xlu1 %2048  ;;  %v1914_v57 = vmul.f32 %v4722_v39, %v1878_v51  ;;  %v1915_v44 = vmul.f32 %v4722_v39, %v1879_v24  ;;  %v31_v45 = vld [vmem:[%s4985_s1 + $0x10] sm:$0xff] }
 0x37a   :  { %vm2209_vm8 = vcmp.gt.f32.partialorder %v4863_v63, 0.0  ;;  %vm2208_vm9 = vcmp.gt.f32.partialorder %v4861_v12, 0.0  ;;  %v2036_v13 = vadd.f32 %v2024_v31, %v1816_v8  ;;  %v2037_v55 = vadd.f32 %v2025_v35, %v1817_v32 }
 0x37b   :  { %v2218_v40 = vmin.f32 %v4924_v26, 0.0  ;;  %v2219_v14 = vmin.f32 %v4926_v21, 0.0  ;;  %v1926_v23 = vadd.f32 %v1914_v57, %v1720_v41  ;;  %v1927_v62 = vadd.f32 %v1915_v44, %v1721_v34 }
 0x37c   :  { %v2674_v29 = vpop.eup %2673  ;;  %v2180_v61 = vadd.f32 %v2168_v42, %v2036_v13  ;;  %vm2207_vm10 = vcmp.gt.f32.partialorder %v4926_v21, 0.0 }
 0x37d   :  { %v2676_v49 = vpop.eup %2675  ;;  %v2232_v33 = vmul.f32 1.442695, %v2218_v40  ;;  %v2234_v6 = vmul.f32 1.442695, %v2219_v14  ;;  %v2061_v22 = vpop.permute.xlu1 %2060  ;;  %v2541_v1 = vadd.f32 -1.0, %v2674_v29  ;;  %v30_v14 = vld [vmem:[%s4985_s1 + $0x8] sm:$0xff] }
 0x37e   :  { %v2072_v53 = vsel %vm516_vm4, %v2049_v60, %v2061_v22  ;;  %v2078_v39 = vsel %vm516_vm4, %v2061_v22, %v2049_v60  ;;  %v2542_v20 = vadd.f32 -1.0, %v2676_v49  ;;  %vm2206_vm4 = vcmp.gt.f32.partialorder %v4924_v26, 0.0 }
 0x37f   :  { %2677 = vpow2.f32 %v2232_v33  ;;  %v2084_v30 = vmul.f32 %v2078_v39, %v5352_v4  ;;  %v2085_v16 = vmul.f32 %v2072_v53, %v5353_v28  ;;  %v2268_v43 = vsel %vm2208_vm9, %v4861_v12, %v2541_v1 }
 0x380   :  { %2679 = vpow2.f32 %v2234_v6  ;;  %v2269_v18 = vsel %vm2209_vm8, %v4863_v63, %v2542_v20  ;;  %v2280_v15 = vadd.f32 %v2268_v43, %v33_v50  ;;  %v2181_v4 = vadd.f32 %v2169_v3, %v2037_v55 }
 0x381   :  { %v2120_v9 = vmul.f32 %v2098_v56, %v2084_v30  ;;  %v2121_v25 = vmul.f32 %v2098_v56, %v2085_v16  ;;  %v2281_v5 = vadd.f32 %v2269_v18, %v34_v38 }
 0x382   :  { %v2305_v47 = vmin.f32 %v2280_v15, 0.0  ;;  %vm2293_vm11 = vcmp.gt.f32.partialorder %v2280_v15, 0.0 }
 0x383   :  { %v2132_v27 = vadd.f32 %v2120_v9, %v1926_v23  ;;  %v2133_v28 = vadd.f32 %v2121_v25, %v1927_v62  ;;  %v2306_v10 = vmin.f32 %v2281_v5, 0.0  ;;  %vm2294_vm12 = vcmp.gt.f32.partialorder %v2281_v5, 0.0  ;;  %v2288_v62 = vld [vmem:[%s4988_s4] sm:$0xff]  ;;  %s2704_s4 = scalar_lea.vmem %s2453_s8, 256 }
 0x384   :  { %v2321_v52 = vmul.f32 1.442695, %v2305_v47  ;;  %p2705_p0 = scmp.ne.s32.totalorder %s2453_s8, %s2704_s4  ;;  %p2710_p2 = scmp.lt.s32.totalorder %s2704_s4, %s2704_s4 }
 0x385   :  { %v2192_v46 = vadd.f32 %v2180_v61, %v2132_v27  ;;  %v2193_v12 = vadd.f32 %v2181_v4, %v2133_v28  ;;  %v2323_v37 = vmul.f32 1.442695, %v2306_v10  ;;  %v2702_v4 = vld [vmem:[%s4984_s0] sm:$0xff]  ;;  %v2703_v28 = vld [vmem:[%s4984_s0 + $0x8] sm:$0xff] }
 0x386   :  { %2681 = vpow2.f32 %v2321_v52  ;;  %p2711_p3 = por %p2710_p2, %p2709_p1 }
 0x387   :  { %v2216_v2 = vmin.f32 %v2192_v46, 0.0  ;;  %v2217_v11 = vmin.f32 %v2193_v12, 0.0  ;;  %2683 = vpow2.f32 %v2323_v37  ;;  %vm2204_vm15 = vcmp.gt.f32.partialorder %v2192_v46, 0.0 }
 0x388   :  { %vm2205_vm3 = vcmp.gt.f32.partialorder %v2193_v12, 0.0  ;;  %p2712_p4 = pnand %p2711_p3, %p2705_p0 }
 0x389   :  { %v2228_v63 = vmul.f32 1.442695, %v2216_v2  ;;  %v2230_v58 = vmul.f32 1.442695, %v2217_v11 }
 0x38b   :  { %2685 = vpow2.f32 %v2228_v63 }
 0x38c   :  { %v2678_v7 = vpop.eup %2677  ;;  %2687 = vpow2.f32 %v2230_v58 }
 0x38d   :  { %v2680_v56 = vpop.eup %2679  ;;  %v2539_v54 = vadd.f32 -1.0, %v2678_v7 }
 0x38e   :  { %v2540_v19 = vadd.f32 -1.0, %v2680_v56 }
 0x38f   :  { %v2266_v42 = vsel %vm2206_vm4, %v4924_v26, %v2539_v54 }
 0x390   :  { %v2267_v48 = vsel %vm2207_vm10, %v4926_v21, %v2540_v19  ;;  %v2278_v51 = vadd.f32 %v2266_v42, %v31_v45  ;;  %v29_v21 = vld [vmem:[%s4985_s1] sm:$0xff] }
 0x391   :  { %v2279_v24 = vadd.f32 %v2267_v48, %v32_v0 }
 0x392   :  { %v2303_v59 = vmin.f32 %v2278_v51, 0.0  ;;  %vm2291_vm13 = vcmp.gt.f32.partialorder %v2278_v51, 0.0 }
 0x393   :  { %v2682_v36 = vpop.eup %2681  ;;  %v2304_v31 = vmin.f32 %v2279_v24, 0.0  ;;  %vm2292_vm14 = vcmp.gt.f32.partialorder %v2279_v24, 0.0 }
 0x394   :  { %v2684_v60 = vpop.eup %2683  ;;  %v2553_v17 = vadd.f32 -1.0, %v2682_v36  ;;  %v2317_v3 = vmul.f32 1.442695, %v2303_v59 }
 0x395   :  { %v2554_v41 = vadd.f32 -1.0, %v2684_v60  ;;  %v2319_v34 = vmul.f32 1.442695, %v2304_v31 }
 0x396   :  { %v2353_v35 = vsel %vm2293_vm11, %v2280_v15, %v2553_v17  ;;  %2689 = vpow2.f32 %v2317_v3 }
 0x397   :  { %v2354_v8 = vsel %vm2294_vm12, %v2281_v5, %v2554_v41  ;;  %2691 = vpow2.f32 %v2319_v34 }
 0x398   :  { %v2686_v32 = vpop.eup %2685  ;;  %2397 = vmatprep.subr.mxu1 %v2354_v8 }
 0x399   :  { %v2688_v26 = vpop.eup %2687  ;;  %2398 = vmatpush1.msra.mxu1 %v2353_v35  ;;  %v2537_v40 = vadd.f32 -1.0, %v2686_v32 }
 0x39a   :  { %v2538_v29 = vadd.f32 -1.0, %v2688_v26 }
 0x39b   :  { %v2264_v57 = vsel %vm2204_vm15, %v2192_v46, %v2537_v40 }
 0x39c   :  { %v2265_v44 = vsel %vm2205_vm3, %v2193_v12, %v2538_v29  ;;  %v2276_v49 = vadd.f32 %v2264_v57, %v29_v21 }
 0x39d   :  { %v2277_v13 = vadd.f32 %v2265_v44, %v30_v14 }
 0x39e   :  { %v2301_v33 = vmin.f32 %v2276_v49, 0.0  ;;  %vm2289_vm5 = vcmp.gt.f32.partialorder %v2276_v49, 0.0 }
 0x39f   :  { %v2302_v6 = vmin.f32 %v2277_v13, 0.0  ;;  %vm2290_vm6 = vcmp.gt.f32.partialorder %v2277_v13, 0.0 }
 0x3a0   :  { %v2313_v22 = vmul.f32 1.442695, %v2301_v33 }
 0x3a1   :  { %v2315_v50 = vmul.f32 1.442695, %v2302_v6 }
 0x3a2   :  { %2693 = vpow2.f32 %v2313_v22 }
 0x3a3   :  { %v2690_v1 = vpop.eup %2689  ;;  %2695 = vpow2.f32 %v2315_v50 }
 0x3a4   :  { %v2692_v55 = vpop.eup %2691  ;;  %v2551_v53 = vadd.f32 -1.0, %v2690_v1 }
 0x3a5   :  { %v2552_v39 = vadd.f32 -1.0, %v2692_v55 }
 0x3a6   :  { %v2351_v38 = vsel %vm2291_vm13, %v2278_v51, %v2551_v53 }
 0x3a7   :  { %v2352_v20 = vsel %vm2292_vm14, %v2279_v24, %v2552_v39 }
 0x3a8   :  { %2399 = vmatprep.subr.mxu1 %v2352_v20 }
 0x3a9   :  { %2400 = vmatpush1.msra.mxu1 %v2351_v38 }
 0x3ad   :  { %v2365_v9 = vpop.permute.xlu0 %2364 }
 0x3af   :  { %v2694_v30 = vpop.eup %2693 }
 0x3b0   :  { %v2696_v16 = vpop.eup %2695  ;;  %v2549_v43 = vadd.f32 -1.0, %v2694_v30 }
 0x3b1   :  { %v2550_v23 = vadd.f32 -1.0, %v2696_v16 }
 0x3b2   :  { %v2349_v18 = vsel %vm2289_vm5, %v2276_v49, %v2549_v43 }
 0x3b3   :  { %v2350_v15 = vsel %vm2290_vm6, %v2277_v13, %v2550_v23 }
 0x3b4   :  { %2401 = vmatprep.subr.mxu1 %v2350_v15 }
 0x3b5   :  { %2402 = vmatpush1.msra.mxu1 %v2349_v18 }
 0x3b6   :  { %2561 = vmatmul.mubr.msk.f32.vlgmr.msra.gmra.mxu1 %vm2367_vm0, %v2288_v62 }
 0x476   :  { %v2437_v25 = vpop.f32.mrf.mxu1 }
 0x477   :  { %v2438_v5 = vadd.f32 %v2437_v25, %v2365_v9 }
 0x478   :  { %v2439_v61 = vpop.f32.mrf.mxu1 }
 0x479   :  { %v2440_v47 = vadd.f32 %v2439_v61, %v2365_v9  ;;  %v2442_v27 = vsub.f32 %v2702_v4, %v2438_v5 }
 0x47b   :  { %v2443_v10 = vsub.f32 %v2703_v28, %v2440_v47  ;;  %2444 = vst [vmem:[#allocation2] sm:$0xff] %v2442_v27 }
 0x47d   :  { %2445 = vst [vmem:[#allocation2 + $0x8] sm:$0xff] %v2443_v10 }
 0x47e   :  { %2715 = shalt.err (!%p2712_p4)
}
 0x47f   :  { %2455 = dma.vmem_to_hbm [thread:$0]  %s2453_s8, 256, %s4991_s7, [#allocation3]  }
 0x480   :  { %2724 = dma.done.wait [#allocation3], 256  }
 0x481   :  { %2725 = vsyncadd [#allocation3], 4294967040 }
 0x482   :  { %2459 = vsyncpa [#allocation3], 1 }

</bundles_post_ra>
